<compile_context>
chip_gen: v5e
topology: v5e:2x2
jax: 0.10.0
libtpu: 0.0.40
codegen_flags: <defaults>
</compile_context>

<pallas_src>
import jax
import jax.numpy as jnp
from jax.experimental import pallas as pl
from jax.experimental.pallas import tpu as pltpu

KSIZE = 7
PAD = 3          # padding = 3 for kernel_size = 7
NTAPS = KSIZE * KSIZE


def spatial_attention_kernel(x_ref, w_ref, o_ref,
                             sum_acc, max_acc, avg_pad, max_pad):
    # x_ref   : VMEM (C_TILE, H, W)  -- one channel tile of one batch element
    # w_ref   : SMEM (98,)           -- flat conv taps: [0:49] avg (pre-scaled by
    #                                   1/C), [49:98] max
    # o_ref   : VMEM (1, H, W)       -- attention map (written only at last c step)
    # sum_acc : VMEM (H, W) f32      -- running channel sum   (across c steps)
    # max_acc : VMEM (H, W) f32      -- running channel max   (across c steps)
    # avg_pad / max_pad : VMEM (H+6, W+6) f32 zero-padded conv inputs (finalize)
    CT, H, W = x_ref.shape
    c_idx = pl.program_id(1)
    n_c = pl.num_programs(1)

    # -- init running accumulators once per batch element ----------------------
    @pl.when(c_idx == 0)
    def _():
        sum_acc[...] = jnp.zeros(sum_acc.shape, sum_acc.dtype)
        max_acc[...] = jnp.full(max_acc.shape, -jnp.inf, max_acc.dtype)

    # -- streaming single-pass channel reduction over this tile ----------------
    def body(c, carry):
        s, m = carry
        xp = x_ref[c].astype(jnp.float32)        # one (H, W) plane, read once
        return s + xp, jnp.maximum(m, xp)

    unroll = True if CT <= 16 else 8
    s, m = jax.lax.fori_loop(0, CT, body, (sum_acc[...], max_acc[...]),
                             unroll=unroll)
    sum_acc[...] = s
    max_acc[...] = m

    # -- finalize: 7x7 conv over (avg, max) planes + sigmoid --------------------
    @pl.when(c_idx == n_c - 1)
    def _():
        avg_pad[...] = jnp.zeros(avg_pad.shape, avg_pad.dtype)
        max_pad[...] = jnp.zeros(max_pad.shape, max_pad.dtype)
        avg_pad[PAD:PAD + H, PAD:PAD + W] = sum_acc[...]   # 1/C lives in the taps
        max_pad[PAD:PAD + H, PAD:PAD + W] = max_acc[...]

        A = avg_pad[...]
        M = max_pad[...]
        acc = jnp.zeros((H, W), jnp.float32)
        # kw (lane) shift hoisted out of the kh (sublane) loop: 7 cross-lane
        # relayouts per plane instead of 49.
        for kw in range(KSIZE):
            a_kw = A[:, kw:kw + W]
            m_kw = M[:, kw:kw + W]
            for kh in range(KSIZE):
                w_avg = w_ref[kh * KSIZE + kw]            # scalars from SMEM
                w_max = w_ref[NTAPS + kh * KSIZE + kw]
                acc += w_avg * a_kw[kh:kh + H, :]          # sublane-offset slices
                acc += w_max * m_kw[kh:kh + H, :]

        o_ref[...] = jax.nn.sigmoid(acc).astype(o_ref.dtype)[None]


def _padded_plane_bytes(h, w, dtype):
    """VMEM footprint of an (h, w) plane including lane/sublane layout padding."""
    itemsize = jnp.dtype(dtype).itemsize
    sub = max(8, 32 // itemsize)          # 8 sublanes f32, 16 bf16, 32 int8
    hr = pl.cdiv(h, sub) * sub
    wr = pl.cdiv(w, 128) * 128
    return hr * wr * itemsize


def spatial_attention(x, weight):
    """x: (N, C, H, W); weight: (1, 2, 7, 7), bias-free -> (N, 1, H, W)."""
    N, C, H, W = x.shape
    assert weight.shape == (1, 2, KSIZE, KSIZE), weight.shape

    # Host-side weight prep: squeeze out-channel, fold 1/C into avg taps (the
    # conv is linear in avg, so a channel SUM in-kernel gives the exact mean
    # term), flatten to 1-D for SMEM (avoids 2-D SMEM padding).
    w = weight.reshape(2, NTAPS).astype(jnp.float32)
    w = w.at[0].multiply(1.0 / C)
    w = w.reshape(-1)                                   # (98,)

    # Generation-aware VMEM capacity (v5e/v6e: 128 MiB, v7x: 64 MiB).
    try:
        cap = int(pltpu.get_tpu_info().vmem_capacity_bytes)
    except Exception:
        cap = 64 * 1024 * 1024                          # conservative fallback
    budget = (3 * cap) // 4                             # headroom below physical

    pad_scratch = 2 * _padded_plane_bytes(H + 2 * PAD, W + 2 * PAD, jnp.float32)
    acc_scratch = 2 * _padded_plane_bytes(H, W, jnp.float32)
    out_bytes = 2 * _padded_plane_bytes(H, W, x.dtype)          # double-buffered

    def est(ct):
        return (2 * ct * _padded_plane_bytes(H, W, x.dtype)     # dbl-buffered in
                + out_bytes + pad_scratch + acc_scratch)

    # Largest divisor of C whose layout-padded, double-buffered block fits.
    c_tile = 1
    for d in range(1, C + 1):
        if C % d == 0 and est(d) <= budget:
            c_tile = d
    num_c = C // c_tile

    vmem_limit = min(cap, max(est(c_tile) + (4 << 20), 32 << 20))

    grid_spec = pltpu.PrefetchScalarGridSpec(
        num_scalar_prefetch=0,
        grid=(N, num_c),                  # channel (reduction) axis last
        in_specs=[
            pl.BlockSpec((pl.Squeezed(), c_tile, H, W),
                         lambda n, c: (n, c, 0, 0)),
            pl.BlockSpec(memory_space=pltpu.MemorySpace.SMEM),
        ],
        out_specs=pl.BlockSpec((pl.Squeezed(), 1, H, W),
                               lambda n, c: (n, 0, 0, 0)),
        scratch_shapes=[
            pltpu.VMEM((H, W), jnp.float32),                         # sum_acc
            pltpu.VMEM((H, W), jnp.float32),                         # max_acc
            pltpu.VMEM((H + 2 * PAD, W + 2 * PAD), jnp.float32),     # avg_pad
            pltpu.VMEM((H + 2 * PAD, W + 2 * PAD), jnp.float32),     # max_pad
        ],
    )

    return pl.pallas_call(
        spatial_attention_kernel,
        out_shape=jax.ShapeDtypeStruct((N, 1, H, W), x.dtype),
        grid_spec=grid_spec,
        compiler_params=pltpu.CompilerParams(
            dimension_semantics=("parallel", "arbitrary"),
            vmem_limit_bytes=int(vmem_limit),
        ),
    )(x, w)


def spatial_attention_ref(x, weight):
    """Pure-JAX reference mirroring the PyTorch forward."""
    avg = jnp.mean(x, axis=1, keepdims=True)
    mx = jnp.max(x, axis=1, keepdims=True)
    feat = jnp.concatenate([avg, mx], axis=1)           # (N, 2, H, W)
    y = jax.lax.conv_general_dilated(
        feat, weight, window_strides=(1, 1), padding=((PAD, PAD), (PAD, PAD)),
        dimension_numbers=("NCHW", "OIHW", "NCHW"))
    return jax.nn.sigmoid(y)


if __name__ == "__main__":
    key = jax.random.PRNGKey(0)
    kx, kw = jax.random.split(key)

    # Small shapes consistent with the module's forward.
    N, C, H, W = 2, 4, 16, 16
    x = jax.random.normal(kx, (N, C, H, W), dtype=jnp.float32)
    # Deterministic synthetic conv1 weight: Conv2d(2, 1, 7, bias=False) -> (1, 2, 7, 7)
    fan_in = 2 * KSIZE * KSIZE
    weight = jax.random.normal(kw, (1, 2, KSIZE, KSIZE), dtype=jnp.float32) / jnp.sqrt(fan_in)

    out = spatial_attention(x, weight)
    out = jax.block_until_ready(out)

    ref = spatial_attention_ref(x, weight)
    assert out.shape == (N, 1, H, W), out.shape
    assert jnp.allclose(out, ref, atol=1e-5, rtol=1e-5), float(jnp.max(jnp.abs(out - ref)))

    print("KERNEL_OK")
</pallas_src>

<mosaic_0001>
module attributes {stable_mosaic.version = 11 : i64} {
  func.func @spatial_attention_kernel(%arg0: i32, %arg1: i32, %arg2: memref<1x4x16x16xf32, #tpu.memory_space<vmem>>, %arg3: memref<98xf32, #tpu.memory_space<smem>>, %arg4: memref<1x1x16x16xf32, #tpu.memory_space<vmem>>, %arg5: memref<16x16xf32, #tpu.memory_space<vmem>>, %arg6: memref<16x16xf32, #tpu.memory_space<vmem>>, %arg7: memref<22x22xf32, #tpu.memory_space<vmem>>, %arg8: memref<22x22xf32, #tpu.memory_space<vmem>>) attributes {dimension_semantics = [#tpu.dimension_semantics<parallel>, #tpu.dimension_semantics<arbitrary>], iteration_bounds = array<i64: 2, 1>, scalar_prefetch = 0 : i64, scratch_operands = 4 : i64, tpu.core_type = #tpu.core_type<tc>, window_params = [{transform_indices = @transform_0, window_bounds = array<i64: 1, 4, 16, 16>}, {transform_indices = @transform_1, window_bounds = array<i64: 98>}, {transform_indices = @transform_2, window_bounds = array<i64: 1, 1, 16, 16>}]} {
    %c0_i32 = arith.constant 0 : i32
    %0 = arith.cmpi eq, %arg1, %c0_i32 : i32
    %1 = arith.extui %0 : i1 to i32
    %c0_i32_0 = arith.constant 0 : i32
    %2 = arith.cmpi ne, %1, %c0_i32_0 : i32
    scf.if %2 {
      %cst = arith.constant 0.000000e+00 : f32
      %30 = vector.broadcast %cst : f32 to vector<16x16xf32>
      %c0_23 = arith.constant 0 : index
      %c0_24 = arith.constant 0 : index
      %31 = vector.load %arg5[%c0_23, %c0_24] : memref<16x16xf32, #tpu.memory_space<vmem>>, vector<16x16xf32>
      tpu.vector_store %arg5[%c0_23, %c0_24], %30 {strides = array<i32>} : memref<16x16xf32, #tpu.memory_space<vmem>>, vector<16x16xf32>,
      %cst_25 = arith.constant 0xFF800000 : f32
      %32 = vector.broadcast %cst_25 : f32 to vector<16x16xf32>
      %c0_26 = arith.constant 0 : index
      %c0_27 = arith.constant 0 : index
      %33 = vector.load %arg6[%c0_26, %c0_27] : memref<16x16xf32, #tpu.memory_space<vmem>>, vector<16x16xf32>
      tpu.vector_store %arg6[%c0_26, %c0_27], %32 {strides = array<i32>} : memref<16x16xf32, #tpu.memory_space<vmem>>, vector<16x16xf32>,
    } else {
    }
    %c0 = arith.constant 0 : index
    %c0_1 = arith.constant 0 : index
    %3 = vector.load %arg5[%c0, %c0_1] : memref<16x16xf32, #tpu.memory_space<vmem>>, vector<16x16xf32>
    %c0_2 = arith.constant 0 : index
    %c0_3 = arith.constant 0 : index
    %4 = vector.load %arg6[%c0_2, %c0_3] : memref<16x16xf32, #tpu.memory_space<vmem>>, vector<16x16xf32>
    %c0_i32_4 = arith.constant 0 : i32
    %c0_5 = arith.constant 0 : index
    %5 = arith.index_cast %c0_i32_4 : i32 to index
    %c0_6 = arith.constant 0 : index
    %c0_7 = arith.constant 0 : index
    %6 = vector.load %arg2[%c0_5, %5, %c0_6, %c0_7] : memref<1x4x16x16xf32, #tpu.memory_space<vmem>>, vector<1x1x16x16xf32>
    %7 = vector.shape_cast %6 : vector<1x1x16x16xf32> to vector<16x16xf32>
    %8 = arith.addf %3, %7 : vector<16x16xf32>
    %9 = arith.maximumf %4, %7 : vector<16x16xf32>
    %c1_i32 = arith.constant 1 : i32
    %c0_8 = arith.constant 0 : index
    %10 = arith.index_cast %c1_i32 : i32 to index
    %c0_9 = arith.constant 0 : index
    %c0_10 = arith.constant 0 : index
    %11 = vector.load %arg2[%c0_8, %10, %c0_9, %c0_10] : memref<1x4x16x16xf32, #tpu.memory_space<vmem>>, vector<1x1x16x16xf32>
    %12 = vector.shape_cast %11 : vector<1x1x16x16xf32> to vector<16x16xf32>
    %13 = arith.addf %8, %12 : vector<16x16xf32>
    %14 = arith.maximumf %9, %12 : vector<16x16xf32>
    %c2_i32 = arith.constant 2 : i32
    %c0_11 = arith.constant 0 : index
    %15 = arith.index_cast %c2_i32 : i32 to index
    %c0_12 = arith.constant 0 : index
    %c0_13 = arith.constant 0 : index
    %16 = vector.load %arg2[%c0_11, %15, %c0_12, %c0_13] : memref<1x4x16x16xf32, #tpu.memory_space<vmem>>, vector<1x1x16x16xf32>
    %17 = vector.shape_cast %16 : vector<1x1x16x16xf32> to vector<16x16xf32>
    %18 = arith.addf %13, %17 : vector<16x16xf32>
    %19 = arith.maximumf %14, %17 : vector<16x16xf32>
    %c3_i32 = arith.constant 3 : i32
    %c0_14 = arith.constant 0 : index
    %20 = arith.index_cast %c3_i32 : i32 to index
    %c0_15 = arith.constant 0 : index
    %c0_16 = arith.constant 0 : index
    %21 = vector.load %arg2[%c0_14, %20, %c0_15, %c0_16] : memref<1x4x16x16xf32, #tpu.memory_space<vmem>>, vector<1x1x16x16xf32>
    %22 = vector.shape_cast %21 : vector<1x1x16x16xf32> to vector<16x16xf32>
    %23 = arith.addf %18, %22 : vector<16x16xf32>
    %24 = arith.maximumf %19, %22 : vector<16x16xf32>
    %c4_i32 = arith.constant 4 : i32
    %c0_17 = arith.constant 0 : index
    %c0_18 = arith.constant 0 : index
    %25 = vector.load %arg5[%c0_17, %c0_18] : memref<16x16xf32, #tpu.memory_space<vmem>>, vector<16x16xf32>
    tpu.vector_store %arg5[%c0_17, %c0_18], %23 {strides = array<i32>} : memref<16x16xf32, #tpu.memory_space<vmem>>, vector<16x16xf32>,
    %c0_19 = arith.constant 0 : index
    %c0_20 = arith.constant 0 : index
    %26 = vector.load %arg6[%c0_19, %c0_20] : memref<16x16xf32, #tpu.memory_space<vmem>>, vector<16x16xf32>
    tpu.vector_store %arg6[%c0_19, %c0_20], %24 {strides = array<i32>} : memref<16x16xf32, #tpu.memory_space<vmem>>, vector<16x16xf32>,
    %c0_i32_21 = arith.constant 0 : i32
    %27 = arith.cmpi eq, %arg1, %c0_i32_21 : i32
    %28 = arith.extui %27 : i1 to i32
    %c0_i32_22 = arith.constant 0 : i32
    %29 = arith.cmpi ne, %28, %c0_i32_22 : i32
    scf.if %29 {
      %cst = arith.constant 0.000000e+00 : f32
      %30 = vector.broadcast %cst : f32 to vector<22x22xf32>
      %c0_23 = arith.constant 0 : index
      %c0_24 = arith.constant 0 : index
      %31 = vector.load %arg7[%c0_23, %c0_24] : memref<22x22xf32, #tpu.memory_space<vmem>>, vector<22x22xf32>
      tpu.vector_store %arg7[%c0_23, %c0_24], %30 {strides = array<i32>} : memref<22x22xf32, #tpu.memory_space<vmem>>, vector<22x22xf32>,
      %cst_25 = arith.constant 0.000000e+00 : f32
      %32 = vector.broadcast %cst_25 : f32 to vector<22x22xf32>
      %c0_26 = arith.constant 0 : index
      %c0_27 = arith.constant 0 : index
      %33 = vector.load %arg8[%c0_26, %c0_27] : memref<22x22xf32, #tpu.memory_space<vmem>>, vector<22x22xf32>
      tpu.vector_store %arg8[%c0_26, %c0_27], %32 {strides = array<i32>} : memref<22x22xf32, #tpu.memory_space<vmem>>, vector<22x22xf32>,
      %c0_28 = arith.constant 0 : index
      %c0_29 = arith.constant 0 : index
      %34 = vector.load %arg5[%c0_28, %c0_29] : memref<16x16xf32, #tpu.memory_space<vmem>>, vector<16x16xf32>
      %c3 = arith.constant 3 : index
      %c3_30 = arith.constant 3 : index
      %35 = vector.load %arg7[%c3, %c3_30] : memref<22x22xf32, #tpu.memory_space<vmem>>, vector<16x16xf32>
      tpu.vector_store %arg7[%c3, %c3_30], %34 {strides = array<i32>} : memref<22x22xf32, #tpu.memory_space<vmem>>, vector<16x16xf32>,
      %c0_31 = arith.constant 0 : index
      %c0_32 = arith.constant 0 : index
      %36 = vector.load %arg6[%c0_31, %c0_32] : memref<16x16xf32, #tpu.memory_space<vmem>>, vector<16x16xf32>
      %c3_33 = arith.constant 3 : index
      %c3_34 = arith.constant 3 : index
      %37 = vector.load %arg8[%c3_33, %c3_34] : memref<22x22xf32, #tpu.memory_space<vmem>>, vector<16x16xf32>
      tpu.vector_store %arg8[%c3_33, %c3_34], %36 {strides = array<i32>} : memref<22x22xf32, #tpu.memory_space<vmem>>, vector<16x16xf32>,
      %c0_35 = arith.constant 0 : index
      %c0_36 = arith.constant 0 : index
      %38 = vector.load %arg7[%c0_35, %c0_36] : memref<22x22xf32, #tpu.memory_space<vmem>>, vector<22x22xf32>
      %c0_37 = arith.constant 0 : index
      %c0_38 = arith.constant 0 : index
      %39 = vector.load %arg8[%c0_37, %c0_38] : memref<22x22xf32, #tpu.memory_space<vmem>>, vector<22x22xf32>
      %cst_39 = arith.constant 0.000000e+00 : f32
      %40 = vector.broadcast %cst_39 : f32 to vector<16x16xf32>
      %41 = vector.extract_strided_slice %38 {offsets = [0, 0], sizes = [22, 16], strides = [1, 1]} : vector<22x22xf32> to vector<22x16xf32>
      %42 = vector.extract_strided_slice %39 {offsets = [0, 0], sizes = [22, 16], strides = [1, 1]} : vector<22x22xf32> to vector<22x16xf32>
      %c0_40 = arith.constant 0 : index
      %43 = memref.load %arg3[%c0_40] : memref<98xf32, #tpu.memory_space<smem>>
      %c49 = arith.constant 49 : index
      %44 = memref.load %arg3[%c49] : memref<98xf32, #tpu.memory_space<smem>>
      %45 = vector.extract_strided_slice %41 {offsets = [0, 0], sizes = [16, 16], strides = [1, 1]} : vector<22x16xf32> to vector<16x16xf32>
      %46 = vector.broadcast %43 : f32 to vector<16x16xf32>
      %47 = arith.mulf %46, %45 : vector<16x16xf32>
      %48 = arith.addf %40, %47 : vector<16x16xf32>
      %49 = vector.extract_strided_slice %42 {offsets = [0, 0], sizes = [16, 16], strides = [1, 1]} : vector<22x16xf32> to vector<16x16xf32>
      %50 = vector.broadcast %44 : f32 to vector<16x16xf32>
      %51 = arith.mulf %50, %49 : vector<16x16xf32>
      %52 = arith.addf %48, %51 : vector<16x16xf32>
      %c7 = arith.constant 7 : index
      %53 = memref.load %arg3[%c7] : memref<98xf32, #tpu.memory_space<smem>>
      %c56 = arith.constant 56 : index
      %54 = memref.load %arg3[%c56] : memref<98xf32, #tpu.memory_space<smem>>
      %55 = vector.extract_strided_slice %41 {offsets = [1, 0], sizes = [16, 16], strides = [1, 1]} : vector<22x16xf32> to vector<16x16xf32>
      %56 = vector.broadcast %53 : f32 to vector<16x16xf32>
      %57 = arith.mulf %56, %55 : vector<16x16xf32>
      %58 = arith.addf %52, %57 : vector<16x16xf32>
      %59 = vector.extract_strided_slice %42 {offsets = [1, 0], sizes = [16, 16], strides = [1, 1]} : vector<22x16xf32> to vector<16x16xf32>
      %60 = vector.broadcast %54 : f32 to vector<16x16xf32>
      %61 = arith.mulf %60, %59 : vector<16x16xf32>
      %62 = arith.addf %58, %61 : vector<16x16xf32>
      %c14 = arith.constant 14 : index
      %63 = memref.load %arg3[%c14] : memref<98xf32, #tpu.memory_space<smem>>
      %c63 = arith.constant 63 : index
      %64 = memref.load %arg3[%c63] : memref<98xf32, #tpu.memory_space<smem>>
      %65 = vector.extract_strided_slice %41 {offsets = [2, 0], sizes = [16, 16], strides = [1, 1]} : vector<22x16xf32> to vector<16x16xf32>
      %66 = vector.broadcast %63 : f32 to vector<16x16xf32>
      %67 = arith.mulf %66, %65 : vector<16x16xf32>
      %68 = arith.addf %62, %67 : vector<16x16xf32>
      %69 = vector.extract_strided_slice %42 {offsets = [2, 0], sizes = [16, 16], strides = [1, 1]} : vector<22x16xf32> to vector<16x16xf32>
      %70 = vector.broadcast %64 : f32 to vector<16x16xf32>
      %71 = arith.mulf %70, %69 : vector<16x16xf32>
      %72 = arith.addf %68, %71 : vector<16x16xf32>
      %c21 = arith.constant 21 : index
      %73 = memref.load %arg3[%c21] : memref<98xf32, #tpu.memory_space<smem>>
      %c70 = arith.constant 70 : index
      %74 = memref.load %arg3[%c70] : memref<98xf32, #tpu.memory_space<smem>>
      %75 = vector.extract_strided_slice %41 {offsets = [3, 0], sizes = [16, 16], strides = [1, 1]} : vector<22x16xf32> to vector<16x16xf32>
      %76 = vector.broadcast %73 : f32 to vector<16x16xf32>
      %77 = arith.mulf %76, %75 : vector<16x16xf32>
      %78 = arith.addf %72, %77 : vector<16x16xf32>
      %79 = vector.extract_strided_slice %42 {offsets = [3, 0], sizes = [16, 16], strides = [1, 1]} : vector<22x16xf32> to vector<16x16xf32>
      %80 = vector.broadcast %74 : f32 to vector<16x16xf32>
      %81 = arith.mulf %80, %79 : vector<16x16xf32>
      %82 = arith.addf %78, %81 : vector<16x16xf32>
      %c28 = arith.constant 28 : index
      %83 = memref.load %arg3[%c28] : memref<98xf32, #tpu.memory_space<smem>>
      %c77 = arith.constant 77 : index
      %84 = memref.load %arg3[%c77] : memref<98xf32, #tpu.memory_space<smem>>
      %85 = vector.extract_strided_slice %41 {offsets = [4, 0], sizes = [16, 16], strides = [1, 1]} : vector<22x16xf32> to vector<16x16xf32>
      %86 = vector.broadcast %83 : f32 to vector<16x16xf32>
      %87 = arith.mulf %86, %85 : vector<16x16xf32>
      %88 = arith.addf %82, %87 : vector<16x16xf32>
      %89 = vector.extract_strided_slice %42 {offsets = [4, 0], sizes = [16, 16], strides = [1, 1]} : vector<22x16xf32> to vector<16x16xf32>
      %90 = vector.broadcast %84 : f32 to vector<16x16xf32>
      %91 = arith.mulf %90, %89 : vector<16x16xf32>
      %92 = arith.addf %88, %91 : vector<16x16xf32>
      %c35 = arith.constant 35 : index
      %93 = memref.load %arg3[%c35] : memref<98xf32, #tpu.memory_space<smem>>
      %c84 = arith.constant 84 : index
      %94 = memref.load %arg3[%c84] : memref<98xf32, #tpu.memory_space<smem>>
      %95 = vector.extract_strided_slice %41 {offsets = [5, 0], sizes = [16, 16], strides = [1, 1]} : vector<22x16xf32> to vector<16x16xf32>
      %96 = vector.broadcast %93 : f32 to vector<16x16xf32>
      %97 = arith.mulf %96, %95 : vector<16x16xf32>
      %98 = arith.addf %92, %97 : vector<16x16xf32>
      %99 = vector.extract_strided_slice %42 {offsets = [5, 0], sizes = [16, 16], strides = [1, 1]} : vector<22x16xf32> to vector<16x16xf32>
      %100 = vector.broadcast %94 : f32 to vector<16x16xf32>
      %101 = arith.mulf %100, %99 : vector<16x16xf32>
      %102 = arith.addf %98, %101 : vector<16x16xf32>
      %c42 = arith.constant 42 : index
      %103 = memref.load %arg3[%c42] : memref<98xf32, #tpu.memory_space<smem>>
      %c91 = arith.constant 91 : index
      %104 = memref.load %arg3[%c91] : memref<98xf32, #tpu.memory_space<smem>>
      %105 = vector.extract_strided_slice %41 {offsets = [6, 0], sizes = [16, 16], strides = [1, 1]} : vector<22x16xf32> to vector<16x16xf32>
      %106 = vector.broadcast %103 : f32 to vector<16x16xf32>
      %107 = arith.mulf %106, %105 : vector<16x16xf32>
      %108 = arith.addf %102, %107 : vector<16x16xf32>
      %109 = vector.extract_strided_slice %42 {offsets = [6, 0], sizes = [16, 16], strides = [1, 1]} : vector<22x16xf32> to vector<16x16xf32>
      %110 = vector.broadcast %104 : f32 to vector<16x16xf32>
      %111 = arith.mulf %110, %109 : vector<16x16xf32>
      %112 = arith.addf %108, %111 : vector<16x16xf32>
      %113 = vector.extract_strided_slice %38 {offsets = [0, 1], sizes = [22, 16], strides = [1, 1]} : vector<22x22xf32> to vector<22x16xf32>
      %114 = vector.extract_strided_slice %39 {offsets = [0, 1], sizes = [22, 16], strides = [1, 1]} : vector<22x22xf32> to vector<22x16xf32>
      %c1 = arith.constant 1 : index
      %115 = memref.load %arg3[%c1] : memref<98xf32, #tpu.memory_space<smem>>
      %c50 = arith.constant 50 : index
      %116 = memref.load %arg3[%c50] : memref<98xf32, #tpu.memory_space<smem>>
      %117 = vector.extract_strided_slice %113 {offsets = [0, 0], sizes = [16, 16], strides = [1, 1]} : vector<22x16xf32> to vector<16x16xf32>
      %118 = vector.broadcast %115 : f32 to vector<16x16xf32>
      %119 = arith.mulf %118, %117 : vector<16x16xf32>
      %120 = arith.addf %112, %119 : vector<16x16xf32>
      %121 = vector.extract_strided_slice %114 {offsets = [0, 0], sizes = [16, 16], strides = [1, 1]} : vector<22x16xf32> to vector<16x16xf32>
      %122 = vector.broadcast %116 : f32 to vector<16x16xf32>
      %123 = arith.mulf %122, %121 : vector<16x16xf32>
      %124 = arith.addf %120, %123 : vector<16x16xf32>
      %c8 = arith.constant 8 : index
      %125 = memref.load %arg3[%c8] : memref<98xf32, #tpu.memory_space<smem>>
      %c57 = arith.constant 57 : index
      %126 = memref.load %arg3[%c57] : memref<98xf32, #tpu.memory_space<smem>>
      %127 = vector.extract_strided_slice %113 {offsets = [1, 0], sizes = [16, 16], strides = [1, 1]} : vector<22x16xf32> to vector<16x16xf32>
      %128 = vector.broadcast %125 : f32 to vector<16x16xf32>
      %129 = arith.mulf %128, %127 : vector<16x16xf32>
      %130 = arith.addf %124, %129 : vector<16x16xf32>
      %131 = vector.extract_strided_slice %114 {offsets = [1, 0], sizes = [16, 16], strides = [1, 1]} : vector<22x16xf32> to vector<16x16xf32>
      %132 = vector.broadcast %126 : f32 to vector<16x16xf32>
      %133 = arith.mulf %132, %131 : vector<16x16xf32>
      %134 = arith.addf %130, %133 : vector<16x16xf32>
      %c15 = arith.constant 15 : index
      %135 = memref.load %arg3[%c15] : memref<98xf32, #tpu.memory_space<smem>>
      %c64 = arith.constant 64 : index
      %136 = memref.load %arg3[%c64] : memref<98xf32, #tpu.memory_space<smem>>
      %137 = vector.extract_strided_slice %113 {offsets = [2, 0], sizes = [16, 16], strides = [1, 1]} : vector<22x16xf32> to vector<16x16xf32>
      %138 = vector.broadcast %135 : f32 to vector<16x16xf32>
      %139 = arith.mulf %138, %137 : vector<16x16xf32>
      %140 = arith.addf %134, %139 : vector<16x16xf32>
      %141 = vector.extract_strided_slice %114 {offsets = [2, 0], sizes = [16, 16], strides = [1, 1]} : vector<22x16xf32> to vector<16x16xf32>
      %142 = vector.broadcast %136 : f32 to vector<16x16xf32>
      %143 = arith.mulf %142, %141 : vector<16x16xf32>
      %144 = arith.addf %140, %143 : vector<16x16xf32>
      %c22 = arith.constant 22 : index
      %145 = memref.load %arg3[%c22] : memref<98xf32, #tpu.memory_space<smem>>
      %c71 = arith.constant 71 : index
      %146 = memref.load %arg3[%c71] : memref<98xf32, #tpu.memory_space<smem>>
      %147 = vector.extract_strided_slice %113 {offsets = [3, 0], sizes = [16, 16], strides = [1, 1]} : vector<22x16xf32> to vector<16x16xf32>
      %148 = vector.broadcast %145 : f32 to vector<16x16xf32>
      %149 = arith.mulf %148, %147 : vector<16x16xf32>
      %150 = arith.addf %144, %149 : vector<16x16xf32>
      %151 = vector.extract_strided_slice %114 {offsets = [3, 0], sizes = [16, 16], strides = [1, 1]} : vector<22x16xf32> to vector<16x16xf32>
      %152 = vector.broadcast %146 : f32 to vector<16x16xf32>
      %153 = arith.mulf %152, %151 : vector<16x16xf32>
      %154 = arith.addf %150, %153 : vector<16x16xf32>
      %c29 = arith.constant 29 : index
      %155 = memref.load %arg3[%c29] : memref<98xf32, #tpu.memory_space<smem>>
      %c78 = arith.constant 78 : index
      %156 = memref.load %arg3[%c78] : memref<98xf32, #tpu.memory_space<smem>>
      %157 = vector.extract_strided_slice %113 {offsets = [4, 0], sizes = [16, 16], strides = [1, 1]} : vector<22x16xf32> to vector<16x16xf32>
      %158 = vector.broadcast %155 : f32 to vector<16x16xf32>
      %159 = arith.mulf %158, %157 : vector<16x16xf32>
      %160 = arith.addf %154, %159 : vector<16x16xf32>
      %161 = vector.extract_strided_slice %114 {offsets = [4, 0], sizes = [16, 16], strides = [1, 1]} : vector<22x16xf32> to vector<16x16xf32>
      %162 = vector.broadcast %156 : f32 to vector<16x16xf32>
      %163 = arith.mulf %162, %161 : vector<16x16xf32>
      %164 = arith.addf %160, %163 : vector<16x16xf32>
      %c36 = arith.constant 36 : index
      %165 = memref.load %arg3[%c36] : memref<98xf32, #tpu.memory_space<smem>>
      %c85 = arith.constant 85 : index
      %166 = memref.load %arg3[%c85] : memref<98xf32, #tpu.memory_space<smem>>
      %167 = vector.extract_strided_slice %113 {offsets = [5, 0], sizes = [16, 16], strides = [1, 1]} : vector<22x16xf32> to vector<16x16xf32>
      %168 = vector.broadcast %165 : f32 to vector<16x16xf32>
      %169 = arith.mulf %168, %167 : vector<16x16xf32>
      %170 = arith.addf %164, %169 : vector<16x16xf32>
      %171 = vector.extract_strided_slice %114 {offsets = [5, 0], sizes = [16, 16], strides = [1, 1]} : vector<22x16xf32> to vector<16x16xf32>
      %172 = vector.broadcast %166 : f32 to vector<16x16xf32>
      %173 = arith.mulf %172, %171 : vector<16x16xf32>
      %174 = arith.addf %170, %173 : vector<16x16xf32>
      %c43 = arith.constant 43 : index
      %175 = memref.load %arg3[%c43] : memref<98xf32, #tpu.memory_space<smem>>
      %c92 = arith.constant 92 : index
      %176 = memref.load %arg3[%c92] : memref<98xf32, #tpu.memory_space<smem>>
      %177 = vector.extract_strided_slice %113 {offsets = [6, 0], sizes = [16, 16], strides = [1, 1]} : vector<22x16xf32> to vector<16x16xf32>
      %178 = vector.broadcast %175 : f32 to vector<16x16xf32>
      %179 = arith.mulf %178, %177 : vector<16x16xf32>
      %180 = arith.addf %174, %179 : vector<16x16xf32>
      %181 = vector.extract_strided_slice %114 {offsets = [6, 0], sizes = [16, 16], strides = [1, 1]} : vector<22x16xf32> to vector<16x16xf32>
      %182 = vector.broadcast %176 : f32 to vector<16x16xf32>
      %183 = arith.mulf %182, %181 : vector<16x16xf32>
      %184 = arith.addf %180, %183 : vector<16x16xf32>
      %185 = vector.extract_strided_slice %38 {offsets = [0, 2], sizes = [22, 16], strides = [1, 1]} : vector<22x22xf32> to vector<22x16xf32>
      %186 = vector.extract_strided_slice %39 {offsets = [0, 2], sizes = [22, 16], strides = [1, 1]} : vector<22x22xf32> to vector<22x16xf32>
      %c2 = arith.constant 2 : index
      %187 = memref.load %arg3[%c2] : memref<98xf32, #tpu.memory_space<smem>>
      %c51 = arith.constant 51 : index
      %188 = memref.load %arg3[%c51] : memref<98xf32, #tpu.memory_space<smem>>
      %189 = vector.extract_strided_slice %185 {offsets = [0, 0], sizes = [16, 16], strides = [1, 1]} : vector<22x16xf32> to vector<16x16xf32>
      %190 = vector.broadcast %187 : f32 to vector<16x16xf32>
      %191 = arith.mulf %190, %189 : vector<16x16xf32>
      %192 = arith.addf %184, %191 : vector<16x16xf32>
      %193 = vector.extract_strided_slice %186 {offsets = [0, 0], sizes = [16, 16], strides = [1, 1]} : vector<22x16xf32> to vector<16x16xf32>
      %194 = vector.broadcast %188 : f32 to vector<16x16xf32>
      %195 = arith.mulf %194, %193 : vector<16x16xf32>
      %196 = arith.addf %192, %195 : vector<16x16xf32>
      %c9 = arith.constant 9 : index
      %197 = memref.load %arg3[%c9] : memref<98xf32, #tpu.memory_space<smem>>
      %c58 = arith.constant 58 : index
      %198 = memref.load %arg3[%c58] : memref<98xf32, #tpu.memory_space<smem>>
      %199 = vector.extract_strided_slice %185 {offsets = [1, 0], sizes = [16, 16], strides = [1, 1]} : vector<22x16xf32> to vector<16x16xf32>
      %200 = vector.broadcast %197 : f32 to vector<16x16xf32>
      %201 = arith.mulf %200, %199 : vector<16x16xf32>
      %202 = arith.addf %196, %201 : vector<16x16xf32>
      %203 = vector.extract_strided_slice %186 {offsets = [1, 0], sizes = [16, 16], strides = [1, 1]} : vector<22x16xf32> to vector<16x16xf32>
      %204 = vector.broadcast %198 : f32 to vector<16x16xf32>
      %205 = arith.mulf %204, %203 : vector<16x16xf32>
      %206 = arith.addf %202, %205 : vector<16x16xf32>
      %c16 = arith.constant 16 : index
      %207 = memref.load %arg3[%c16] : memref<98xf32, #tpu.memory_space<smem>>
      %c65 = arith.constant 65 : index
      %208 = memref.load %arg3[%c65] : memref<98xf32, #tpu.memory_space<smem>>
      %209 = vector.extract_strided_slice %185 {offsets = [2, 0], sizes = [16, 16], strides = [1, 1]} : vector<22x16xf32> to vector<16x16xf32>
      %210 = vector.broadcast %207 : f32 to vector<16x16xf32>
      %211 = arith.mulf %210, %209 : vector<16x16xf32>
      %212 = arith.addf %206, %211 : vector<16x16xf32>
      %213 = vector.extract_strided_slice %186 {offsets = [2, 0], sizes = [16, 16], strides = [1, 1]} : vector<22x16xf32> to vector<16x16xf32>
      %214 = vector.broadcast %208 : f32 to vector<16x16xf32>
      %215 = arith.mulf %214, %213 : vector<16x16xf32>
      %216 = arith.addf %212, %215 : vector<16x16xf32>
      %c23 = arith.constant 23 : index
      %217 = memref.load %arg3[%c23] : memref<98xf32, #tpu.memory_space<smem>>
      %c72 = arith.constant 72 : index
      %218 = memref.load %arg3[%c72] : memref<98xf32, #tpu.memory_space<smem>>
      %219 = vector.extract_strided_slice %185 {offsets = [3, 0], sizes = [16, 16], strides = [1, 1]} : vector<22x16xf32> to vector<16x16xf32>
      %220 = vector.broadcast %217 : f32 to vector<16x16xf32>
      %221 = arith.mulf %220, %219 : vector<16x16xf32>
      %222 = arith.addf %216, %221 : vector<16x16xf32>
      %223 = vector.extract_strided_slice %186 {offsets = [3, 0], sizes = [16, 16], strides = [1, 1]} : vector<22x16xf32> to vector<16x16xf32>
      %224 = vector.broadcast %218 : f32 to vector<16x16xf32>
      %225 = arith.mulf %224, %223 : vector<16x16xf32>
      %226 = arith.addf %222, %225 : vector<16x16xf32>
      %c30 = arith.constant 30 : index
      %227 = memref.load %arg3[%c30] : memref<98xf32, #tpu.memory_space<smem>>
      %c79 = arith.constant 79 : index
      %228 = memref.load %arg3[%c79] : memref<98xf32, #tpu.memory_space<smem>>
      %229 = vector.extract_strided_slice %185 {offsets = [4, 0], sizes = [16, 16], strides = [1, 1]} : vector<22x16xf32> to vector<16x16xf32>
      %230 = vector.broadcast %227 : f32 to vector<16x16xf32>
      %231 = arith.mulf %230, %229 : vector<16x16xf32>
      %232 = arith.addf %226, %231 : vector<16x16xf32>
      %233 = vector.extract_strided_slice %186 {offsets = [4, 0], sizes = [16, 16], strides = [1, 1]} : vector<22x16xf32> to vector<16x16xf32>
      %234 = vector.broadcast %228 : f32 to vector<16x16xf32>
      %235 = arith.mulf %234, %233 : vector<16x16xf32>
      %236 = arith.addf %232, %235 : vector<16x16xf32>
      %c37 = arith.constant 37 : index
      %237 = memref.load %arg3[%c37] : memref<98xf32, #tpu.memory_space<smem>>
      %c86 = arith.constant 86 : index
      %238 = memref.load %arg3[%c86] : memref<98xf32, #tpu.memory_space<smem>>
      %239 = vector.extract_strided_slice %185 {offsets = [5, 0], sizes = [16, 16], strides = [1, 1]} : vector<22x16xf32> to vector<16x16xf32>
      %240 = vector.broadcast %237 : f32 to vector<16x16xf32>
      %241 = arith.mulf %240, %239 : vector<16x16xf32>
      %242 = arith.addf %236, %241 : vector<16x16xf32>
      %243 = vector.extract_strided_slice %186 {offsets = [5, 0], sizes = [16, 16], strides = [1, 1]} : vector<22x16xf32> to vector<16x16xf32>
      %244 = vector.broadcast %238 : f32 to vector<16x16xf32>
      %245 = arith.mulf %244, %243 : vector<16x16xf32>
      %246 = arith.addf %242, %245 : vector<16x16xf32>
      %c44 = arith.constant 44 : index
      %247 = memref.load %arg3[%c44] : memref<98xf32, #tpu.memory_space<smem>>
      %c93 = arith.constant 93 : index
      %248 = memref.load %arg3[%c93] : memref<98xf32, #tpu.memory_space<smem>>
      %249 = vector.extract_strided_slice %185 {offsets = [6, 0], sizes = [16, 16], strides = [1, 1]} : vector<22x16xf32> to vector<16x16xf32>
      %250 = vector.broadcast %247 : f32 to vector<16x16xf32>
      %251 = arith.mulf %250, %249 : vector<16x16xf32>
      %252 = arith.addf %246, %251 : vector<16x16xf32>
      %253 = vector.extract_strided_slice %186 {offsets = [6, 0], sizes = [16, 16], strides = [1, 1]} : vector<22x16xf32> to vector<16x16xf32>
      %254 = vector.broadcast %248 : f32 to vector<16x16xf32>
      %255 = arith.mulf %254, %253 : vector<16x16xf32>
      %256 = arith.addf %252, %255 : vector<16x16xf32>
      %257 = vector.extract_strided_slice %38 {offsets = [0, 3], sizes = [22, 16], strides = [1, 1]} : vector<22x22xf32> to vector<22x16xf32>
      %258 = vector.extract_strided_slice %39 {offsets = [0, 3], sizes = [22, 16], strides = [1, 1]} : vector<22x22xf32> to vector<22x16xf32>
      %c3_41 = arith.constant 3 : index
      %259 = memref.load %arg3[%c3_41] : memref<98xf32, #tpu.memory_space<smem>>
      %c52 = arith.constant 52 : index
      %260 = memref.load %arg3[%c52] : memref<98xf32, #tpu.memory_space<smem>>
      %261 = vector.extract_strided_slice %257 {offsets = [0, 0], sizes = [16, 16], strides = [1, 1]} : vector<22x16xf32> to vector<16x16xf32>
      %262 = vector.broadcast %259 : f32 to vector<16x16xf32>
      %263 = arith.mulf %262, %261 : vector<16x16xf32>
      %264 = arith.addf %256, %263 : vector<16x16xf32>
      %265 = vector.extract_strided_slice %258 {offsets = [0, 0], sizes = [16, 16], strides = [1, 1]} : vector<22x16xf32> to vector<16x16xf32>
      %266 = vector.broadcast %260 : f32 to vector<16x16xf32>
      %267 = arith.mulf %266, %265 : vector<16x16xf32>
      %268 = arith.addf %264, %267 : vector<16x16xf32>
      %c10 = arith.constant 10 : index
      %269 = memref.load %arg3[%c10] : memref<98xf32, #tpu.memory_space<smem>>
      %c59 = arith.constant 59 : index
      %270 = memref.load %arg3[%c59] : memref<98xf32, #tpu.memory_space<smem>>
      %271 = vector.extract_strided_slice %257 {offsets = [1, 0], sizes = [16, 16], strides = [1, 1]} : vector<22x16xf32> to vector<16x16xf32>
      %272 = vector.broadcast %269 : f32 to vector<16x16xf32>
      %273 = arith.mulf %272, %271 : vector<16x16xf32>
      %274 = arith.addf %268, %273 : vector<16x16xf32>
      %275 = vector.extract_strided_slice %258 {offsets = [1, 0], sizes = [16, 16], strides = [1, 1]} : vector<22x16xf32> to vector<16x16xf32>
      %276 = vector.broadcast %270 : f32 to vector<16x16xf32>
      %277 = arith.mulf %276, %275 : vector<16x16xf32>
      %278 = arith.addf %274, %277 : vector<16x16xf32>
      %c17 = arith.constant 17 : index
      %279 = memref.load %arg3[%c17] : memref<98xf32, #tpu.memory_space<smem>>
      %c66 = arith.constant 66 : index
      %280 = memref.load %arg3[%c66] : memref<98xf32, #tpu.memory_space<smem>>
      %281 = vector.extract_strided_slice %257 {offsets = [2, 0], sizes = [16, 16], strides = [1, 1]} : vector<22x16xf32> to vector<16x16xf32>
      %282 = vector.broadcast %279 : f32 to vector<16x16xf32>
      %283 = arith.mulf %282, %281 : vector<16x16xf32>
      %284 = arith.addf %278, %283 : vector<16x16xf32>
      %285 = vector.extract_strided_slice %258 {offsets = [2, 0], sizes = [16, 16], strides = [1, 1]} : vector<22x16xf32> to vector<16x16xf32>
      %286 = vector.broadcast %280 : f32 to vector<16x16xf32>
      %287 = arith.mulf %286, %285 : vector<16x16xf32>
      %288 = arith.addf %284, %287 : vector<16x16xf32>
      %c24 = arith.constant 24 : index
      %289 = memref.load %arg3[%c24] : memref<98xf32, #tpu.memory_space<smem>>
      %c73 = arith.constant 73 : index
      %290 = memref.load %arg3[%c73] : memref<98xf32, #tpu.memory_space<smem>>
      %291 = vector.extract_strided_slice %257 {offsets = [3, 0], sizes = [16, 16], strides = [1, 1]} : vector<22x16xf32> to vector<16x16xf32>
      %292 = vector.broadcast %289 : f32 to vector<16x16xf32>
      %293 = arith.mulf %292, %291 : vector<16x16xf32>
      %294 = arith.addf %288, %293 : vector<16x16xf32>
      %295 = vector.extract_strided_slice %258 {offsets = [3, 0], sizes = [16, 16], strides = [1, 1]} : vector<22x16xf32> to vector<16x16xf32>
      %296 = vector.broadcast %290 : f32 to vector<16x16xf32>
      %297 = arith.mulf %296, %295 : vector<16x16xf32>
      %298 = arith.addf %294, %297 : vector<16x16xf32>
      %c31 = arith.constant 31 : index
      %299 = memref.load %arg3[%c31] : memref<98xf32, #tpu.memory_space<smem>>
      %c80 = arith.constant 80 : index
      %300 = memref.load %arg3[%c80] : memref<98xf32, #tpu.memory_space<smem>>
      %301 = vector.extract_strided_slice %257 {offsets = [4, 0], sizes = [16, 16], strides = [1, 1]} : vector<22x16xf32> to vector<16x16xf32>
      %302 = vector.broadcast %299 : f32 to vector<16x16xf32>
      %303 = arith.mulf %302, %301 : vector<16x16xf32>
      %304 = arith.addf %298, %303 : vector<16x16xf32>
      %305 = vector.extract_strided_slice %258 {offsets = [4, 0], sizes = [16, 16], strides = [1, 1]} : vector<22x16xf32> to vector<16x16xf32>
      %306 = vector.broadcast %300 : f32 to vector<16x16xf32>
      %307 = arith.mulf %306, %305 : vector<16x16xf32>
      %308 = arith.addf %304, %307 : vector<16x16xf32>
      %c38 = arith.constant 38 : index
      %309 = memref.load %arg3[%c38] : memref<98xf32, #tpu.memory_space<smem>>
      %c87 = arith.constant 87 : index
      %310 = memref.load %arg3[%c87] : memref<98xf32, #tpu.memory_space<smem>>
      %311 = vector.extract_strided_slice %257 {offsets = [5, 0], sizes = [16, 16], strides = [1, 1]} : vector<22x16xf32> to vector<16x16xf32>
      %312 = vector.broadcast %309 : f32 to vector<16x16xf32>
      %313 = arith.mulf %312, %311 : vector<16x16xf32>
      %314 = arith.addf %308, %313 : vector<16x16xf32>
      %315 = vector.extract_strided_slice %258 {offsets = [5, 0], sizes = [16, 16], strides = [1, 1]} : vector<22x16xf32> to vector<16x16xf32>
      %316 = vector.broadcast %310 : f32 to vector<16x16xf32>
      %317 = arith.mulf %316, %315 : vector<16x16xf32>
      %318 = arith.addf %314, %317 : vector<16x16xf32>
      %c45 = arith.constant 45 : index
      %319 = memref.load %arg3[%c45] : memref<98xf32, #tpu.memory_space<smem>>
      %c94 = arith.constant 94 : index
      %320 = memref.load %arg3[%c94] : memref<98xf32, #tpu.memory_space<smem>>
      %321 = vector.extract_strided_slice %257 {offsets = [6, 0], sizes = [16, 16], strides = [1, 1]} : vector<22x16xf32> to vector<16x16xf32>
      %322 = vector.broadcast %319 : f32 to vector<16x16xf32>
      %323 = arith.mulf %322, %321 : vector<16x16xf32>
      %324 = arith.addf %318, %323 : vector<16x16xf32>
      %325 = vector.extract_strided_slice %258 {offsets = [6, 0], sizes = [16, 16], strides = [1, 1]} : vector<22x16xf32> to vector<16x16xf32>
      %326 = vector.broadcast %320 : f32 to vector<16x16xf32>
      %327 = arith.mulf %326, %325 : vector<16x16xf32>
      %328 = arith.addf %324, %327 : vector<16x16xf32>
      %329 = vector.extract_strided_slice %38 {offsets = [0, 4], sizes = [22, 16], strides = [1, 1]} : vector<22x22xf32> to vector<22x16xf32>
      %330 = vector.extract_strided_slice %39 {offsets = [0, 4], sizes = [22, 16], strides = [1, 1]} : vector<22x22xf32> to vector<22x16xf32>
      %c4 = arith.constant 4 : index
      %331 = memref.load %arg3[%c4] : memref<98xf32, #tpu.memory_space<smem>>
      %c53 = arith.constant 53 : index
      %332 = memref.load %arg3[%c53] : memref<98xf32, #tpu.memory_space<smem>>
      %333 = vector.extract_strided_slice %329 {offsets = [0, 0], sizes = [16, 16], strides = [1, 1]} : vector<22x16xf32> to vector<16x16xf32>
      %334 = vector.broadcast %331 : f32 to vector<16x16xf32>
      %335 = arith.mulf %334, %333 : vector<16x16xf32>
      %336 = arith.addf %328, %335 : vector<16x16xf32>
      %337 = vector.extract_strided_slice %330 {offsets = [0, 0], sizes = [16, 16], strides = [1, 1]} : vector<22x16xf32> to vector<16x16xf32>
      %338 = vector.broadcast %332 : f32 to vector<16x16xf32>
      %339 = arith.mulf %338, %337 : vector<16x16xf32>
      %340 = arith.addf %336, %339 : vector<16x16xf32>
      %c11 = arith.constant 11 : index
      %341 = memref.load %arg3[%c11] : memref<98xf32, #tpu.memory_space<smem>>
      %c60 = arith.constant 60 : index
      %342 = memref.load %arg3[%c60] : memref<98xf32, #tpu.memory_space<smem>>
      %343 = vector.extract_strided_slice %329 {offsets = [1, 0], sizes = [16, 16], strides = [1, 1]} : vector<22x16xf32> to vector<16x16xf32>
      %344 = vector.broadcast %341 : f32 to vector<16x16xf32>
      %345 = arith.mulf %344, %343 : vector<16x16xf32>
      %346 = arith.addf %340, %345 : vector<16x16xf32>
      %347 = vector.extract_strided_slice %330 {offsets = [1, 0], sizes = [16, 16], strides = [1, 1]} : vector<22x16xf32> to vector<16x16xf32>
      %348 = vector.broadcast %342 : f32 to vector<16x16xf32>
      %349 = arith.mulf %348, %347 : vector<16x16xf32>
      %350 = arith.addf %346, %349 : vector<16x16xf32>
      %c18 = arith.constant 18 : index
      %351 = memref.load %arg3[%c18] : memref<98xf32, #tpu.memory_space<smem>>
      %c67 = arith.constant 67 : index
      %352 = memref.load %arg3[%c67] : memref<98xf32, #tpu.memory_space<smem>>
      %353 = vector.extract_strided_slice %329 {offsets = [2, 0], sizes = [16, 16], strides = [1, 1]} : vector<22x16xf32> to vector<16x16xf32>
      %354 = vector.broadcast %351 : f32 to vector<16x16xf32>
      %355 = arith.mulf %354, %353 : vector<16x16xf32>
      %356 = arith.addf %350, %355 : vector<16x16xf32>
      %357 = vector.extract_strided_slice %330 {offsets = [2, 0], sizes = [16, 16], strides = [1, 1]} : vector<22x16xf32> to vector<16x16xf32>
      %358 = vector.broadcast %352 : f32 to vector<16x16xf32>
      %359 = arith.mulf %358, %357 : vector<16x16xf32>
      %360 = arith.addf %356, %359 : vector<16x16xf32>
      %c25 = arith.constant 25 : index
      %361 = memref.load %arg3[%c25] : memref<98xf32, #tpu.memory_space<smem>>
      %c74 = arith.constant 74 : index
      %362 = memref.load %arg3[%c74] : memref<98xf32, #tpu.memory_space<smem>>
      %363 = vector.extract_strided_slice %329 {offsets = [3, 0], sizes = [16, 16], strides = [1, 1]} : vector<22x16xf32> to vector<16x16xf32>
      %364 = vector.broadcast %361 : f32 to vector<16x16xf32>
      %365 = arith.mulf %364, %363 : vector<16x16xf32>
      %366 = arith.addf %360, %365 : vector<16x16xf32>
      %367 = vector.extract_strided_slice %330 {offsets = [3, 0], sizes = [16, 16], strides = [1, 1]} : vector<22x16xf32> to vector<16x16xf32>
      %368 = vector.broadcast %362 : f32 to vector<16x16xf32>
      %369 = arith.mulf %368, %367 : vector<16x16xf32>
      %370 = arith.addf %366, %369 : vector<16x16xf32>
      %c32 = arith.constant 32 : index
      %371 = memref.load %arg3[%c32] : memref<98xf32, #tpu.memory_space<smem>>
      %c81 = arith.constant 81 : index
      %372 = memref.load %arg3[%c81] : memref<98xf32, #tpu.memory_space<smem>>
      %373 = vector.extract_strided_slice %329 {offsets = [4, 0], sizes = [16, 16], strides = [1, 1]} : vector<22x16xf32> to vector<16x16xf32>
      %374 = vector.broadcast %371 : f32 to vector<16x16xf32>
      %375 = arith.mulf %374, %373 : vector<16x16xf32>
      %376 = arith.addf %370, %375 : vector<16x16xf32>
      %377 = vector.extract_strided_slice %330 {offsets = [4, 0], sizes = [16, 16], strides = [1, 1]} : vector<22x16xf32> to vector<16x16xf32>
      %378 = vector.broadcast %372 : f32 to vector<16x16xf32>
      %379 = arith.mulf %378, %377 : vector<16x16xf32>
      %380 = arith.addf %376, %379 : vector<16x16xf32>
      %c39 = arith.constant 39 : index
      %381 = memref.load %arg3[%c39] : memref<98xf32, #tpu.memory_space<smem>>
      %c88 = arith.constant 88 : index
      %382 = memref.load %arg3[%c88] : memref<98xf32, #tpu.memory_space<smem>>
      %383 = vector.extract_strided_slice %329 {offsets = [5, 0], sizes = [16, 16], strides = [1, 1]} : vector<22x16xf32> to vector<16x16xf32>
      %384 = vector.broadcast %381 : f32 to vector<16x16xf32>
      %385 = arith.mulf %384, %383 : vector<16x16xf32>
      %386 = arith.addf %380, %385 : vector<16x16xf32>
      %387 = vector.extract_strided_slice %330 {offsets = [5, 0], sizes = [16, 16], strides = [1, 1]} : vector<22x16xf32> to vector<16x16xf32>
      %388 = vector.broadcast %382 : f32 to vector<16x16xf32>
      %389 = arith.mulf %388, %387 : vector<16x16xf32>
      %390 = arith.addf %386, %389 : vector<16x16xf32>
      %c46 = arith.constant 46 : index
      %391 = memref.load %arg3[%c46] : memref<98xf32, #tpu.memory_space<smem>>
      %c95 = arith.constant 95 : index
      %392 = memref.load %arg3[%c95] : memref<98xf32, #tpu.memory_space<smem>>
      %393 = vector.extract_strided_slice %329 {offsets = [6, 0], sizes = [16, 16], strides = [1, 1]} : vector<22x16xf32> to vector<16x16xf32>
      %394 = vector.broadcast %391 : f32 to vector<16x16xf32>
      %395 = arith.mulf %394, %393 : vector<16x16xf32>
      %396 = arith.addf %390, %395 : vector<16x16xf32>
      %397 = vector.extract_strided_slice %330 {offsets = [6, 0], sizes = [16, 16], strides = [1, 1]} : vector<22x16xf32> to vector<16x16xf32>
      %398 = vector.broadcast %392 : f32 to vector<16x16xf32>
      %399 = arith.mulf %398, %397 : vector<16x16xf32>
      %400 = arith.addf %396, %399 : vector<16x16xf32>
      %401 = vector.extract_strided_slice %38 {offsets = [0, 5], sizes = [22, 16], strides = [1, 1]} : vector<22x22xf32> to vector<22x16xf32>
      %402 = vector.extract_strided_slice %39 {offsets = [0, 5], sizes = [22, 16], strides = [1, 1]} : vector<22x22xf32> to vector<22x16xf32>
      %c5 = arith.constant 5 : index
      %403 = memref.load %arg3[%c5] : memref<98xf32, #tpu.memory_space<smem>>
      %c54 = arith.constant 54 : index
      %404 = memref.load %arg3[%c54] : memref<98xf32, #tpu.memory_space<smem>>
      %405 = vector.extract_strided_slice %401 {offsets = [0, 0], sizes = [16, 16], strides = [1, 1]} : vector<22x16xf32> to vector<16x16xf32>
      %406 = vector.broadcast %403 : f32 to vector<16x16xf32>
      %407 = arith.mulf %406, %405 : vector<16x16xf32>
      %408 = arith.addf %400, %407 : vector<16x16xf32>
      %409 = vector.extract_strided_slice %402 {offsets = [0, 0], sizes = [16, 16], strides = [1, 1]} : vector<22x16xf32> to vector<16x16xf32>
      %410 = vector.broadcast %404 : f32 to vector<16x16xf32>
      %411 = arith.mulf %410, %409 : vector<16x16xf32>
      %412 = arith.addf %408, %411 : vector<16x16xf32>
      %c12 = arith.constant 12 : index
      %413 = memref.load %arg3[%c12] : memref<98xf32, #tpu.memory_space<smem>>
      %c61 = arith.constant 61 : index
      %414 = memref.load %arg3[%c61] : memref<98xf32, #tpu.memory_space<smem>>
      %415 = vector.extract_strided_slice %401 {offsets = [1, 0], sizes = [16, 16], strides = [1, 1]} : vector<22x16xf32> to vector<16x16xf32>
      %416 = vector.broadcast %413 : f32 to vector<16x16xf32>
      %417 = arith.mulf %416, %415 : vector<16x16xf32>
      %418 = arith.addf %412, %417 : vector<16x16xf32>
      %419 = vector.extract_strided_slice %402 {offsets = [1, 0], sizes = [16, 16], strides = [1, 1]} : vector<22x16xf32> to vector<16x16xf32>
      %420 = vector.broadcast %414 : f32 to vector<16x16xf32>
      %421 = arith.mulf %420, %419 : vector<16x16xf32>
      %422 = arith.addf %418, %421 : vector<16x16xf32>
      %c19 = arith.constant 19 : index
      %423 = memref.load %arg3[%c19] : memref<98xf32, #tpu.memory_space<smem>>
      %c68 = arith.constant 68 : index
      %424 = memref.load %arg3[%c68] : memref<98xf32, #tpu.memory_space<smem>>
      %425 = vector.extract_strided_slice %401 {offsets = [2, 0], sizes = [16, 16], strides = [1, 1]} : vector<22x16xf32> to vector<16x16xf32>
      %426 = vector.broadcast %423 : f32 to vector<16x16xf32>
      %427 = arith.mulf %426, %425 : vector<16x16xf32>
      %428 = arith.addf %422, %427 : vector<16x16xf32>
      %429 = vector.extract_strided_slice %402 {offsets = [2, 0], sizes = [16, 16], strides = [1, 1]} : vector<22x16xf32> to vector<16x16xf32>
      %430 = vector.broadcast %424 : f32 to vector<16x16xf32>
      %431 = arith.mulf %430, %429 : vector<16x16xf32>
      %432 = arith.addf %428, %431 : vector<16x16xf32>
      %c26 = arith.constant 26 : index
      %433 = memref.load %arg3[%c26] : memref<98xf32, #tpu.memory_space<smem>>
      %c75 = arith.constant 75 : index
      %434 = memref.load %arg3[%c75] : memref<98xf32, #tpu.memory_space<smem>>
      %435 = vector.extract_strided_slice %401 {offsets = [3, 0], sizes = [16, 16], strides = [1, 1]} : vector<22x16xf32> to vector<16x16xf32>
      %436 = vector.broadcast %433 : f32 to vector<16x16xf32>
      %437 = arith.mulf %436, %435 : vector<16x16xf32>
      %438 = arith.addf %432, %437 : vector<16x16xf32>
      %439 = vector.extract_strided_slice %402 {offsets = [3, 0], sizes = [16, 16], strides = [1, 1]} : vector<22x16xf32> to vector<16x16xf32>
      %440 = vector.broadcast %434 : f32 to vector<16x16xf32>
      %441 = arith.mulf %440, %439 : vector<16x16xf32>
      %442 = arith.addf %438, %441 : vector<16x16xf32>
      %c33 = arith.constant 33 : index
      %443 = memref.load %arg3[%c33] : memref<98xf32, #tpu.memory_space<smem>>
      %c82 = arith.constant 82 : index
      %444 = memref.load %arg3[%c82] : memref<98xf32, #tpu.memory_space<smem>>
      %445 = vector.extract_strided_slice %401 {offsets = [4, 0], sizes = [16, 16], strides = [1, 1]} : vector<22x16xf32> to vector<16x16xf32>
      %446 = vector.broadcast %443 : f32 to vector<16x16xf32>
      %447 = arith.mulf %446, %445 : vector<16x16xf32>
      %448 = arith.addf %442, %447 : vector<16x16xf32>
      %449 = vector.extract_strided_slice %402 {offsets = [4, 0], sizes = [16, 16], strides = [1, 1]} : vector<22x16xf32> to vector<16x16xf32>
      %450 = vector.broadcast %444 : f32 to vector<16x16xf32>
      %451 = arith.mulf %450, %449 : vector<16x16xf32>
      %452 = arith.addf %448, %451 : vector<16x16xf32>
      %c40 = arith.constant 40 : index
      %453 = memref.load %arg3[%c40] : memref<98xf32, #tpu.memory_space<smem>>
      %c89 = arith.constant 89 : index
      %454 = memref.load %arg3[%c89] : memref<98xf32, #tpu.memory_space<smem>>
      %455 = vector.extract_strided_slice %401 {offsets = [5, 0], sizes = [16, 16], strides = [1, 1]} : vector<22x16xf32> to vector<16x16xf32>
      %456 = vector.broadcast %453 : f32 to vector<16x16xf32>
      %457 = arith.mulf %456, %455 : vector<16x16xf32>
      %458 = arith.addf %452, %457 : vector<16x16xf32>
      %459 = vector.extract_strided_slice %402 {offsets = [5, 0], sizes = [16, 16], strides = [1, 1]} : vector<22x16xf32> to vector<16x16xf32>
      %460 = vector.broadcast %454 : f32 to vector<16x16xf32>
      %461 = arith.mulf %460, %459 : vector<16x16xf32>
      %462 = arith.addf %458, %461 : vector<16x16xf32>
      %c47 = arith.constant 47 : index
      %463 = memref.load %arg3[%c47] : memref<98xf32, #tpu.memory_space<smem>>
      %c96 = arith.constant 96 : index
      %464 = memref.load %arg3[%c96] : memref<98xf32, #tpu.memory_space<smem>>
      %465 = vector.extract_strided_slice %401 {offsets = [6, 0], sizes = [16, 16], strides = [1, 1]} : vector<22x16xf32> to vector<16x16xf32>
      %466 = vector.broadcast %463 : f32 to vector<16x16xf32>
      %467 = arith.mulf %466, %465 : vector<16x16xf32>
      %468 = arith.addf %462, %467 : vector<16x16xf32>
      %469 = vector.extract_strided_slice %402 {offsets = [6, 0], sizes = [16, 16], strides = [1, 1]} : vector<22x16xf32> to vector<16x16xf32>
      %470 = vector.broadcast %464 : f32 to vector<16x16xf32>
      %471 = arith.mulf %470, %469 : vector<16x16xf32>
      %472 = arith.addf %468, %471 : vector<16x16xf32>
      %473 = vector.extract_strided_slice %38 {offsets = [0, 6], sizes = [22, 16], strides = [1, 1]} : vector<22x22xf32> to vector<22x16xf32>
      %474 = vector.extract_strided_slice %39 {offsets = [0, 6], sizes = [22, 16], strides = [1, 1]} : vector<22x22xf32> to vector<22x16xf32>
      %c6 = arith.constant 6 : index
      %475 = memref.load %arg3[%c6] : memref<98xf32, #tpu.memory_space<smem>>
      %c55 = arith.constant 55 : index
      %476 = memref.load %arg3[%c55] : memref<98xf32, #tpu.memory_space<smem>>
      %477 = vector.extract_strided_slice %473 {offsets = [0, 0], sizes = [16, 16], strides = [1, 1]} : vector<22x16xf32> to vector<16x16xf32>
      %478 = vector.broadcast %475 : f32 to vector<16x16xf32>
      %479 = arith.mulf %478, %477 : vector<16x16xf32>
      %480 = arith.addf %472, %479 : vector<16x16xf32>
      %481 = vector.extract_strided_slice %474 {offsets = [0, 0], sizes = [16, 16], strides = [1, 1]} : vector<22x16xf32> to vector<16x16xf32>
      %482 = vector.broadcast %476 : f32 to vector<16x16xf32>
      %483 = arith.mulf %482, %481 : vector<16x16xf32>
      %484 = arith.addf %480, %483 : vector<16x16xf32>
      %c13 = arith.constant 13 : index
      %485 = memref.load %arg3[%c13] : memref<98xf32, #tpu.memory_space<smem>>
      %c62 = arith.constant 62 : index
      %486 = memref.load %arg3[%c62] : memref<98xf32, #tpu.memory_space<smem>>
      %487 = vector.extract_strided_slice %473 {offsets = [1, 0], sizes = [16, 16], strides = [1, 1]} : vector<22x16xf32> to vector<16x16xf32>
      %488 = vector.broadcast %485 : f32 to vector<16x16xf32>
      %489 = arith.mulf %488, %487 : vector<16x16xf32>
      %490 = arith.addf %484, %489 : vector<16x16xf32>
      %491 = vector.extract_strided_slice %474 {offsets = [1, 0], sizes = [16, 16], strides = [1, 1]} : vector<22x16xf32> to vector<16x16xf32>
      %492 = vector.broadcast %486 : f32 to vector<16x16xf32>
      %493 = arith.mulf %492, %491 : vector<16x16xf32>
      %494 = arith.addf %490, %493 : vector<16x16xf32>
      %c20 = arith.constant 20 : index
      %495 = memref.load %arg3[%c20] : memref<98xf32, #tpu.memory_space<smem>>
      %c69 = arith.constant 69 : index
      %496 = memref.load %arg3[%c69] : memref<98xf32, #tpu.memory_space<smem>>
      %497 = vector.extract_strided_slice %473 {offsets = [2, 0], sizes = [16, 16], strides = [1, 1]} : vector<22x16xf32> to vector<16x16xf32>
      %498 = vector.broadcast %495 : f32 to vector<16x16xf32>
      %499 = arith.mulf %498, %497 : vector<16x16xf32>
      %500 = arith.addf %494, %499 : vector<16x16xf32>
      %501 = vector.extract_strided_slice %474 {offsets = [2, 0], sizes = [16, 16], strides = [1, 1]} : vector<22x16xf32> to vector<16x16xf32>
      %502 = vector.broadcast %496 : f32 to vector<16x16xf32>
      %503 = arith.mulf %502, %501 : vector<16x16xf32>
      %504 = arith.addf %500, %503 : vector<16x16xf32>
      %c27 = arith.constant 27 : index
      %505 = memref.load %arg3[%c27] : memref<98xf32, #tpu.memory_space<smem>>
      %c76 = arith.constant 76 : index
      %506 = memref.load %arg3[%c76] : memref<98xf32, #tpu.memory_space<smem>>
      %507 = vector.extract_strided_slice %473 {offsets = [3, 0], sizes = [16, 16], strides = [1, 1]} : vector<22x16xf32> to vector<16x16xf32>
      %508 = vector.broadcast %505 : f32 to vector<16x16xf32>
      %509 = arith.mulf %508, %507 : vector<16x16xf32>
      %510 = arith.addf %504, %509 : vector<16x16xf32>
      %511 = vector.extract_strided_slice %474 {offsets = [3, 0], sizes = [16, 16], strides = [1, 1]} : vector<22x16xf32> to vector<16x16xf32>
      %512 = vector.broadcast %506 : f32 to vector<16x16xf32>
      %513 = arith.mulf %512, %511 : vector<16x16xf32>
      %514 = arith.addf %510, %513 : vector<16x16xf32>
      %c34 = arith.constant 34 : index
      %515 = memref.load %arg3[%c34] : memref<98xf32, #tpu.memory_space<smem>>
      %c83 = arith.constant 83 : index
      %516 = memref.load %arg3[%c83] : memref<98xf32, #tpu.memory_space<smem>>
      %517 = vector.extract_strided_slice %473 {offsets = [4, 0], sizes = [16, 16], strides = [1, 1]} : vector<22x16xf32> to vector<16x16xf32>
      %518 = vector.broadcast %515 : f32 to vector<16x16xf32>
      %519 = arith.mulf %518, %517 : vector<16x16xf32>
      %520 = arith.addf %514, %519 : vector<16x16xf32>
      %521 = vector.extract_strided_slice %474 {offsets = [4, 0], sizes = [16, 16], strides = [1, 1]} : vector<22x16xf32> to vector<16x16xf32>
      %522 = vector.broadcast %516 : f32 to vector<16x16xf32>
      %523 = arith.mulf %522, %521 : vector<16x16xf32>
      %524 = arith.addf %520, %523 : vector<16x16xf32>
      %c41 = arith.constant 41 : index
      %525 = memref.load %arg3[%c41] : memref<98xf32, #tpu.memory_space<smem>>
      %c90 = arith.constant 90 : index
      %526 = memref.load %arg3[%c90] : memref<98xf32, #tpu.memory_space<smem>>
      %527 = vector.extract_strided_slice %473 {offsets = [5, 0], sizes = [16, 16], strides = [1, 1]} : vector<22x16xf32> to vector<16x16xf32>
      %528 = vector.broadcast %525 : f32 to vector<16x16xf32>
      %529 = arith.mulf %528, %527 : vector<16x16xf32>
      %530 = arith.addf %524, %529 : vector<16x16xf32>
      %531 = vector.extract_strided_slice %474 {offsets = [5, 0], sizes = [16, 16], strides = [1, 1]} : vector<22x16xf32> to vector<16x16xf32>
      %532 = vector.broadcast %526 : f32 to vector<16x16xf32>
      %533 = arith.mulf %532, %531 : vector<16x16xf32>
      %534 = arith.addf %530, %533 : vector<16x16xf32>
      %c48 = arith.constant 48 : index
      %535 = memref.load %arg3[%c48] : memref<98xf32, #tpu.memory_space<smem>>
      %c97 = arith.constant 97 : index
      %536 = memref.load %arg3[%c97] : memref<98xf32, #tpu.memory_space<smem>>
      %537 = vector.extract_strided_slice %473 {offsets = [6, 0], sizes = [16, 16], strides = [1, 1]} : vector<22x16xf32> to vector<16x16xf32>
      %538 = vector.broadcast %535 : f32 to vector<16x16xf32>
      %539 = arith.mulf %538, %537 : vector<16x16xf32>
      %540 = arith.addf %534, %539 : vector<16x16xf32>
      %541 = vector.extract_strided_slice %474 {offsets = [6, 0], sizes = [16, 16], strides = [1, 1]} : vector<22x16xf32> to vector<16x16xf32>
      %542 = vector.broadcast %536 : f32 to vector<16x16xf32>
      %543 = arith.mulf %542, %541 : vector<16x16xf32>
      %544 = arith.addf %540, %543 : vector<16x16xf32>
      %545 = arith.negf %544 : vector<16x16xf32>
      %546 = math.exp %545 : vector<16x16xf32>
      %cst_42 = arith.constant 1.000000e+00 : f32
      %547 = vector.broadcast %cst_42 : f32 to vector<16x16xf32>
      %548 = arith.addf %547, %546 : vector<16x16xf32>
      %549 = arith.divf %547, %548 : vector<16x16xf32>
      %550 = vector.shape_cast %549 : vector<16x16xf32> to vector<1x16x16xf32>
      %c0_43 = arith.constant 0 : index
      %c0_44 = arith.constant 0 : index
      %c0_45 = arith.constant 0 : index
      %c0_46 = arith.constant 0 : index
      %551 = vector.load %arg4[%c0_43, %c0_44, %c0_45, %c0_46] : memref<1x1x16x16xf32, #tpu.memory_space<vmem>>, vector<1x1x16x16xf32>
      %552 = vector.shape_cast %551 : vector<1x1x16x16xf32> to vector<1x16x16xf32>
      %553 = vector.shape_cast %550 : vector<1x16x16xf32> to vector<1x1x16x16xf32>
      tpu.vector_store %arg4[%c0_43, %c0_44, %c0_45, %c0_46], %553 {strides = array<i32>} : memref<1x1x16x16xf32, #tpu.memory_space<vmem>>, vector<1x1x16x16xf32>,
    } else {
    }
    return
  }
  func.func @transform_0(%arg0: i32, %arg1: i32) -> (i32, i32, i32, i32) {
    %c0_i32 = arith.constant 0 : i32
    %c0_i32_0 = arith.constant 0 : i32
    %c0_i32_1 = arith.constant 0 : i32
    return %arg0, %arg1, %c0_i32, %c0_i32_0 : i32, i32, i32, i32
  }
  func.func @transform_1(%arg0: i32, %arg1: i32) -> i32 {
    %c0_i32 = arith.constant 0 : i32
    %c0_i32_0 = arith.constant 0 : i32
    return %c0_i32 : i32
  }
  func.func @transform_2(%arg0: i32, %arg1: i32) -> (i32, i32, i32, i32) {
    %c0_i32 = arith.constant 0 : i32
    %c0_i32_0 = arith.constant 0 : i32
    %c0_i32_1 = arith.constant 0 : i32
    %c0_i32_2 = arith.constant 0 : i32
    return %arg0, %c0_i32, %c0_i32_0, %c0_i32_1 : i32, i32, i32, i32
  }
}

</mosaic_0001>

<bundles_post_ra>
// kernel: tpu_custom_call.1
= control target key start
LH: loop header
LB: loop body
LE: loop exit
PB: predicated region body
PF: predicated region fallthrough
CT: control target
= control target key end

     0   :  { %7 = vsyncpa [#allocation7], 0  ;;  %s3842_s0 = inlined_call_operand.hbm [shape: f32[2,4,16,16], index: 0, kind: input, shape index: {}]   ;;  %s3843_s1 = inlined_call_operand.hbm [shape: f32[98], index: 1, kind: input, shape index: {}]   ;;  %s3844_s2 = inlined_call_operand.hbm [shape: f32[2,1,16,16], index: 2, kind: output, shape index: {}]  }
   0x1   :  { %9 = vsyncpa [#allocation7 + $0x1], 0 }
   0x2   :  { %10 = vsyncpa [#allocation9], 0 }
   0x3   :  { %11 = vsyncpa [#allocation8], 0 }
   0x4   :  { %13 = vsyncpa [#allocation8 + $0x1], 0  ;;  %s2729_s9 = smov 0   ;;  %s2731_s10 = smov 0  }
   0x5   :  { %s2733_s11 = smov 0   ;;  %s2735_s12 = smov 0  }
   0x6   :  { %s2737_s13 = smov 0   ;;  %s2739_s14 = smov 0  }
   0x7 LB: > { %s2337_s15 = sadd.s32 4294967295, %s2698_s14   ;;  %s2338_s16 = sadd.s32 4294967294, %s2698_s14   ;;  %s2698_s14 = sphi %s2739_s14, %s19_s14   ;;  %s2694_s13 = sphi %s2737_s13, %s3856_s13   ;;  %s2690_s12 = sphi %s2735_s12, %s3855_s12   ;;  %s2686_s11 = sphi %s2733_s11, %s3854_s11   ;;  %s2682_s10 = sphi %s2731_s10, %s3853_s10   ;;  %s2678_s9 = sphi %s2729_s9, %s3852_s9  }
   0x8   : > { %s40_s17 = sadd.s32 1, %s2686_s11  ;;  %p47_p0 = scmp.ne.s32.totalorder %s2686_s11, %s2682_s10 }
   0x9   : > { %p48_p1 = scmp.eq.s32.totalorder %s2698_s14, 0  ;;  %p53_p2 = scmp.ne.s32.totalorder %s2682_s10, %s2678_s9 }
   0xa   : > { %p2767_p3 = scmp.eq.s32.totalorder %s2337_s15, 0  ;;  %p98_p4 = scmp.eq.s32.totalorder %s2337_s15, 1 }
   0xb   : > { %p2771_p5 = por %p48_p1, %p47_p0  ;;  %p104_p6 = scmp.eq.s32.totalorder %s2338_s16, 1 }
   0xc   : > { %p2777_p7 = por %p2767_p3, %p53_p2  ;;  %p2781_p8 = por %p98_p4, %p47_p0 }
   0xd   : > { %p2785_p9 = por %p104_p6, %p53_p2  ;;  %p2339_p10 = scmp.ge.s32.totalorder %s2698_s14, 1 }
   0xe   : > { %p111_p11 = scmp.lt.s32.totalorder %s2698_s14, 3  ;;  %s123_s25 = sshll.u32 %s3843_s1, 4  ;;  %s124_s25 = int_to_ptr.hbm [resolvable:$true] %s123_s25 }
   0xf   : > { %p2341_p13 = scmp.ge.s32.totalorder %s2698_s14, 2  ;;  %p2482_p0 = scmp.lt.s32.totalorder %s2698_s14, 2 }
  0x10   : > { %p2794_p12 = pnand %p2339_p10, %p111_p11  ;;  %s31_s28 = sadd.s32 1, %s2694_s13 }
  0x11   : > { %p2804_p2 = pnand %p2482_p0, %p2771_p5  ;;  %p33_p6 = scmp.ge.s32.totalorder %s31_s28, 2 }
  0x12   : > { %p2469_p1 = pneg %p2794_p12  ;;  %s134_s29 = sand.u32 1, %s2686_s11  }
  0x13   : > { %s2700_s30 = smov [#allocation10]   ;;  %s3858_s28 = smov (%p33_p6, %s31_s28), 0 }
  0x14   : > { %p2470_p4 = pnand %p2469_p1, %p2767_p3  ;;  %s2342_s3 = sshll.u32 %s134_s29, 6 }
  0x15   : > { %s35_s4 = ssub.s32 %s2694_s13, %s3858_s28  ;;  %s2459_s5 = sshll.u32 %s2694_s13, 6 }
  0x16   : > { %2472 = dma.hbm_to_smem (!%p2470_p4), %s124_s25, 16, %s2700_s30, [#allocation9]  }
  0x17   : > { %p38_p10 = scmp.eq.s32.totalorder %s35_s4, 0  ;;  %s146_s8 = scalar_lea.hbm %s3842_s0, %s2459_s5 }
  0x18   : > { %s138_s15 = scalar_lea.vmem [#allocation6], %s2342_s3  ;;  %s147_s23 = sshll.u32 %s146_s8, 4  ;;  %s148_s23 = int_to_ptr.hbm [resolvable:$true] %s147_s23 }
  0x19   : > { %s149_s16 = sshll.u32 %s138_s15, 4  ;;  %s135_s24 = scalar_lea.sflag [#allocation7], %s134_s29  ;;  %s150_s16 = int_to_ptr.vmem [resolvable:$true] %s149_s16 }
  0x1a   : > { %s2823_s19 = scalar_select %p38_p10, %s2686_s11, %s40_s17  }
  0x1b   : > { %s2701_s25 = smov 128   ;;  %s2702_s30 = smov 8  }
  0x1c   : > { %2476 = dma.hbm_to_vmem [thread:$0]  (!%p2804_p2), %s148_s23, 1024, %s150_s16, %s135_s24, %s2701_s25, %s2701_s25, %s2702_s30  }
  0x1d   : > { %161 = sbr.rel (%p2794_p12) target bundleno = 780 (0x30c), region = 28  ;;  %s2830_s4 = sand.u32 (!%p2794_p12), 1, %s2682_s10  }
  0x1e   : > { %s2346_s3 = sshll.u32 (!%p2794_p12), %s2830_s4, 6  ;;  %s164_s17 = scalar_lea.sflag (!%p2794_p12), [#allocation7], %s2830_s4 }
  0x1f   : > { %s2834_s5 = scalar_lea.vmem (!%p2794_p12), [#allocation6], %s2346_s3 }
  0x22   : > { %2665 = dma.done.wait (%p2777_p7), %s164_s17, 1024  }
  0x23   : > { %2667 = vsyncadd (%p2777_p7), %s164_s17, 4294966272 }
  0x24   : > { %2669 = dma.done.wait (%p2767_p3), [#allocation9], 16  }
  0x25   : > { %2671 = vsyncadd (%p2767_p3), [#allocation9], 4294967280 }
  0x26   : > { %178 = sfence }
  0x27   : > { %vm200_vm0 = vcmask 130048   ;;  %v2703_v0 = vmov -inf   ;;  %v2704_v1 = vmov 0.0   ;;  %vm244_vm1 = vcmask 179200   ;;  %v209_v2 = vld [vmem:[%s2834_s5] sm:$0xff]  ;;  %v210_v3 = vld [vmem:[%s2834_s5 + $0x8] sm:$0xff] }
  0x28   : > { %203 = vst.msk [vmem:[#allocation3] sm:$0xff] %vm200_vm0, %v2703_v0  ;;  %v2349_v5 = vld [vmem:[%s2834_s5 + $0x10] sm:$0xff]  ;;  %v2350_v8 = vld [vmem:[%s2834_s5 + $0x18] sm:$0xff]  ;;  %v2351_v9 = vld [vmem:[%s2834_s5 + $0x20] sm:$0xff]  ;;  %s2705_s18 = smov 3   ;;  %vm247_vm2 = vcmask 177152  }
  0x29   : > { %204 = vst.msk [vmem:[#allocation3 + $0x8] sm:$0xff] %vm200_vm0, %v2703_v0  ;;  %v2352_v14 = vld [vmem:[%s2834_s5 + $0x28] sm:$0xff]  ;;  %v2353_v16 = vld [vmem:[%s2834_s5 + $0x30] sm:$0xff]  ;;  %v2354_v21 = vld [vmem:[%s2834_s5 + $0x38] sm:$0xff]  ;;  %vm262_vm3 = vcmask 154648   ;;  %s2369_s20 = sld [smem:[#allocation10 + $0x32]] }
  0x2a   : > { %201 = vst.msk [vmem:[#allocation2] sm:$0xff] %vm200_vm0, %v2704_v1  ;;  %s2368_s26 = sld [smem:[#allocation10 + $0x1]]  ;;  %s2706_s29 = smov 127   ;;  %vm304_vm4 = vcmask 1046528   ;;  %vm339_vm5 = vcmask 1045504   ;;  %vm374_vm6 = vcmask 1044480  }
  0x2b   : > { %202 = vst.msk [vmem:[#allocation2 + $0x8] sm:$0xff] %vm200_vm0, %v2704_v1  ;;  %s2868_s27 = sld [smem:[#allocation10 + $0x2]]  ;;  %s2707_s16 = smov 126   ;;  %vm409_vm7 = vcmask 1043456   ;;  %vm444_vm8 = vcmask 1042432   ;;  %vm479_vm9 = vcmask 1041408  }
  0x2c   : > { %249 = vst.msk [vmem:[#allocation5] sm:$0xff] %vm244_vm1, %v2704_v1  ;;  %s2370_s6 = sld [smem:[#allocation10 + $0x8]] }
  0x2d   : > { %250 = vst.msk [vmem:[#allocation5 + $0x8] sm:$0xff] %vm244_vm1, %v2704_v1  ;;  %s2874_s7 = sld [smem:[#allocation10 + $0x33]] }
  0x2e   : > { %245 = vst.msk [vmem:[#allocation4] sm:$0xff] %vm244_vm1, %v2704_v1  ;;  %s2371_s8 = sld [smem:[#allocation10 + $0x39]] }
  0x2f   : > { %v207_v4 = vld [vmem:[#allocation3] sm:$0xff]  ;;  %246 = vst.msk [vmem:[#allocation4 + $0x8] sm:$0xff] %vm244_vm1, %v2704_v1  ;;  %v520_v36 = vstv %s2369_s20  ;;  %s2372_s15 = sld [smem:[#allocation10 + $0xf]] }
  0x30   : > { %v213_v6 = vmax.f32 %v207_v4, %v209_v2  ;;  %v208_v7 = vld [vmem:[#allocation3 + $0x8] sm:$0xff]  ;;  %251 = vst.msk [vmem:[#allocation5 + $0x10] sm:$0x3f] %vm247_vm2, %v2704_v1  ;;  %v507_v39 = vstv %s2368_s26  ;;  %s2373_s23 = sld [smem:[#allocation10 + $0x40]] }
  0x31   : > { %v205_v10 = vld [vmem:[#allocation2] sm:$0xff]  ;;  %v214_v11 = vmax.f32 %v208_v7, %v210_v3  ;;  %248 = vst.msk [vmem:[#allocation4 + $0x10] sm:$0x3f] %vm247_vm2, %v2704_v1  ;;  %v787_v48 = vstv %s2868_s27  ;;  %s2374_s24 = sld [smem:[#allocation10 + $0x16]] }
  0x32   : > { %v220_v12 = vmax.f32 %v213_v6, %v2349_v5  ;;  %v211_v13 = vadd.f32 %v209_v2, %v205_v10  ;;  %v206_v15 = vld [vmem:[#allocation2 + $0x8] sm:$0xff]  ;;  %v535_v51 = vstv %s2370_s6  ;;  %s2375_s25 = sld [smem:[#allocation10 + $0x47]] }
  0x33   : > { %v221_v17 = vmax.f32 %v214_v11, %v2350_v8  ;;  %v212_v18 = vadd.f32 %v210_v3, %v206_v15  ;;  %v800_v54 = vstv %s2874_s7  ;;  %s2376_s30 = sld [smem:[#allocation10 + $0x1d]] }
  0x34   : > { %v227_v19 = vmax.f32 %v220_v12, %v2351_v9  ;;  %v218_v20 = vadd.f32 %v2349_v5, %v211_v13  ;;  %v555_v58 = vstv %s2371_s8  ;;  %s2377_s3 = sld [smem:[#allocation10 + $0x4e]] }
  0x35   : > { %v228_v22 = vmax.f32 %v221_v17, %v2352_v14  ;;  %v219_v23 = vadd.f32 %v2350_v8, %v212_v18  ;;  %v577_v61 = vstv %s2372_s15  ;;  %s2378_s17 = sld [smem:[#allocation10 + $0x24]] }
  0x36   : > { %v234_v24 = vmax.f32 %v227_v19, %v2353_v16  ;;  %v225_v25 = vadd.f32 %v2351_v9, %v218_v20  ;;  %v597_v10 = vstv %s2373_s23  ;;  %s2379_s5 = sld [smem:[#allocation10 + $0x55]] }
  0x37   : > { %v235_v26 = vmax.f32 %v228_v22, %v2354_v21  ;;  %v226_v27 = vadd.f32 %v2352_v14, %v219_v23  ;;  %v619_v18 = vstv %s2374_s24  ;;  %s2381_s20 = sld [smem:[#allocation10 + $0x5c]] }
  0x38   : > { %239 = vst.msk [vmem:[#allocation3] sm:$0xff] %vm200_vm0, %v234_v24  ;;  %v232_v28 = vadd.f32 %v2353_v16, %v225_v25  ;;  %v639_v23 = vstv %s2375_s25  ;;  %s2384_s26 = sld [smem:[#allocation10 + $0x9]] }
  0x39   : > { %240 = vst.msk [vmem:[#allocation3 + $0x8] sm:$0xff] %vm200_vm0, %v235_v26  ;;  %v233_v29 = vadd.f32 %v2354_v21, %v226_v27  ;;  %s2385_s27 = sld [smem:[#allocation10 + $0x3a]] }
  0x3a   : > { %237 = vst.msk [vmem:[#allocation2] sm:$0xff] %vm200_vm0, %v232_v28  ;;  %s2982_s6 = sld [smem:[#allocation10]] }
  0x3b   : > { %238 = vst.msk [vmem:[#allocation2 + $0x8] sm:$0xff] %vm200_vm0, %v233_v29  ;;  %s2984_s7 = sld [smem:[#allocation10 + $0x31]] }
  0x3c   : > { %s2990_s8 = sld [smem:[#allocation10 + $0x7]] }
  0x3d   : > { %s2993_s15 = sld [smem:[#allocation10 + $0x38]] }
  0x3e   : > { %s2998_s23 = sld [smem:[#allocation10 + $0x3f]] }
  0x3f   : > { %v265_v30 = vld [vmem:[#allocation3] sm:$0xff]  ;;  %s3002_s24 = sld [smem:[#allocation10 + $0x46]] }
  0x40   : > { %269 = vrot.lane.b32.xlu1 %v265_v30, %s2705_s18  ;;  %v266_v32 = vld [vmem:[#allocation3 + $0x8] sm:$0xff]  ;;  %s2358_s25 = sld [smem:[#allocation10 + $0xe]] }
  0x41   : > { %v252_v31 = vld [vmem:[#allocation2] sm:$0xff] }
  0x42   : > { %256 = vrot.lane.b32.xlu0 %v252_v31, %s2705_s18  ;;  %v253_v33 = vld [vmem:[#allocation2 + $0x8] sm:$0xff] }
  0x48   : > { %271 = vrot.lane.b32.xlu1 %v266_v32, %s2705_s18 }
  0x4a   : > { %258 = vrot.lane.b32.xlu0 %v253_v33, %s2705_s18  ;;  %s2380_s18 = sld [smem:[#allocation10 + $0x2b]] }
  0xb2   : > { %v270_v34 = vpop.permute.xlu1 %269 }
  0xb3   : > { %275 = vst.msk [vmem:[#allocation5 + $0x3] sm:$0xff] %vm262_vm3, %v270_v34 }
  0xb4   : > { %v257_v35 = vpop.permute.xlu0 %256 }
  0xb5   : > { %263 = vst.msk [vmem:[#allocation4 + $0x3] sm:$0xff] %vm262_vm3, %v257_v35 }
  0xba   : > { %v2862_v37 = vld [vmem:[#allocation5] sm:$0xff]  ;;  %v272_v38 = vpop.permute.xlu1 %271 }
  0xbb   : > { %276 = vst.msk [vmem:[#allocation5 + $0xb] sm:$0xff] %vm262_vm3, %v272_v38  ;;  %v521_v40 = vmul.f32 %v520_v36, %v2862_v37  ;;  %v801_v57 = vmul.f32 %v800_v54, %v2862_v37  ;;  %v556_v63 = vmul.f32 %v555_v58, %v2862_v37  ;;  %v640_v29 = vmul.f32 %v639_v23, %v2862_v37 }
  0xbc   : > { %v2866_v41 = vld [vmem:[#allocation4] sm:$0xff]  ;;  %v259_v42 = vpop.permute.xlu0 %258 }
  0xbd   : > { %264 = vst.msk [vmem:[#allocation4 + $0xb] sm:$0xff] %vm262_vm3, %v259_v42  ;;  %525 = vrot.lane.b32.xlu0 %v521_v40, %s2706_s29  ;;  %v508_v43 = vmul.f32 %v507_v39, %v2866_v41  ;;  %v788_v60 = vmul.f32 %v787_v48, %v2866_v41  ;;  %v578_v2 = vmul.f32 %v577_v61, %v2866_v41  ;;  %v562_v3 = vrot.slane %v556_v63, 1 }
  0xbe   : > { %v536_v15 = vmul.f32 %v535_v51, %v2866_v41  ;;  %v620_v22 = vmul.f32 %v619_v18, %v2866_v41  ;;  %v646_v34 = vrot.slane %v640_v29, 3 }
  0xbf   : > { %512 = vrot.lane.b32.xlu2 %v508_v43, %s2706_s29  ;;  %v584_v7 = vrot.slane %v578_v2, 2 }
  0xc0   : > { %v542_v20 = vrot.slane %v536_v15, 1  ;;  %v626_v30 = vrot.slane %v620_v22, 3 }
  0xc2   : > { %v2876_v44 = vld [vmem:[#allocation5 + $0x8] sm:$0xff]  ;;  %v2905_v5 = vld [vmem:[#allocation5 + $0x10] sm:$0x3f] }
  0xc3   : > { %v522_v45 = vmul.f32 %v520_v36, %v2876_v44  ;;  %v2894_v59 = vmul.f32 %v555_v58, %v2876_v44  ;;  %v802_v9 = vmul.f32 %v800_v54, %v2876_v44  ;;  %v599_v12 = vmul.f32 %v597_v10, %v2876_v44 }
  0xc4   : > { %v2879_v46 = vld [vmem:[#allocation4 + $0x8] sm:$0xff]  ;;  %v2881_v47 = vld [vmem:[#allocation4 + $0x10] sm:$0x3f]  ;;  %v600_v13 = vmul.f32 %v597_v10, %v2905_v5  ;;  %v641_v26 = vmul.f32 %v639_v23, %v2876_v44  ;;  %v558_v27 = vmul.f32 %v555_v58, %v2905_v5  ;;  %v642_v35 = vmul.f32 %v639_v23, %v2905_v5 }
  0xc5   : > { %v509_v49 = vmul.f32 %v507_v39, %v2879_v46  ;;  %527 = vrot.lane.b32.xlu1 %v522_v45, %s2706_s29  ;;  %v789_v50 = vmul.f32 %v787_v48, %v2879_v46  ;;  %v537_v52 = vmul.f32 %v535_v51, %v2879_v46  ;;  %v538_v53 = vmul.f32 %v535_v51, %v2881_v47 }
  0xc6   : > { %v579_v0 = vmul.f32 %v577_v61, %v2879_v46  ;;  %v563_v1 = vrot.slane %v2894_v59, 1  ;;  %v580_v8 = vmul.f32 %v577_v61, %v2881_v47  ;;  %v605_v16 = vrot.slane %v599_v12, 2 }
  0xc7   : > { %794 = vrot.lane.b32.xlu0 %v789_v50, %s2707_s16  ;;  %514 = vrot.lane.b32.xlu2 %v509_v49, %s2706_s29  ;;  %v543_v55 = vrot.slane %v537_v52, 1  ;;  %v545_v56 = vrot.slane %v538_v53, 1  ;;  %v607_v17 = vrot.slane %v600_v13, 2  ;;  %v2919_v21 = vmul.f32 %v619_v18, %v2879_v46 }
  0xc8   : > { %v585_v4 = vrot.slane %v579_v0, 2  ;;  %v564_v6 = vsel %vm304_vm4, %v562_v3, %v563_v1  ;;  %v587_v14 = vrot.slane %v580_v8, 2  ;;  %v647_v31 = vrot.slane %v641_v26, 3 }
  0xc9   : > { %v546_v62 = vsel %vm304_vm4, %v543_v55, %v545_v56  ;;  %v608_v24 = vsel %vm339_vm5, %v605_v16, %v607_v17  ;;  %v544_v25 = vsel %vm304_vm4, %v542_v20, %v543_v55  ;;  %v627_v28 = vrot.slane %v2919_v21, 3 }
  0xca   : > { %v586_v11 = vsel %vm339_vm5, %v584_v7, %v585_v4  ;;  %v588_v19 = vsel %vm339_vm5, %v585_v4, %v587_v14  ;;  %v565_v32 = vrot.slane %v558_v27, 1  ;;  %v661_v36 = vstv %s2376_s30  ;;  %s3006_s30 = sld [smem:[#allocation10 + $0x15]] }
  0xcb   : > { %v628_v33 = vsel %vm374_vm6, %v626_v30, %v627_v28  ;;  %v648_v38 = vsel %vm374_vm6, %v646_v34, %v647_v31  ;;  %v663_v40 = vmul.f32 %v661_v36, %v2879_v46  ;;  %v664_v42 = vmul.f32 %v661_v36, %v2881_v47 }
  0xcc   : > { %v566_v39 = vsel %vm304_vm4, %v563_v1, %v565_v32  ;;  %v649_v43 = vrot.slane %v642_v35, 3  ;;  %v598_v45 = vmul.f32 %v597_v10, %v2862_v37  ;;  %v681_v50 = vstv %s2377_s3  ;;  %s3008_s3 = sld [smem:[#allocation10 + $0x4d]] }
  0xcd   : > { %805 = vrot.lane.b32.xlu1 %v801_v57, %s2707_s16  ;;  %v669_v48 = vrot.slane %v663_v40, 4  ;;  %v671_v49 = vrot.slane %v664_v42, 4  ;;  %v2943_v53 = vmul.f32 %v681_v50, %v2876_v44  ;;  %v682_v54 = vmul.f32 %v681_v50, %v2862_v37 }
  0xce   : > { %v650_v51 = vsel %vm374_vm6, %v647_v31, %v649_v43  ;;  %v604_v52 = vrot.slane %v598_v45, 2  ;;  %v703_v55 = vstv %s2378_s17  ;;  %v622_v59 = vmul.f32 %v619_v18, %v2881_v47  ;;  %s3010_s17 = sld [smem:[#allocation10 + $0x10]] }
  0xcf   : > { %549 = vrot.lane.b32.xlu0 %v546_v62, %s2706_s29  ;;  %792 = vrot.lane.b32.xlu2 %v788_v60, %s2707_s16  ;;  %v672_v56 = vsel %vm409_vm7, %v669_v48, %v671_v49  ;;  %v705_v58 = vmul.f32 %v703_v55, %v2879_v46  ;;  %v689_v60 = vrot.slane %v2943_v53, 4  ;;  %v704_v61 = vmul.f32 %v703_v55, %v2866_v41 }
  0xd0   : > { %v606_v57 = vsel %vm339_vm5, %v604_v52, %v605_v16  ;;  %v688_v62 = vrot.slane %v682_v54, 4  ;;  %v629_v0 = vrot.slane %v622_v59, 3  ;;  %v706_v3 = vmul.f32 %v703_v55, %v2881_v47 }
  0xd1   : > { %v711_v63 = vrot.slane %v705_v58, 5  ;;  %v710_v2 = vrot.slane %v704_v61, 5  ;;  %v723_v4 = vstv %s2379_s5  ;;  %v745_v14 = vstv %s2380_s18  ;;  %s2387_s5 = sld [smem:[#allocation10 + $0x41]] }
  0xd2   : > { %v690_v1 = vsel %vm409_vm7, %v688_v62, %v689_v60  ;;  %v630_v7 = vsel %vm374_vm6, %v627_v28, %v629_v0  ;;  %v2961_v8 = vmul.f32 %v723_v4, %v2876_v44  ;;  %v713_v10 = vrot.slane %v706_v3, 5  ;;  %s3022_s18 = sld [smem:[#allocation10 + $0x1c]] }
  0xd3   : > { %v2970_v17 = vmul.f32 %v745_v14, %v2879_v46  ;;  %v746_v18 = vmul.f32 %v745_v14, %v2866_v41  ;;  %v684_v23 = vmul.f32 %v681_v50, %v2905_v5  ;;  %v815_v32 = vstv %s2384_s26  ;;  %s3066_s26 = sld [smem:[#allocation10 + $0x17]] }
  0xd4   : > { %v731_v12 = vrot.slane %v2961_v8, 5  ;;  %v714_v15 = vsel %vm444_vm8, %v711_v63, %v713_v10  ;;  %v817_v35 = vmul.f32 %v815_v32, %v2879_v46  ;;  %v835_v42 = vstv %s2385_s27  ;;  %s3117_s27 = sld [smem:[#allocation10 + $0x1e]] }
  0xd5   : > { %567 = vrot.lane.b32.xlu1 %v564_v6, %s2706_s29  ;;  %v712_v6 = vsel %vm444_vm8, %v710_v2, %v711_v63  ;;  %v752_v26 = vrot.slane %v746_v18, 6  ;;  %v691_v28 = vrot.slane %v684_v23, 4  ;;  %v818_v49 = vmul.f32 %v815_v32, %v2881_v47 }
  0xd6   : > { %v823_v40 = vrot.slane %v817_v35, 1  ;;  %v3016_v50 = vmul.f32 %v835_v42, %v2876_v44  ;;  %v748_v54 = vmul.f32 %v745_v14, %v2881_v47  ;;  %v314_v58 = vstv %s2993_s15  ;;  %s3208_s15 = sld [smem:[#allocation10 + $0x56]] }
  0xd7   : > { %589 = vrot.lane.b32.xlu0 %v586_v11, %s2706_s29  ;;  %807 = vrot.lane.b32.xlu2 %v802_v9, %s2707_s16  ;;  %v726_v9 = vmul.f32 %v723_v4, %v2905_v5  ;;  %v662_v11 = vmul.f32 %v661_v36, %v2866_v41  ;;  %v692_v34 = vsel %vm409_vm7, %v689_v60, %v691_v28  ;;  %v825_v55 = vrot.slane %v818_v49, 1 }
  0xd8   : > { %v843_v59 = vrot.slane %v3016_v50, 1  ;;  %v297_v61 = vstv %s2990_s8  ;;  %v3034_v62 = vstv %s2998_s23  ;;  %v755_v63 = vrot.slane %v748_v54, 6  ;;  %s3202_s8 = sld [smem:[#allocation10 + $0x25]] }
  0xd9   : > { %v733_v13 = vrot.slane %v726_v9, 5  ;;  %v668_v16 = vrot.slane %v662_v11, 4  ;;  %v3036_v0 = vstv %s2358_s25  ;;  %v3042_v2 = vmul.f32 %v297_v61, %v2879_v46  ;;  %s3235_s23 = sld [smem:[#allocation10 + $0x2a]] }
  0xda   : > { %v826_v8 = vsel %vm304_vm4, %v823_v40, %v825_v55  ;;  %v298_v9 = vmul.f32 %v297_v61, %v2866_v41  ;;  %v877_v11 = vstv %s2387_s5  ;;  %v3061_v14 = vmul.f32 %v314_v58, %v2876_v44  ;;  %s3286_s25 = sld [smem:[#allocation10 + $0x5b]] }
  0xdb   : > { %v734_v20 = vsel %vm444_vm8, %v731_v12, %v733_v13  ;;  %v670_v21 = vsel %vm409_vm7, %v668_v16, %v669_v48  ;;  %v315_v13 = vmul.f32 %v314_v58, %v2862_v37  ;;  %v333_v35 = vmul.f32 %v3036_v0, %v2866_v41  ;;  %s3370_s5 = sld [smem:[#allocation10 + $0x34]] }
  0xdc   : > { %v880_v49 = vmul.f32 %v877_v11, %v2905_v5 }
  0xdd   : > { %591 = vrot.lane.b32.xlu1 %v588_v19, %s2706_s29  ;;  %v765_v19 = vstv %s2381_s20  ;;  %s3026_s20 = sld [smem:[#allocation10 + $0x54]]  ;;  %v321_v28 = vrot.slane %v315_v13, 1 }
  0xde   : > { %v767_v22 = vmul.f32 %v765_v19, %v2876_v44  ;;  %v768_v31 = vmul.f32 %v765_v19, %v2905_v5 }
  0xdf   : > { %611 = vrot.lane.b32.xlu0 %v608_v24, %s2706_s29  ;;  %547 = vrot.lane.b32.xlu2 %v544_v25, %s2706_s29  ;;  %v753_v24 = vrot.slane %v2970_v17, 6  ;;  %v766_v25 = vmul.f32 %v765_v19, %v2862_v37  ;;  %v306_v19 = vrot.slane %v3042_v2, 1  ;;  %v878_v17 = vmul.f32 %v877_v11, %v2862_v37 }
  0xe0   : > { %v773_v27 = vrot.slane %v767_v22, 6  ;;  %v775_v36 = vrot.slane %v768_v31, 6  ;;  %v3081_v22 = vstv %s3022_s18  ;;  %s2399_s18 = sld [smem:[#allocation10 + $0x3b]] }
  0xe1   : > { %v754_v29 = vsel %vm479_vm9, %v752_v26, %v753_v24  ;;  %v772_v30 = vrot.slane %v766_v25, 6  ;;  %v756_v16 = vsel %vm479_vm9, %v753_v24, %v755_v63  ;;  %v305_v24 = vrot.slane %v298_v9, 1 }
  0xe2   : > { %v776_v43 = vsel %vm479_vm9, %v773_v27, %v775_v36  ;;  %v836_v26 = vmul.f32 %v835_v42, %v2862_v37 }
  0xe3   : > { %v3084_v23 = vstv %s3026_s20  ;;  %s2708_s20 = smov 125  }
  0xe5   : > { %631 = vrot.lane.b32.xlu1 %v628_v33, %s2706_s29  ;;  %v774_v33 = vsel %vm479_vm9, %v772_v30, %v773_v27  ;;  %v300_v27 = vmul.f32 %v297_v61, %v2881_v47  ;;  %v3093_v30 = vmul.f32 %v3034_v62, %v2876_v44 }
  0xe7   : > { %651 = vrot.lane.b32.xlu0 %v648_v38, %s2706_s29  ;;  %569 = vrot.lane.b32.xlu2 %v566_v39, %s2706_s29  ;;  %v816_v38 = vmul.f32 %v815_v32, %v2866_v41  ;;  %v724_v39 = vmul.f32 %v723_v4, %v2862_v37  ;;  %v3046_v4 = vstv %s3006_s30  ;;  %v357_v61 = vrot.slane %v3093_v30, 2  ;;  %s3305_s30 = sld [smem:[#allocation10 + $0x5d]] }
  0xe9   : > { %v822_v45 = vrot.slane %v816_v38, 1  ;;  %v730_v48 = vrot.slane %v724_v39, 5  ;;  %v3103_v38 = vmul.f32 %v3036_v0, %v2879_v46  ;;  %v884_v39 = vrot.slane %v878_v17, 2 }
  0xeb   : > { %v824_v52 = vsel %vm304_vm4, %v822_v45, %v823_v40  ;;  %v732_v53 = vsel %vm444_vm8, %v730_v48, %v731_v12  ;;  %v842_v45 = vrot.slane %v836_v26, 1  ;;  %v308_v48 = vrot.slane %v300_v27, 1 }
  0xec   : > { %v341_v2 = vrot.slane %v3103_v38, 2 }
  0xed   : > { %653 = vrot.lane.b32.xlu1 %v650_v51, %s2706_s29  ;;  %v838_v51 = vmul.f32 %v835_v42, %v2905_v5  ;;  %v844_v54 = vsel %vm304_vm4, %v842_v45, %v843_v59 }
  0xef   : > { %675 = vrot.lane.b32.xlu0 %v672_v56, %s2706_s29  ;;  %609 = vrot.lane.b32.xlu2 %v606_v57, %s2706_s29  ;;  %v285_v56 = vstv %s2982_s6  ;;  %v290_v57 = vstv %s2984_s7  ;;  %v845_v60 = vrot.slane %v838_v51, 1  ;;  %s3164_s6 = sld [smem:[#allocation10 + $0x4f]] }
  0xf0   : > { %v291_v3 = vmul.f32 %v290_v57, %v2862_v37  ;;  %v286_v18 = vmul.f32 %v285_v56, %v2866_v41  ;;  %v292_v40 = vmul.f32 %v290_v57, %v2876_v44  ;;  %v287_v42 = vmul.f32 %v285_v56, %v2879_v46  ;;  %s3183_s7 = sld [smem:[#allocation10 + $0x23]] }
  0xf1   : > { %v846_v12 = vsel %vm304_vm4, %v843_v59, %v845_v60 }
  0xf5   : > { %693 = vrot.lane.b32.xlu1 %v690_v1, %s2706_s29  ;;  %v3039_v1 = vstv %s3002_s24  ;;  %s3269_s24 = sld [smem:[#allocation10 + $0x2c]] }
  0xf6   : > { %v3129_v63 = vmul.f32 %v3039_v1, %v2862_v37 }
  0xf7   : > { %715 = vrot.lane.b32.xlu0 %v712_v6, %s2706_s29  ;;  %633 = vrot.lane.b32.xlu2 %v630_v7, %s2706_s29  ;;  %v3049_v6 = vstv %s3008_s3  ;;  %v857_v7 = vstv %s3010_s17  ;;  %s3343_s3 = sld [smem:[#allocation10 + $0x3]] }
  0xf8   : > { %v3055_v10 = vmul.f32 %v857_v7, %v2879_v46  ;;  %v860_v57 = vmul.f32 %v857_v7, %v2881_v47  ;;  %s2398_s17 = sld [smem:[#allocation10 + $0xa]] }
  0xfa   : > { %v865_v25 = vrot.slane %v3055_v10, 2 }
  0xfd   : > { %717 = vrot.lane.b32.xlu1 %v714_v15, %s2706_s29  ;;  %v3064_v15 = vmul.f32 %v877_v11, %v2876_v44 }
  0xff   : > { %737 = vrot.lane.b32.xlu0 %v734_v20, %s2706_s29  ;;  %673 = vrot.lane.b32.xlu2 %v670_v21, %s2706_s29  ;;  %v858_v20 = vmul.f32 %v857_v7, %v2866_v41  ;;  %v3078_v21 = vmul.f32 %v3034_v62, %v2862_v37  ;;  %v885_v32 = vrot.slane %v3064_v15, 2  ;;  %v887_v7 = vrot.slane %v880_v49, 2 }
 0x101   : > { %v864_v36 = vrot.slane %v858_v20, 2  ;;  %v886_v51 = vsel %vm339_vm5, %v884_v39, %v885_v32  ;;  %v356_v60 = vrot.slane %v3078_v21, 2  ;;  %v3151_v20 = vmul.f32 %v3046_v4, %v2879_v46 }
 0x102   : > { %v888_v26 = vsel %vm339_vm5, %v885_v32, %v887_v7 }
 0x103   : > { %v358_v10 = vsel %vm339_vm5, %v356_v60, %v357_v61 }
 0x105   : > { %757 = vrot.lane.b32.xlu1 %v754_v29, %s2706_s29  ;;  %v322_v29 = vrot.slane %v3061_v14, 1  ;;  %v340_v14 = vrot.slane %v333_v35, 2  ;;  %v941_v35 = vstv %s3117_s27  ;;  %s2403_s27 = sld [smem:[#allocation10 + $0x49]] }
 0x106   : > { %v3172_v39 = vmul.f32 %v941_v35, %v2879_v46  ;;  %v942_v45 = vmul.f32 %v941_v35, %v2866_v41 }
 0x107   : > { %777 = vrot.lane.b32.xlu0 %v774_v33, %s2706_s29  ;;  %695 = vrot.lane.b32.xlu2 %v692_v34, %s2706_s29  ;;  %v293_v33 = vadd.f32 %v291_v3, %v286_v18  ;;  %v307_v34 = vsel %vm304_vm4, %v305_v24, %v306_v19  ;;  %v323_v59 = vsel %vm304_vm4, %v321_v28, %v322_v29  ;;  %v867_v18 = vrot.slane %v860_v57, 2 }
 0x108   : > { %v309_v3 = vsel %vm304_vm4, %v306_v19, %v308_v48  ;;  %v3147_v19 = vmul.f32 %v3049_v6, %v2862_v37  ;;  %v368_v24 = vmul.f32 %v3046_v4, %v2866_v41  ;;  %v949_v57 = vrot.slane %v3172_v39, 4 }
 0x109   : > { %v312_v50 = vadd.f32 %v307_v34, %v293_v33  ;;  %v868_v38 = vsel %vm339_vm5, %v865_v25, %v867_v18 }
 0x10b   : > { %v328_v9 = vadd.f32 %v323_v59, %v312_v50 }
 0x10d   : > { %779 = vrot.lane.b32.xlu1 %v776_v43, %s2706_s29  ;;  %v866_v43 = vsel %vm339_vm5, %v864_v36, %v865_v25 }
 0x10f   : > { %827 = vrot.lane.b32.xlu0 %v824_v52, %s2707_s16  ;;  %735 = vrot.lane.b32.xlu2 %v732_v53, %s2706_s29  ;;  %v317_v52 = vmul.f32 %v314_v58, %v2905_v5  ;;  %v899_v53 = vstv %s3066_s26  ;;  %v294_v58 = vadd.f32 %v292_v40, %v287_v42  ;;  %v391_v40 = vrot.slane %v3129_v63, 3  ;;  %s2400_s26 = sld [smem:[#allocation10 + $0x11]] }
 0x110   : > { %v3121_v55 = vmul.f32 %v899_v53, %v2879_v46  ;;  %v902_v56 = vmul.f32 %v899_v53, %v2881_v47  ;;  %v352_v42 = vmul.f32 %v3034_v62, %v2905_v5  ;;  %v900_v48 = vmul.f32 %v899_v53, %v2866_v41 }
 0x111   : > { %v324_v11 = vrot.slane %v317_v52, 1  ;;  %v313_v21 = vadd.f32 %v309_v3, %v294_v58  ;;  %v3191_v62 = vmul.f32 %v3049_v6, %v2876_v44  ;;  %v370_v63 = vmul.f32 %v3046_v4, %v2881_v47 }
 0x112   : > { %v907_v15 = vrot.slane %v3121_v55, 3  ;;  %v359_v60 = vrot.slane %v352_v42, 2  ;;  %v948_v3 = vrot.slane %v942_v45, 4  ;;  %v906_v7 = vrot.slane %v900_v48, 3 }
 0x113   : > { %v325_v33 = vsel %vm304_vm4, %v322_v29, %v324_v11  ;;  %v376_v29 = vrot.slane %v3151_v20, 3  ;;  %v3212_v11 = vmul.f32 %v3081_v22, %v2879_v46  ;;  %v961_v4 = vstv %s3164_s6  ;;  %s2404_s6 = sld [smem:[#allocation10 + $0x1f]] }
 0x114   : > { %v3220_v18 = vmul.f32 %v961_v4, %v2876_v44  ;;  %v964_v20 = vmul.f32 %v961_v4, %v2905_v5 }
 0x115   : > { %829 = vrot.lane.b32.xlu1 %v826_v8, %s2707_s16  ;;  %v3138_v8 = vmul.f32 %v3039_v1, %v2876_v44 }
 0x117   : > { %849 = vrot.lane.b32.xlu0 %v846_v12, %s2707_s16  ;;  %759 = vrot.lane.b32.xlu2 %v756_v16, %s2706_s29  ;;  %s3107_s29 = sld [smem:[#allocation10 + $0x48]]  ;;  %v335_v12 = vmul.f32 %v3036_v0, %v2881_v47  ;;  %v909_v16 = vrot.slane %v902_v56, 3  ;;  %v342_v0 = vsel %vm339_vm5, %v340_v14, %v341_v2  ;;  %v392_v49 = vrot.slane %v3138_v8, 3 }
 0x118   : > { %v347_v28 = vadd.f32 %v342_v0, %v328_v9  ;;  %v950_v14 = vsel %vm409_vm7, %v948_v3, %v949_v57  ;;  %v360_v0 = vsel %vm339_vm5, %v357_v61, %v359_v60 }
 0x119   : > { %v3095_v31 = vpop.permute.xlu2 %512  ;;  %v343_v34 = vrot.slane %v335_v12, 2  ;;  %v910_v36 = vsel %vm374_vm6, %v907_v15, %v909_v16  ;;  %v908_v16 = vsel %vm374_vm6, %v906_v7, %v907_v15  ;;  %v393_v61 = vsel %vm374_vm6, %v391_v40, %v392_v49 }
 0x11a   : > { %v363_v50 = vadd.f32 %v358_v10, %v347_v28  ;;  %v437_v28 = vstv %s3183_s7  ;;  %v983_v10 = vstv %s3202_s8  ;;  %s2405_s7 = sld [smem:[#allocation10 + $0x50]] }
 0x11b   : > { %v344_v55 = vsel %vm339_vm5, %v341_v2, %v343_v34  ;;  %v944_v2 = vmul.f32 %v941_v35, %v2881_v47  ;;  %v411_v34 = vrot.slane %v3212_v11, 4  ;;  %v984_v60 = vmul.f32 %v983_v10, %v2866_v41  ;;  %s2406_s8 = sld [smem:[#allocation10 + $0x26]] }
 0x11d   : > { %869 = vrot.lane.b32.xlu1 %v866_v43, %s2707_s16  ;;  %v919_v17 = vstv %s3107_s29  ;;  %v329_v43 = vadd.f32 %v325_v33, %v313_v21  ;;  %v426_v21 = vrot.slane %v3147_v19, 4  ;;  %v951_v30 = vrot.slane %v944_v2, 4  ;;  %s2401_s29 = sld [smem:[#allocation10 + $0x42]] }
 0x11e   : > { %v3159_v27 = vmul.f32 %v919_v17, %v2876_v44  ;;  %v920_v32 = vmul.f32 %v919_v17, %v2862_v37  ;;  %v922_v12 = vmul.f32 %v919_v17, %v2905_v5  ;;  %v427_v17 = vrot.slane %v3191_v62, 4 }
 0x11f   : > { %889 = vrot.lane.b32.xlu0 %v886_v51, %s2707_s16  ;;  %847 = vrot.lane.b32.xlu2 %v844_v54, %s2707_s16  ;;  %v375_v51 = vrot.slane %v368_v24, 3  ;;  %v403_v54 = vmul.f32 %v3081_v22, %v2866_v41  ;;  %v348_v58 = vadd.f32 %v344_v55, %v329_v43  ;;  %v378_v24 = vrot.slane %v370_v63, 3 }
 0x120   : > { %v927_v25 = vrot.slane %v3159_v27, 3  ;;  %v926_v56 = vrot.slane %v920_v32, 3  ;;  %v971_v32 = vrot.slane %v964_v20, 4  ;;  %v929_v39 = vrot.slane %v922_v12, 3 }
 0x121   : > { %v3142_v13 = vpop.permute.xlu2 %514  ;;  %v377_v53 = vsel %vm374_vm6, %v375_v51, %v376_v29  ;;  %v364_v19 = vadd.f32 %v360_v0, %v348_v58  ;;  %v410_v33 = vrot.slane %v403_v54, 4  ;;  %v405_v43 = vmul.f32 %v3081_v22, %v2881_v47 }
 0x122   : > { %v928_v59 = vsel %vm374_vm6, %v926_v56, %v927_v25  ;;  %v382_v9 = vadd.f32 %v377_v53, %v363_v50  ;;  %v379_v40 = vsel %vm374_vm6, %v376_v29, %v378_v24  ;;  %v952_v48 = vsel %vm409_vm7, %v949_v57, %v951_v30 }
 0x123   : > { %v383_v45 = vadd.f32 %v379_v40, %v364_v19  ;;  %v3254_v50 = vmul.f32 %v983_v10, %v2879_v46  ;;  %v1003_v51 = vstv %s3208_s15  ;;  %v3259_v54 = vmul.f32 %v3084_v23, %v2876_v44  ;;  %s2407_s15 = sld [smem:[#allocation10 + $0x57]] }
 0x124   : > { %v412_v55 = vsel %vm409_vm7, %v410_v33, %v411_v34  ;;  %v3263_v56 = vmul.f32 %v437_v28, %v2879_v46  ;;  %v3267_v22 = vmul.f32 %v1003_v51, %v2876_v44  ;;  %v930_v53 = vsel %vm374_vm6, %v927_v25, %v929_v39 }
 0x125   : > { %891 = vrot.lane.b32.xlu1 %v888_v26, %s2707_s16  ;;  %v387_v26 = vmul.f32 %v3039_v1, %v2905_v5  ;;  %v3242_v1 = vmul.f32 %v3084_v23, %v2862_v37  ;;  %v413_v58 = vrot.slane %v405_v43, 4  ;;  %v1004_v27 = vmul.f32 %v1003_v51, %v2862_v37 }
 0x126   : > { %v472_v25 = vstv %s3235_s23  ;;  %v991_v8 = vrot.slane %v3254_v50, 5  ;;  %v990_v20 = vrot.slane %v984_v60, 5  ;;  %v986_v43 = vmul.f32 %v983_v10, %v2881_v47  ;;  %s2408_s23 = sld [smem:[#allocation10 + $0x2d]] }
 0x127   : > { %913 = vrot.lane.b32.xlu0 %v910_v36, %s2707_s16  ;;  %871 = vrot.lane.b32.xlu2 %v868_v38, %s2707_s16  ;;  %v398_v36 = vadd.f32 %v393_v61, %v382_v9  ;;  %v969_v38 = vrot.slane %v3220_v18, 4  ;;  %v394_v42 = vrot.slane %v387_v26, 3  ;;  %v461_v2 = vrot.slane %v3242_v1, 5 }
 0x128   : > { %v438_v9 = vmul.f32 %v437_v28, %v2866_v41  ;;  %v446_v18 = vrot.slane %v3263_v56, 5  ;;  %v414_v24 = vsel %vm409_vm7, %v411_v34, %v413_v58  ;;  %v1010_v26 = vrot.slane %v1004_v27, 5 }
 0x129   : > { %v3193_v52 = vpop.permute.xlu2 %792  ;;  %v417_v29 = vadd.f32 %v412_v55, %v398_v36  ;;  %v972_v57 = vsel %vm409_vm7, %v969_v38, %v971_v32  ;;  %v395_v63 = vsel %vm374_vm6, %v392_v49, %v394_v42  ;;  %v962_v49 = vmul.f32 %v961_v4, %v2862_v37 }
 0x12a   : > { %v399_v7 = vadd.f32 %v395_v63, %v383_v45  ;;  %v440_v4 = vmul.f32 %v437_v28, %v2881_v47  ;;  %v992_v30 = vsel %vm444_vm8, %v990_v20, %v991_v8  ;;  %v1006_v1 = vmul.f32 %v1003_v51, %v2905_v5 }
 0x12b   : > { %v968_v61 = vrot.slane %v962_v49, 4  ;;  %v445_v33 = vrot.slane %v438_v9, 5  ;;  %v3312_v28 = vmul.f32 %v472_v25, %v2879_v46  ;;  %v1025_v36 = vstv %s3269_s24  ;;  %s2409_s24 = sld [smem:[#allocation10 + $0x5e]] }
 0x12c   : > { %v418_v19 = vadd.f32 %v414_v24, %v399_v7  ;;  %v3319_v39 = vmul.f32 %v1025_v36, %v2879_v46  ;;  %v1028_v42 = vmul.f32 %v1025_v36, %v2881_v47  ;;  %v457_v51 = vmul.f32 %v3084_v23, %v2905_v5 }
 0x12d   : > { %931 = vrot.lane.b32.xlu1 %v928_v59, %s2707_s16  ;;  %v422_v59 = vmul.f32 %v3049_v6, %v2905_v5  ;;  %v428_v6 = vsel %vm409_vm7, %v426_v21, %v427_v17  ;;  %v970_v32 = vsel %vm409_vm7, %v968_v61, %v969_v38  ;;  %v447_v40 = vsel %vm444_vm8, %v445_v33, %v446_v18 }
 0x12e   : > { %v433_v0 = vadd.f32 %v428_v6, %v417_v29  ;;  %v1013_v56 = vrot.slane %v1006_v1, 5  ;;  %v1035_v60 = vrot.slane %v1028_v42, 6  ;;  %v993_v63 = vrot.slane %v986_v43, 5 }
 0x12f   : > { %953 = vrot.lane.b32.xlu0 %v950_v14, %s2707_s16  ;;  %911 = vrot.lane.b32.xlu2 %v908_v16, %s2707_s16  ;;  %v3231_v15 = vpop.permute.xlu0 %525  ;;  %v1011_v14 = vrot.slane %v3267_v22, 5  ;;  %v462_v16 = vrot.slane %v3259_v54, 5  ;;  %v429_v21 = vrot.slane %v422_v59, 4  ;;  %v489_v54 = vstv %s3286_s25  ;;  %s3486_s25 = sld [smem:[#allocation10 + $0x4]] }
 0x130   : > { %v452_v55 = vadd.f32 %v447_v40, %v433_v0  ;;  %v491_v62 = vmul.f32 %v489_v54, %v2876_v44  ;;  %v464_v58 = vrot.slane %v457_v51, 5  ;;  %v475_v59 = vmul.f32 %v472_v25, %v2881_v47 }
 0x131   : > { %v3245_v35 = vpop.permute.xlu2 %807  ;;  %v1012_v34 = vsel %vm444_vm8, %v1010_v26, %v1011_v14  ;;  %v430_v45 = vsel %vm409_vm7, %v427_v17, %v429_v21  ;;  %v463_v22 = vsel %vm444_vm8, %v461_v2, %v462_v16  ;;  %v473_v17 = vmul.f32 %v472_v25, %v2866_v41 }
 0x132   : > { %v434_v10 = vadd.f32 %v430_v45, %v418_v19  ;;  %v1045_v7 = vstv %s3305_s30  ;;  %v468_v49 = vadd.f32 %v463_v22, %v452_v55  ;;  %v1014_v2 = vsel %vm444_vm8, %v1011_v14, %v1013_v56  ;;  %s3488_s30 = sld [smem:[#allocation10 + $0x35]] }
 0x133   : > { %v3350_v9 = vmul.f32 %v1045_v7, %v2876_v44  ;;  %v480_v20 = vrot.slane %v473_v17, 6  ;;  %v497_v0 = vrot.slane %v491_v62, 6  ;;  %v994_v47 = vsel %vm444_vm8, %v991_v8, %v993_v63 }
 0x134   : > { %v1046_v25 = vmul.f32 %v1045_v7, %v2862_v37  ;;  %v483_v24 = vrot.slane %v475_v59, 6  ;;  %v492_v26 = vmul.f32 %v489_v54, %v2905_v5  ;;  %v1026_v8 = vmul.f32 %v1025_v36, %v2866_v41 }
 0x135   : > { %955 = vrot.lane.b32.xlu1 %v952_v48, %s2707_s16  ;;  %v448_v48 = vrot.slane %v440_v4, 5  ;;  %v490_v4 = vmul.f32 %v489_v54, %v2862_v37  ;;  %v1053_v50 = vrot.slane %v3350_v9, 6  ;;  %v1048_v54 = vmul.f32 %v1045_v7, %v2905_v5 }
 0x136   : > { %v1032_v45 = vrot.slane %v1026_v8, 6  ;;  %v1080_v59 = vstv %s3370_s5  ;;  %v1115_v7 = vstv %s2399_s18  ;;  %s2414_s5 = sld [smem:[#allocation10 + $0x12]]  ;;  %s2709_s18 = smov 124  }
 0x137   : > { %975 = vrot.lane.b32.xlu0 %v972_v57, %s2707_s16  ;;  %933 = vrot.lane.b32.xlu2 %v930_v53, %s2707_s16  ;;  %v3283_v3 = vpop.permute.xlu1 %527  ;;  %v481_v57 = vrot.slane %v3312_v28, 6  ;;  %v1033_v53 = vrot.slane %v3319_v39, 6  ;;  %v449_v27 = vsel %vm444_vm8, %v446_v18, %v448_v48  ;;  %v465_v18 = vsel %vm444_vm8, %v462_v16, %v464_v58 }
 0x138   : > { %v453_v6 = vadd.f32 %v449_v27, %v434_v10  ;;  %v496_v37 = vrot.slane %v490_v4, 6  ;;  %v1052_v28 = vrot.slane %v1046_v25, 6  ;;  %v3397_v4 = vld [vmem:[#allocation5] sm:$0xff] }
 0x139   : > { %v3296_v11 = vpop.permute.xlu2 %547  ;;  %v3298_v12 = vpop.permute.xlu0 %794  ;;  %v1036_v21 = vsel %vm479_vm9, %v1033_v53, %v1035_v60  ;;  %v482_v14 = vsel %vm479_vm9, %v480_v20, %v481_v57  ;;  %v484_v39 = vsel %vm479_vm9, %v481_v57, %v483_v24  ;;  %v1034_v51 = vsel %vm479_vm9, %v1032_v45, %v1033_v53 }
 0x13a   : > { %v469_v61 = vadd.f32 %v465_v18, %v453_v6  ;;  %v498_v16 = vsel %vm479_vm9, %v496_v37, %v497_v0  ;;  %v1054_v40 = vsel %vm479_vm9, %v1052_v28, %v1053_v50  ;;  %v1055_v57 = vrot.slane %v1048_v54, 6  ;;  %v3409_v37 = vld [vmem:[#allocation4 + $0x8] sm:$0xff] }
 0x13b   : > { %v1095_v60 = vstv %s2398_s17  ;;  %v1116_v20 = vmul.f32 %v3397_v4, %v1115_v7  ;;  %v1157_v45 = vstv %s2401_s29  ;;  %s2413_s17 = sld [smem:[#allocation10 + $0x3c]] }
 0x13c   : > { %v488_v43 = vadd.f32 %v484_v39, %v469_v61  ;;  %v1097_v27 = vmul.f32 %v1095_v60, %v2879_v46  ;;  %v3405_v61 = vld [vmem:[#allocation4 + $0x10] sm:$0x3f]  ;;  %s2417_s29 = sld [smem:[#allocation10 + $0x4a]] }
 0x13d   : > { %995 = vrot.lane.b32.xlu1 %v992_v30, %s2707_s16  ;;  %v487_v30 = vadd.f32 %v482_v14, %v468_v49  ;;  %v3391_v49 = vld [vmem:[#allocation4] sm:$0xff] }
 0x13e   : > { %v1096_v6 = vmul.f32 %v3391_v49, %v1095_v60  ;;  %v1103_v9 = vrot.slane %v1097_v27, 1 }
 0x13f   : > { %1015 = vrot.lane.b32.xlu0 %v1012_v34, %s2707_s16  ;;  %973 = vrot.lane.b32.xlu2 %v970_v32, %s2707_s16  ;;  %v3331_v38 = vpop.permute.xlu1 %805  ;;  %v1067_v34 = vstv %s3343_s3  ;;  %v499_v32 = vrot.slane %v492_v26, 6  ;;  %v503_v42 = vadd.f32 %v498_v16, %v487_v30  ;;  %v1122_v26 = vrot.slane %v1116_v20, 1  ;;  %s2412_s3 = sld [smem:[#allocation10 + $0xb]] }
 0x140   : > { %v1068_v36 = vmul.f32 %v1067_v34, %v2866_v41  ;;  %v1069_v53 = vmul.f32 %v1067_v34, %v2879_v46  ;;  %v1137_v30 = vstv %s2400_s26  ;;  %s2415_s26 = sld [smem:[#allocation10 + $0x43]] }
 0x141   : > { %v3337_v29 = vpop.permute.xlu2 %569  ;;  %v3339_v23 = vpop.permute.xlu0 %549  ;;  %v518_v48 = vadd.f32 %v3095_v31, %v503_v42  ;;  %v500_v55 = vsel %vm479_vm9, %v497_v0, %v499_v32 }
 0x142   : > { %v504_v56 = vadd.f32 %v500_v55, %v488_v43 }
 0x143   : > { %v531_v22 = vadd.f32 %v3231_v15, %v518_v48  ;;  %v1082_v15 = vmul.f32 %v1080_v59, %v2876_v44 }
 0x144   : > { %v519_v31 = vadd.f32 %v3142_v13, %v504_v56 }
 0x145   : > { %1017 = vrot.lane.b32.xlu1 %v1014_v2, %s2707_s16  ;;  %v553_v17 = vadd.f32 %v3296_v11, %v531_v22  ;;  %v1056_v11 = vsel %vm479_vm9, %v1053_v50, %v1055_v57  ;;  %v1098_v50 = vmul.f32 %v3405_v61, %v1095_v60 }
 0x146   : > { %v532_v63 = vadd.f32 %v3283_v3, %v519_v31  ;;  %v1117_v3 = vmul.f32 %v1115_v7, %v2876_v44  ;;  %v1118_v44 = vmul.f32 %v1115_v7, %v2905_v5  ;;  %v1139_v5 = vmul.f32 %v3409_v37, %v1137_v30 }
 0x147   : > { %1039 = vrot.lane.b32.xlu0 %v1036_v21, %s2707_s16  ;;  %997 = vrot.lane.b32.xlu2 %v994_v47, %s2707_s16  ;;  %v568_v19 = vpop.permute.xlu1 %567  ;;  %v1102_v47 = vrot.slane %v1096_v6, 1  ;;  %v1105_v39 = vrot.slane %v1098_v50, 1  ;;  %v1199_v6 = vstv %s2403_s27  ;;  %s2419_s27 = sld [smem:[#allocation10 + $0x51]] }
 0x148   : > { %v573_v58 = vadd.f32 %v568_v19, %v553_v17  ;;  %v554_v13 = vadd.f32 %v3339_v23, %v532_v63  ;;  %v1123_v25 = vrot.slane %v1117_v3, 1  ;;  %v1081_v19 = vmul.f32 %v3397_v4, %v1080_v59 }
 0x149   : > { %v610_v1 = vpop.permute.xlu2 %609  ;;  %v590_v33 = vpop.permute.xlu0 %589  ;;  %v1104_v24 = vsel %vm304_vm4, %v1102_v47, %v1103_v9  ;;  %v1125_v34 = vrot.slane %v1118_v44, 1  ;;  %v1145_v43 = vrot.slane %v1139_v5, 2  ;;  %v1106_v55 = vsel %vm304_vm4, %v1103_v9, %v1105_v39 }
 0x14a   : > { %v595_v2 = vadd.f32 %v590_v33, %v573_v58  ;;  %v574_v21 = vadd.f32 %v3337_v29, %v554_v13  ;;  %v1124_v8 = vsel %vm304_vm4, %v1122_v26, %v1123_v25  ;;  %v1138_v63 = vmul.f32 %v3391_v49, %v1137_v30 }
 0x14b   : > { %v1126_v48 = vsel %vm304_vm4, %v1123_v25, %v1125_v34  ;;  %v1221_v5 = vstv %s2404_s6  ;;  %v1241_v34 = vstv %s2405_s7  ;;  %s2420_s6 = sld [smem:[#allocation10 + $0x27]] }
 0x14c   : > { %v615_v14 = vadd.f32 %v610_v1, %v595_v2  ;;  %v1140_v1 = vmul.f32 %v3405_v61, %v1137_v30  ;;  %v1144_v9 = vrot.slane %v1138_v63, 2  ;;  %v1222_v39 = vmul.f32 %v3391_v49, %v1221_v5  ;;  %s2421_s7 = sld [smem:[#allocation10 + $0x58]] }
 0x14d   : > { %1057 = vrot.lane.b32.xlu1 %v1054_v40, %s2707_s16 }
 0x14e   : > { %v1147_v40 = vrot.slane %v1140_v1, 2  ;;  %v1146_v25 = vsel %vm339_vm5, %v1144_v9, %v1145_v43 }
 0x14f   : > { %1072 = vrot.lane.b32.xlu0 %v1068_v36, %s2708_s20  ;;  %1037 = vrot.lane.b32.xlu2 %v1034_v51, %s2707_s16  ;;  %v592_v10 = vpop.permute.xlu1 %591  ;;  %v3416_v51 = vld [vmem:[#allocation5 + $0x8] sm:$0xff] }
 0x150   : > { %v596_v18 = vadd.f32 %v592_v10, %v574_v21  ;;  %v1159_v54 = vmul.f32 %v3416_v51, %v1157_v45  ;;  %v1158_v10 = vmul.f32 %v3397_v4, %v1157_v45  ;;  %v1148_v31 = vsel %vm339_vm5, %v1145_v43, %v1147_v40 }
 0x151   : > { %v634_v41 = vpop.permute.xlu2 %633  ;;  %v612_v62 = vpop.permute.xlu0 %611  ;;  %v1201_v20 = vmul.f32 %v3416_v51, %v1199_v6  ;;  %v1242_v40 = vmul.f32 %v3397_v4, %v1241_v34 }
 0x152   : > { %v616_v28 = vadd.f32 %v612_v62, %v596_v18  ;;  %v1164_v7 = vrot.slane %v1158_v10, 2 }
 0x153   : > { %v1207_v50 = vrot.slane %v1201_v20, 3  ;;  %v1283_v20 = vstv %s2407_s15  ;;  %s2423_s15 = sld [smem:[#allocation10 + $0x5f]] }
 0x154   : > { %v638_v36 = vadd.f32 %v634_v41, %v616_v28  ;;  %v1223_v28 = vmul.f32 %v3409_v37, %v1221_v5 }
 0x155   : > { %1074 = vrot.lane.b32.xlu1 %v1069_v53, %s2708_s20  ;;  %v1165_v53 = vrot.slane %v1159_v54, 2 }
 0x157   : > { %1087 = vrot.lane.b32.xlu0 %v1082_v15, %s2708_s20  ;;  %1059 = vrot.lane.b32.xlu2 %v1056_v11, %s2707_s16  ;;  %v632_v46 = vpop.permute.xlu1 %631  ;;  %s2402_s16 = sld [smem:[#allocation10 + $0x18]] }
 0x158   : > { %v637_v29 = vadd.f32 %v632_v46, %v615_v14  ;;  %v1166_v46 = vsel %vm339_vm5, %v1164_v7, %v1165_v53 }
 0x159   : > { %v674_v23 = vpop.permute.xlu2 %673  ;;  %v652_v0 = vpop.permute.xlu0 %651 }
 0x15a   : > { %v657_v42 = vadd.f32 %v652_v0, %v637_v29 }
 0x15c   : > { %v679_v22 = vadd.f32 %v674_v23, %v657_v42  ;;  %v3432_v23 = vld [vmem:[#allocation5 + $0x10] sm:$0x3f]  ;;  %v1243_v42 = vmul.f32 %v3416_v51, %v1241_v34 }
 0x15d   : > { %1107 = vrot.lane.b32.xlu1 %v1104_v24, %s2708_s20  ;;  %v1179_v56 = vstv %s2402_s16  ;;  %v1202_v0 = vmul.f32 %v3432_v23, %v1199_v6  ;;  %v1160_v44 = vmul.f32 %v3432_v23, %v1157_v45  ;;  %s2418_s16 = sld [smem:[#allocation10 + $0x20]] }
 0x15e   : > { %v1181_v17 = vmul.f32 %v3409_v37, %v1179_v56  ;;  %v1180_v60 = vmul.f32 %v3391_v49, %v1179_v56  ;;  %v1182_v11 = vmul.f32 %v3405_v61, %v1179_v56  ;;  %v1228_v56 = vrot.slane %v1222_v39, 4 }
 0x15f   : > { %1127 = vrot.lane.b32.xlu0 %v1124_v8, %s2708_s20  ;;  %1085 = vrot.lane.b32.xlu2 %v1081_v19, %s2708_s20  ;;  %v654_v33 = vpop.permute.xlu1 %653  ;;  %v1209_v29 = vrot.slane %v1202_v0, 3  ;;  %v1167_v8 = vrot.slane %v1160_v44, 2  ;;  %v1284_v44 = vmul.f32 %v3397_v4, %v1283_v20 }
 0x160   : > { %v658_v62 = vadd.f32 %v654_v33, %v638_v36  ;;  %v1187_v13 = vrot.slane %v1181_v17, 3  ;;  %v1186_v2 = vrot.slane %v1180_v60, 3  ;;  %v1189_v24 = vrot.slane %v1182_v11, 3 }
 0x161   : > { %v696_v16 = vpop.permute.xlu2 %695  ;;  %v676_v32 = vpop.permute.xlu0 %675  ;;  %v1229_v36 = vrot.slane %v1223_v28, 4 }
 0x162   : > { %v680_v27 = vadd.f32 %v676_v32, %v658_v62  ;;  %v1188_v47 = vsel %vm374_vm6, %v1186_v2, %v1187_v13  ;;  %v1190_v33 = vsel %vm374_vm6, %v1187_v13, %v1189_v24  ;;  %v1168_v32 = vsel %vm339_vm5, %v1165_v53, %v1167_v8 }
 0x163   : > { %v1248_v62 = vrot.slane %v1242_v40, 4  ;;  %v1244_v53 = vmul.f32 %v3432_v23, %v1241_v34 }
 0x164   : > { %v700_v21 = vadd.f32 %v696_v16, %v680_v27  ;;  %v1210_v16 = vsel %vm374_vm6, %v1207_v50, %v1209_v29 }
 0x165   : > { %1129 = vrot.lane.b32.xlu1 %v1126_v48, %s2708_s20  ;;  %v1200_v48 = vmul.f32 %v3397_v4, %v1199_v6  ;;  %v1251_v13 = vrot.slane %v1244_v53, 4 }
 0x167   : > { %1151 = vrot.lane.b32.xlu0 %v1148_v31, %s2708_s20  ;;  %1109 = vrot.lane.b32.xlu2 %v1106_v55, %s2708_s20  ;;  %v694_v41 = vpop.permute.xlu1 %693  ;;  %v1263_v31 = vstv %s2406_s8  ;;  %s2422_s8 = sld [smem:[#allocation10 + $0x2e]] }
 0x168   : > { %v699_v57 = vadd.f32 %v694_v41, %v679_v22  ;;  %v1249_v22 = vrot.slane %v1243_v42, 4  ;;  %v1230_v41 = vsel %vm409_vm7, %v1228_v56, %v1229_v36  ;;  %v1265_v60 = vmul.f32 %v3409_v37, %v1263_v31 }
 0x169   : > { %v736_v58 = vpop.permute.xlu2 %735  ;;  %v716_v59 = vpop.permute.xlu0 %715  ;;  %v1266_v63 = vmul.f32 %v3405_v61, %v1263_v31  ;;  %v1264_v29 = vmul.f32 %v3391_v49, %v1263_v31  ;;  %v1325_v42 = vstv %s2409_s24  ;;  %s2426_s24 = sld [smem:[#allocation10 + $0xc]] }
 0x16a   : > { %v721_v15 = vadd.f32 %v716_v59, %v699_v57  ;;  %v1206_v57 = vrot.slane %v1200_v48, 3  ;;  %v1250_v59 = vsel %vm409_vm7, %v1248_v62, %v1249_v22  ;;  %v1328_v48 = vmul.f32 %v3432_v23, %v1325_v42 }
 0x16c   : > { %v741_v3 = vadd.f32 %v736_v58, %v721_v15  ;;  %v1208_v27 = vsel %vm374_vm6, %v1206_v57, %v1207_v50 }
 0x16d   : > { %1169 = vrot.lane.b32.xlu1 %v1166_v46, %s2708_s20  ;;  %v1273_v46 = vrot.slane %v1266_v63, 5 }
 0x16f   : > { %1191 = vrot.lane.b32.xlu0 %v1188_v47, %s2708_s20  ;;  %1149 = vrot.lane.b32.xlu2 %v1146_v25, %s2708_s20  ;;  %v718_v14 = vpop.permute.xlu1 %717  ;;  %v1285_v47 = vmul.f32 %v3416_v51, %v1283_v20  ;;  %v1305_v25 = vstv %s2408_s23  ;;  %s3583_s23 = sld [smem:[#allocation10 + $0x5]] }
 0x170   : > { %v722_v18 = vadd.f32 %v718_v14, %v700_v21  ;;  %v1252_v21 = vsel %vm409_vm7, %v1249_v22, %v1251_v13  ;;  %v1307_v24 = vmul.f32 %v3409_v37, %v1305_v25  ;;  %v1308_v39 = vmul.f32 %v3405_v61, %v1305_v25 }
 0x171   : > { %v760_v26 = vpop.permute.xlu2 %759  ;;  %v738_v19 = vpop.permute.xlu0 %737  ;;  %v1291_v50 = vrot.slane %v1285_v47, 5 }
 0x172   : > { %v742_v30 = vadd.f32 %v738_v19, %v722_v18  ;;  %v1306_v19 = vmul.f32 %v3391_v49, %v1305_v25 }
 0x174   : > { %v764_v1 = vadd.f32 %v760_v26, %v742_v30  ;;  %v1312_v28 = vrot.slane %v1306_v19, 6 }
 0x175   : > { %1193 = vrot.lane.b32.xlu1 %v1190_v33, %s2708_s20  ;;  %v1313_v33 = vrot.slane %v1307_v24, 6 }
 0x177   : > { %1213 = vrot.lane.b32.xlu0 %v1210_v16, %s2708_s20  ;;  %1171 = vrot.lane.b32.xlu2 %v1168_v32, %s2708_s20  ;;  %v758_v43 = vpop.permute.xlu1 %757  ;;  %v1270_v32 = vrot.slane %v1264_v29, 5  ;;  %v1314_v40 = vsel %vm479_vm9, %v1312_v28, %v1313_v33 }
 0x178   : > { %v763_v45 = vadd.f32 %v758_v43, %v741_v3  ;;  %v1271_v3 = vrot.slane %v1265_v60, 5  ;;  %v1286_v43 = vmul.f32 %v3432_v23, %v1283_v20 }
 0x179   : > { %v848_v54 = vpop.permute.xlu2 %847  ;;  %v778_v55 = vpop.permute.xlu0 %777 }
 0x17a   : > { %v783_v10 = vadd.f32 %v778_v55, %v763_v45  ;;  %v1274_v18 = vsel %vm444_vm8, %v1271_v3, %v1273_v46  ;;  %v1272_v45 = vsel %vm444_vm8, %v1270_v32, %v1271_v3 }
 0x17c   : > { %v798_v17 = vadd.f32 %v3193_v52, %v783_v10  ;;  %v1224_v52 = vmul.f32 %v3405_v61, %v1221_v5  ;;  %v1315_v10 = vrot.slane %v1308_v39, 6 }
 0x17d   : > { %1233 = vrot.lane.b32.xlu1 %v1230_v41, %s2708_s20  ;;  %v1293_v41 = vrot.slane %v1286_v43, 5 }
 0x17e   : > { %v811_v58 = vadd.f32 %v3331_v38, %v798_v17  ;;  %v1231_v9 = vrot.slane %v1224_v52, 4  ;;  %v1335_v17 = vrot.slane %v1328_v48, 6  ;;  %v1316_v53 = vsel %vm479_vm9, %v1313_v33, %v1315_v10 }
 0x17f   : > { %1253 = vrot.lane.b32.xlu0 %v1250_v59, %s2708_s20  ;;  %1211 = vrot.lane.b32.xlu2 %v1208_v27, %s2708_s20  ;;  %v780_v15 = vpop.permute.xlu1 %779  ;;  %v1294_v63 = vsel %vm444_vm8, %v1291_v50, %v1293_v41  ;;  %v1347_v27 = vstv %s3486_s25  ;;  %v1326_v52 = vmul.f32 %v3397_v4, %v1325_v42  ;;  %v1437_v10 = vstv %s2415_s26  ;;  %s3591_s25 = sld [smem:[#allocation10 + $0x36]] }
 0x180   : > { %v784_v7 = vadd.f32 %v780_v15, %v764_v1  ;;  %v1290_v1 = vrot.slane %v1284_v44, 5  ;;  %v1349_v29 = vmul.f32 %v3409_v37, %v1347_v27  ;;  %s2431_s26 = sld [smem:[#allocation10 + $0x4b]] }
 0x181   : > { %v872_v11 = vpop.permute.xlu2 %871  ;;  %v828_v6 = vpop.permute.xlu0 %827  ;;  %v1332_v46 = vrot.slane %v1326_v52, 6 }
 0x182   : > { %v799_v2 = vadd.f32 %v3298_v12, %v784_v7  ;;  %v833_v38 = vadd.f32 %v828_v6, %v811_v58  ;;  %v1232_v12 = vsel %vm409_vm7, %v1229_v36, %v1231_v9  ;;  %v1292_v16 = vsel %vm444_vm8, %v1290_v1, %v1291_v50 }
 0x183   : > { %v1327_v36 = vmul.f32 %v3416_v51, %v1325_v42  ;;  %v1348_v6 = vmul.f32 %v3391_v49, %v1347_v27  ;;  %v1417_v50 = vstv %s2414_s5  ;;  %s2429_s5 = sld [smem:[#allocation10 + $0x44]] }
 0x184   : > { %v853_v0 = vadd.f32 %v848_v54, %v833_v38  ;;  %v812_v14 = vadd.f32 %v3245_v35, %v799_v2  ;;  %v1375_v38 = vstv %s2412_s3  ;;  %v1418_v33 = vmul.f32 %v3391_v49, %v1417_v50  ;;  %s2710_s3 = smov 123  }
 0x185   : > { %1255 = vrot.lane.b32.xlu1 %v1252_v21, %s2708_s20  ;;  %v1333_v31 = vrot.slane %v1327_v36, 6  ;;  %v1377_v20 = vmul.f32 %v3409_v37, %v1375_v38  ;;  %v1420_v36 = vmul.f32 %v3405_v61, %v1417_v50 }
 0x187   : > { %1277 = vrot.lane.b32.xlu0 %v1274_v18, %s2708_s20  ;;  %1235 = vrot.lane.b32.xlu2 %v1232_v12, %s2708_s20  ;;  %v830_v26 = vpop.permute.xlu1 %829  ;;  %v1336_v60 = vsel %vm479_vm9, %v1333_v31, %v1335_v17  ;;  %v1334_v9 = vsel %vm479_vm9, %v1332_v46, %v1333_v31  ;;  %v1383_v18 = vrot.slane %v1377_v20, 1  ;;  %v1440_v31 = vmul.f32 %v3432_v23, %v1437_v10 }
 0x188   : > { %v834_v30 = vadd.f32 %v830_v26, %v812_v14  ;;  %v1395_v26 = vstv %s2413_s17  ;;  %v1438_v20 = vmul.f32 %v3397_v4, %v1437_v10  ;;  %s2428_s17 = sld [smem:[#allocation10 + $0x13]] }
 0x189   : > { %v912_v8 = vpop.permute.xlu2 %911  ;;  %v850_v5 = vpop.permute.xlu0 %849  ;;  %v1398_v17 = vmul.f32 %v3432_v23, %v1395_v26  ;;  %v1447_v27 = vrot.slane %v1440_v31, 2 }
 0x18a   : > { %v854_v35 = vadd.f32 %v850_v5, %v834_v30  ;;  %v1397_v30 = vmul.f32 %v3416_v51, %v1395_v26  ;;  %v1396_v5 = vmul.f32 %v3397_v4, %v1395_v26  ;;  %v1501_v26 = vstv %s2418_s16  ;;  %s2434_s16 = sld [smem:[#allocation10 + $0x28]] }
 0x18b   : > { %v1405_v52 = vrot.slane %v1398_v17, 1 }
 0x18c   : > { %v876_v34 = vadd.f32 %v872_v11, %v854_v35  ;;  %v1360_v11 = vstv %s3488_s30  ;;  %v1419_v35 = vmul.f32 %v3409_v37, %v1417_v50  ;;  %v1402_v43 = vrot.slane %v1396_v5, 1  ;;  %s2427_s30 = sld [smem:[#allocation10 + $0x3d]] }
 0x18d   : > { %1295 = vrot.lane.b32.xlu1 %v1292_v16, %s2708_s20  ;;  %v1361_v2 = vmul.f32 %v3397_v4, %v1360_v11  ;;  %v1362_v24 = vmul.f32 %v3416_v51, %v1360_v11  ;;  %v1376_v16 = vmul.f32 %v3391_v49, %v1375_v38 }
 0x18f   : > { %1317 = vrot.lane.b32.xlu0 %v1314_v40, %s2708_s20  ;;  %1275 = vrot.lane.b32.xlu2 %v1272_v45, %s2708_s20  ;;  %v870_v54 = vpop.permute.xlu1 %869  ;;  %v1425_v40 = vrot.slane %v1419_v35, 2  ;;  %v1424_v45 = vrot.slane %v1418_v33, 2 }
 0x190   : > { %v875_v55 = vadd.f32 %v870_v54, %v853_v0  ;;  %v1378_v0 = vmul.f32 %v3405_v61, %v1375_v38 }
 0x191   : > { %v934_v56 = vpop.permute.xlu2 %933  ;;  %v890_v22 = vpop.permute.xlu0 %889 }
 0x192   : > { %v895_v62 = vadd.f32 %v890_v22, %v875_v55  ;;  %v1385_v12 = vrot.slane %v1378_v0, 1  ;;  %v1382_v55 = vrot.slane %v1376_v16, 1  ;;  %v1426_v22 = vsel %vm339_vm5, %v1424_v45, %v1425_v40 }
 0x194   : > { %v917_v57 = vadd.f32 %v912_v8, %v895_v62  ;;  %v1386_v8 = vsel %vm304_vm4, %v1383_v18, %v1385_v12  ;;  %v1384_v62 = vsel %vm304_vm4, %v1382_v55, %v1383_v18 }
 0x195   : > { %1319 = vrot.lane.b32.xlu1 %v1316_v53, %s2708_s20  ;;  %v1427_v53 = vrot.slane %v1420_v36, 2  ;;  %v1521_v36 = vstv %s2419_s27  ;;  %s2435_s27 = sld [smem:[#allocation10 + $0x59]] }
 0x196   : > { %v1523_v55 = vmul.f32 %v3416_v51, %v1521_v36 }
 0x197   : > { %1339 = vrot.lane.b32.xlu0 %v1336_v60, %s2708_s20  ;;  %1297 = vrot.lane.b32.xlu2 %v1294_v63, %s2708_s20  ;;  %v892_v58 = vpop.permute.xlu1 %891 }
 0x198   : > { %v896_v59 = vadd.f32 %v892_v58, %v876_v34  ;;  %v1403_v34 = vrot.slane %v1397_v30, 1 }
 0x199   : > { %v974_v15 = vpop.permute.xlu2 %973  ;;  %v914_v7 = vpop.permute.xlu0 %913 }
 0x19a   : > { %v918_v13 = vadd.f32 %v914_v7, %v896_v59  ;;  %v1404_v54 = vsel %vm304_vm4, %v1402_v43, %v1403_v34  ;;  %v1406_v46 = vsel %vm304_vm4, %v1403_v34, %v1405_v52 }
 0x19c   : > { %v938_v3 = vadd.f32 %v934_v56, %v918_v13  ;;  %v1439_v56 = vmul.f32 %v3416_v51, %v1437_v10  ;;  %v1428_v13 = vsel %vm339_vm5, %v1425_v40, %v1427_v53  ;;  %v1543_v10 = vstv %s2420_s6  ;;  %s2436_s6 = sld [smem:[#allocation10 + $0x2f]] }
 0x19d   : > { %1352 = vrot.lane.b32.xlu1 %v1348_v6, %s2709_s18  ;;  %v1479_v6 = vstv %s2417_s29  ;;  %v1545_v31 = vmul.f32 %v3409_v37, %v1543_v10  ;;  %v1529_v53 = vrot.slane %v1523_v55, 4  ;;  %s2433_s29 = sld [smem:[#allocation10 + $0x52]] }
 0x19e   : > { %v1445_v59 = vrot.slane %v1439_v56, 2  ;;  %v1481_v38 = vmul.f32 %v3416_v51, %v1479_v6 }
 0x19f   : > { %1365 = vrot.lane.b32.xlu0 %v1361_v2, %s2709_s18  ;;  %1337 = vrot.lane.b32.xlu2 %v1334_v9, %s2708_s20  ;;  %v932_v21 = vpop.permute.xlu1 %931  ;;  %s2416_s20 = sld [smem:[#allocation10 + $0x19]]  ;;  %v1551_v52 = vrot.slane %v1545_v31, 5 }
 0x1a0   : > { %v937_v47 = vadd.f32 %v932_v21, %v917_v57  ;;  %v1487_v12 = vrot.slane %v1481_v38, 3 }
 0x1a1   : > { %v998_v25 = vpop.permute.xlu2 %997  ;;  %v954_v44 = vpop.permute.xlu0 %953 }
 0x1a2   : > { %v959_v14 = vadd.f32 %v954_v44, %v937_v47  ;;  %v1480_v47 = vmul.f32 %v3397_v4, %v1479_v6 }
 0x1a4   : > { %v979_v19 = vadd.f32 %v974_v15, %v959_v14  ;;  %v1486_v50 = vrot.slane %v1480_v47, 3 }
 0x1a5   : > { %1367 = vrot.lane.b32.xlu1 %v1362_v24, %s2709_s18  ;;  %v1459_v15 = vstv %s2416_s20  ;;  %v1444_v24 = vrot.slane %v1438_v20, 2  ;;  %v1524_v20 = vmul.f32 %v3432_v23, %v1521_v36  ;;  %s2432_s20 = sld [smem:[#allocation10 + $0x21]] }
 0x1a6   : > { %v1461_v11 = vmul.f32 %v3409_v37, %v1459_v15  ;;  %v1460_v2 = vmul.f32 %v3391_v49, %v1459_v15  ;;  %v1488_v5 = vsel %vm374_vm6, %v1486_v50, %v1487_v12  ;;  %v1462_v33 = vmul.f32 %v3405_v61, %v1459_v15 }
 0x1a7   : > { %1389 = vrot.lane.b32.xlu0 %v1386_v8, %s2709_s18  ;;  %1354 = vrot.lane.b32.xlu2 %v1349_v29, %s2709_s18  ;;  %v956_v1 = vpop.permute.xlu1 %955  ;;  %v1482_v29 = vmul.f32 %v3432_v23, %v1479_v6  ;;  %v1503_v8 = vmul.f32 %v3409_v37, %v1501_v26  ;;  %v1446_v35 = vsel %vm339_vm5, %v1444_v24, %v1445_v59  ;;  %v1531_v24 = vrot.slane %v1524_v20, 4 }
 0x1a8   : > { %v960_v28 = vadd.f32 %v956_v1, %v938_v3  ;;  %v1448_v3 = vsel %vm339_vm5, %v1445_v59, %v1447_v27  ;;  %v1467_v21 = vrot.slane %v1461_v11, 3  ;;  %v1466_v18 = vrot.slane %v1460_v2, 3 }
 0x1a9   : > { %v1038_v32 = vpop.permute.xlu2 %1037  ;;  %v976_v39 = vpop.permute.xlu0 %975  ;;  %v1504_v1 = vmul.f32 %v3405_v61, %v1501_v26  ;;  %v1489_v16 = vrot.slane %v1482_v29, 3  ;;  %v1509_v43 = vrot.slane %v1503_v8, 4  ;;  %v1469_v45 = vrot.slane %v1462_v33, 3 }
 0x1aa   : > { %v980_v42 = vadd.f32 %v976_v39, %v960_v28  ;;  %v1468_v30 = vsel %vm374_vm6, %v1466_v18, %v1467_v21  ;;  %v1605_v29 = vstv %s2423_s15  ;;  %s2440_s15 = sld [smem:[#allocation10 + $0xd]] }
 0x1ab   : > { %v1511_v40 = vrot.slane %v1504_v1, 4  ;;  %v1607_v1 = vmul.f32 %v3416_v51, %v1605_v29 }
 0x1ac   : > { %v1002_v48 = vadd.f32 %v998_v25, %v980_v42 }
 0x1ad   : > { %1407 = vrot.lane.b32.xlu1 %v1404_v54, %s2709_s18  ;;  %v1490_v54 = vsel %vm374_vm6, %v1487_v12, %v1489_v16  ;;  %v1512_v56 = vsel %vm409_vm7, %v1509_v43, %v1511_v40 }
 0x1af   : > { %1429 = vrot.lane.b32.xlu0 %v1426_v22, %s2709_s18  ;;  %1387 = vrot.lane.b32.xlu2 %v1384_v62, %s2709_s18  ;;  %v996_v41 = vpop.permute.xlu1 %995  ;;  %v1470_v22 = vsel %vm374_vm6, %v1467_v21, %v1469_v45  ;;  %v1522_v62 = vmul.f32 %v3397_v4, %v1521_v36  ;;  %v1613_v45 = vrot.slane %v1607_v1, 6  ;;  %v1697_v1 = vstv %s2428_s17  ;;  %s2443_s17 = sld [smem:[#allocation10 + $0x45]] }
 0x1b0   : > { %v1001_v57 = vadd.f32 %v996_v41, %v979_v19  ;;  %v1502_v41 = vmul.f32 %v3391_v49, %v1501_v26  ;;  %v1585_v26 = vstv %s2422_s8  ;;  %s3685_s8 = sld [smem:[#allocation10 + $0x6]] }
 0x1b1   : > { %v1060_v60 = vpop.permute.xlu2 %1059  ;;  %v1016_v63 = vpop.permute.xlu0 %1015  ;;  %v1528_v27 = vrot.slane %v1522_v62, 4  ;;  %v1587_v50 = vmul.f32 %v3409_v37, %v1585_v26  ;;  %v1588_v62 = vmul.f32 %v3405_v61, %v1585_v26 }
 0x1b2   : > { %v1021_v58 = vadd.f32 %v1016_v63, %v1001_v57  ;;  %v1508_v15 = vrot.slane %v1502_v41, 4 }
 0x1b3   : > { %v1530_v11 = vsel %vm409_vm7, %v1528_v27, %v1529_v53  ;;  %v1593_v16 = vrot.slane %v1587_v50, 6  ;;  %v1627_v27 = vstv %s3583_s23  ;;  %s3698_s23 = sld [smem:[#allocation10 + $0x37]] }
 0x1b4   : > { %v1043_v7 = vadd.f32 %v1038_v32, %v1021_v58  ;;  %v1510_v38 = vsel %vm409_vm7, %v1508_v15, %v1509_v43  ;;  %v1655_v15 = vstv %s2426_s24  ;;  %s2441_s24 = sld [smem:[#allocation10 + $0x3e]] }
 0x1b5   : > { %1431 = vrot.lane.b32.xlu1 %v1428_v13, %s2709_s18 }
 0x1b7   : > { %1451 = vrot.lane.b32.xlu0 %v1448_v3, %s2709_s18  ;;  %1409 = vrot.lane.b32.xlu2 %v1406_v46, %s2709_s18  ;;  %v1018_v9 = vpop.permute.xlu1 %1017  ;;  %v1563_v3 = vstv %s2421_s7  ;;  %s2437_s7 = sld [smem:[#allocation10 + $0x60]] }
 0x1b8   : > { %v1022_v0 = vadd.f32 %v1018_v9, %v1002_v48  ;;  %v1565_v46 = vmul.f32 %v3416_v51, %v1563_v3  ;;  %v1566_v9 = vmul.f32 %v3432_v23, %v1563_v3 }
 0x1b9   : > { %v1086_v25 = vpop.permute.xlu2 %1085  ;;  %v1040_v44 = vpop.permute.xlu0 %1039 }
 0x1ba   : > { %v1044_v14 = vadd.f32 %v1040_v44, %v1022_v0  ;;  %v1571_v18 = vrot.slane %v1565_v46, 5  ;;  %v1573_v12 = vrot.slane %v1566_v9, 5  ;;  %v1656_v46 = vmul.f32 %v3391_v49, %v1655_v15 }
 0x1bc   : > { %v1064_v19 = vadd.f32 %v1060_v60, %v1044_v14  ;;  %v1544_v60 = vmul.f32 %v3391_v49, %v1543_v10  ;;  %v1574_v8 = vsel %vm444_vm8, %v1571_v18, %v1573_v12 }
 0x1bd   : > { %1471 = vrot.lane.b32.xlu1 %v1468_v30, %s2709_s18 }
 0x1be   : > { %v1550_v6 = vrot.slane %v1544_v60, 5 }
 0x1bf   : > { %1491 = vrot.lane.b32.xlu0 %v1488_v5, %s2709_s18  ;;  %1449 = vrot.lane.b32.xlu2 %v1446_v35, %s2709_s18  ;;  %v1058_v28 = vpop.permute.xlu1 %1057  ;;  %v1532_v5 = vsel %vm409_vm7, %v1529_v53, %v1531_v24  ;;  %v1586_v35 = vmul.f32 %v3391_v49, %v1585_v26 }
 0x1c0   : > { %v1063_v34 = vadd.f32 %v1058_v28, %v1043_v7  ;;  %v1546_v7 = vmul.f32 %v3405_v61, %v1543_v10  ;;  %v1552_v2 = vsel %vm444_vm8, %v1550_v6, %v1551_v52  ;;  %v1564_v28 = vmul.f32 %v3397_v4, %v1563_v3 }
 0x1c1   : > { %v1110_v32 = vpop.permute.xlu2 %1109  ;;  %v1073_v39 = vpop.permute.xlu0 %1072  ;;  %v1592_v40 = vrot.slane %v1586_v35, 6  ;;  %v1608_v10 = vmul.f32 %v3432_v23, %v1605_v29  ;;  %v1640_v3 = vstv %s3591_s25  ;;  %s2711_s25 = smov 122  }
 0x1c2   : > { %v1078_v42 = vadd.f32 %v1073_v39, %v1063_v34  ;;  %v1553_v47 = vrot.slane %v1546_v7, 5  ;;  %v1570_v36 = vrot.slane %v1564_v28, 5 }
 0x1c3   : > { %v1615_v41 = vrot.slane %v1608_v10, 6 }
 0x1c4   : > { %v1091_v48 = vadd.f32 %v1086_v25, %v1078_v42  ;;  %v1554_v30 = vsel %vm444_vm8, %v1551_v52, %v1553_v47  ;;  %v1629_v52 = vmul.f32 %v3409_v37, %v1627_v27  ;;  %v1662_v47 = vrot.slane %v1656_v46, 1 }
 0x1c5   : > { %1493 = vrot.lane.b32.xlu1 %v1490_v54, %s2709_s18  ;;  %v1594_v54 = vsel %vm479_vm9, %v1592_v40, %v1593_v16 }
 0x1c7   : > { %1515 = vrot.lane.b32.xlu0 %v1512_v56, %s2709_s18  ;;  %1473 = vrot.lane.b32.xlu2 %v1470_v22, %s2709_s18  ;;  %v1075_v17 = vpop.permute.xlu1 %1074  ;;  %v1572_v22 = vsel %vm444_vm8, %v1570_v36, %v1571_v18 }
 0x1c8   : > { %v1079_v57 = vadd.f32 %v1075_v17, %v1064_v19 }
 0x1c9   : > { %v1150_v63 = vpop.permute.xlu2 %1149  ;;  %v1088_v58 = vpop.permute.xlu0 %1087 }
 0x1ca   : > { %v1092_v59 = vadd.f32 %v1088_v58, %v1079_v57 }
 0x1cc   : > { %v1114_v13 = vadd.f32 %v1110_v32, %v1092_v59  ;;  %v1606_v32 = vmul.f32 %v3397_v4, %v1605_v29  ;;  %v1616_v59 = vsel %vm479_vm9, %v1613_v45, %v1615_v41 }
 0x1cd   : > { %1533 = vrot.lane.b32.xlu1 %v1530_v11, %s2709_s18 }
 0x1ce   : > { %v1612_v55 = vrot.slane %v1606_v32, 6  ;;  %v1698_v32 = vmul.f32 %v3391_v49, %v1697_v1 }
 0x1cf   : > { %1555 = vrot.lane.b32.xlu0 %v1552_v2, %s2709_s18  ;;  %1513 = vrot.lane.b32.xlu2 %v1510_v38, %s2709_s18  ;;  %v1108_v0 = vpop.permute.xlu1 %1107 }
 0x1d0   : > { %v1113_v21 = vadd.f32 %v1108_v0, %v1091_v48  ;;  %v1614_v56 = vsel %vm479_vm9, %v1612_v55, %v1613_v45  ;;  %v1641_v0 = vmul.f32 %v3397_v4, %v1640_v3 }
 0x1d1   : > { %v1172_v25 = vpop.permute.xlu2 %1171  ;;  %v1128_v44 = vpop.permute.xlu0 %1127 }
 0x1d2   : > { %v1133_v14 = vadd.f32 %v1128_v44, %v1113_v21  ;;  %v1628_v44 = vmul.f32 %v3391_v49, %v1627_v27  ;;  %v1700_v27 = vmul.f32 %v3405_v61, %v1697_v1 }
 0x1d4   : > { %v1155_v19 = vadd.f32 %v1150_v63, %v1133_v14  ;;  %v1595_v63 = vrot.slane %v1588_v62, 6  ;;  %v1675_v14 = vstv %s2427_s30  ;;  %s2442_s30 = sld [smem:[#allocation10 + $0x14]] }
 0x1d5   : > { %1557 = vrot.lane.b32.xlu1 %v1554_v30, %s2709_s18  ;;  %v1677_v12 = vmul.f32 %v3416_v51, %v1675_v14  ;;  %v1678_v24 = vmul.f32 %v3432_v23, %v1675_v14 }
 0x1d6   : > { %v1596_v7 = vsel %vm479_vm9, %v1593_v16, %v1595_v63  ;;  %v1642_v16 = vmul.f32 %v3416_v51, %v1640_v3 }
 0x1d7   : > { %1577 = vrot.lane.b32.xlu0 %v1574_v8, %s2709_s18  ;;  %1535 = vrot.lane.b32.xlu2 %v1532_v5, %s2709_s18  ;;  %v1130_v33 = vpop.permute.xlu1 %1129  ;;  %v1683_v5 = vrot.slane %v1677_v12, 1  ;;  %v1685_v35 = vrot.slane %v1678_v24, 1  ;;  %v3642_v12 = vld [vmem:[#allocation4] sm:$0xff] }
 0x1d8   : > { %v1134_v34 = vadd.f32 %v1130_v33, %v1114_v13  ;;  %v1657_v13 = vmul.f32 %v3409_v37, %v1655_v15  ;;  %v1699_v33 = vmul.f32 %v3409_v37, %v1697_v1 }
 0x1d9   : > { %v1212_v39 = vpop.permute.xlu2 %1211  ;;  %v1152_v42 = vpop.permute.xlu0 %1151 }
 0x1da   : > { %v1156_v43 = vadd.f32 %v1152_v42, %v1134_v34  ;;  %v1663_v20 = vrot.slane %v1657_v13, 1  ;;  %v1686_v42 = vsel %vm304_vm4, %v1683_v5, %v1685_v35  ;;  %v1705_v45 = vrot.slane %v1699_v33, 2 }
 0x1dc   : > { %v1176_v48 = vadd.f32 %v1172_v25, %v1156_v43  ;;  %v1658_v25 = vmul.f32 %v3405_v61, %v1655_v15  ;;  %v1664_v18 = vsel %vm304_vm4, %v1662_v47, %v1663_v20 }
 0x1dd   : > { %1597 = vrot.lane.b32.xlu1 %v1594_v54, %s2709_s18  ;;  %v1676_v54 = vmul.f32 %v3397_v4, %v1675_v14 }
 0x1de   : > { %v1665_v30 = vrot.slane %v1658_v25, 1 }
 0x1df   : > { %1617 = vrot.lane.b32.xlu0 %v1614_v56, %s2709_s18  ;;  %1575 = vrot.lane.b32.xlu2 %v1572_v22, %s2709_s18  ;;  %v1170_v31 = vpop.permute.xlu1 %1169  ;;  %v1704_v56 = vrot.slane %v1698_v32, 2 }
 0x1e0   : > { %v1175_v17 = vadd.f32 %v1170_v31, %v1155_v19  ;;  %v1666_v34 = vsel %vm304_vm4, %v1663_v20, %v1665_v30 }
 0x1e1   : > { %v1236_v57 = vpop.permute.xlu2 %1235  ;;  %v1192_v53 = vpop.permute.xlu0 %1191  ;;  %v1706_v62 = vsel %vm339_vm5, %v1704_v56, %v1705_v45  ;;  %v1823_v56 = vstv %s2434_s16  ;;  %s2450_s16 = sld [smem:[#allocation10 + $0x30]] }
 0x1e2   : > { %v1197_v60 = vadd.f32 %v1192_v53, %v1175_v17 }
 0x1e4   : > { %v1217_v58 = vadd.f32 %v1212_v39, %v1197_v60  ;;  %v1717_v39 = vstv %s2429_s5  ;;  %s2445_s5 = sld [smem:[#allocation10 + $0x4c]] }
 0x1e5   : > { %1619 = vrot.lane.b32.xlu1 %v1616_v59, %s2709_s18  ;;  %v1719_v43 = vmul.f32 %v3416_v51, %v1717_v39  ;;  %v1720_v31 = vmul.f32 %v3432_v23, %v1717_v39 }
 0x1e7   : > { %1634 = vrot.lane.b32.xlu0 %v1629_v52, %s2710_s3  ;;  %1599 = vrot.lane.b32.xlu2 %v1596_v7, %s2709_s18  ;;  %v1194_v11 = vpop.permute.xlu1 %1193  ;;  %s2430_s18 = sld [smem:[#allocation10 + $0x1a]]  ;;  %v1725_v22 = vrot.slane %v1719_v43, 2  ;;  %v1727_v7 = vrot.slane %v1720_v31, 2  ;;  %v1843_v31 = vstv %s2435_s27 }
 0x1e8   : > { %v1198_v6 = vadd.f32 %v1194_v11, %v1176_v48  ;;  %v1718_v48 = vmul.f32 %v3397_v4, %v1717_v39  ;;  %s2451_s27 = sld [smem:[#allocation10 + $0x61]] }
 0x1e9   : > { %v1276_v2 = vpop.permute.xlu2 %1275  ;;  %v1214_v38 = vpop.permute.xlu0 %1213 }
 0x1ea   : > { %v1218_v9 = vadd.f32 %v1214_v38, %v1198_v6  ;;  %v1724_v41 = vrot.slane %v1718_v48, 2  ;;  %v1759_v38 = vstv %s2431_s26  ;;  %s2447_s26 = sld [smem:[#allocation10 + $0x53]] }
 0x1eb   : > { %v1761_v20 = vmul.f32 %v3416_v51, %v1759_v38  ;;  %v1762_v43 = vmul.f32 %v3432_v23, %v1759_v38 }
 0x1ec   : > { %v1240_v21 = vadd.f32 %v1236_v57, %v1218_v9  ;;  %v1682_v57 = vrot.slane %v1676_v54, 1  ;;  %v1726_v63 = vsel %vm339_vm5, %v1724_v41, %v1725_v22  ;;  %v1728_v9 = vsel %vm339_vm5, %v1725_v22, %v1727_v7  ;;  %v3657_v22 = vld [vmem:[#allocation4 + $0x8] sm:$0xff] }
 0x1ed   : > { %1645 = vrot.lane.b32.xlu1 %v1641_v0, %s2710_s3  ;;  %v1739_v53 = vstv %s2430_s18  ;;  %v1781_v0 = vstv %s2432_s20  ;;  %v1767_v30 = vrot.slane %v1761_v20, 3  ;;  %v1846_v20 = vmul.f32 %v3432_v23, %v1843_v31  ;;  %s2446_s18 = sld [smem:[#allocation10 + $0x22]] }
 0x1ee   : > { %v1741_v60 = vmul.f32 %v3409_v37, %v1739_v53  ;;  %v1742_v59 = vmul.f32 %v3405_v61, %v1739_v53  ;;  %v1783_v14 = vmul.f32 %v3409_v37, %v1781_v0  ;;  %v1782_v24 = vmul.f32 %v3642_v12, %v1781_v0  ;;  %s2448_s20 = sld [smem:[#allocation10 + $0x29]] }
 0x1ef   : > { %1667 = vrot.lane.b32.xlu0 %v1664_v18, %s2710_s3  ;;  %1632 = vrot.lane.b32.xlu2 %v1628_v44, %s2710_s3  ;;  %v1234_v26 = vpop.permute.xlu1 %1233  ;;  %v1760_v44 = vmul.f32 %v3397_v4, %v1759_v38  ;;  %v1784_v33 = vmul.f32 %v3405_v61, %v1781_v0 }
 0x1f0   : > { %v1239_v19 = vadd.f32 %v1234_v26, %v1217_v58  ;;  %v1684_v58 = vsel %vm304_vm4, %v1682_v57, %v1683_v5  ;;  %v1747_v3 = vrot.slane %v1741_v60, 3  ;;  %v1749_v46 = vrot.slane %v1742_v59, 3  ;;  %v3664_v60 = vld [vmem:[#allocation5 + $0x8] sm:$0xff]  ;;  %v3669_v59 = vld [vmem:[#allocation5] sm:$0xff] }
 0x1f1   : > { %v1298_v50 = vpop.permute.xlu2 %1297  ;;  %v1254_v29 = vpop.permute.xlu0 %1253  ;;  %v1740_v26 = vmul.f32 %v3642_v12, %v1739_v53  ;;  %v1766_v5 = vrot.slane %v1760_v44, 3  ;;  %v1789_v4 = vrot.slane %v1783_v14, 4  ;;  %v1788_v35 = vrot.slane %v1782_v24, 4 }
 0x1f2   : > { %v1259_v8 = vadd.f32 %v1254_v29, %v1239_v19  ;;  %v1750_v47 = vsel %vm374_vm6, %v1747_v3, %v1749_v46  ;;  %v1824_v53 = vmul.f32 %v3642_v12, %v1823_v56 }
 0x1f3   : > { %v1746_v37 = vrot.slane %v1740_v26, 3  ;;  %v1768_v1 = vsel %vm374_vm6, %v1766_v5, %v1767_v30  ;;  %v1790_v32 = vsel %vm409_vm7, %v1788_v35, %v1789_v4  ;;  %v1885_v35 = vstv %s2437_s7  ;;  %s2460_s7 = sshll.u32 %s2690_s12, 4 }
 0x1f4   : > { %v1281_v28 = vadd.f32 %v1276_v2, %v1259_v8  ;;  %v1707_v2 = vrot.slane %v1700_v27, 2  ;;  %v1844_v27 = vmul.f32 %v3669_v59, %v1843_v31 }
 0x1f5   : > { %1669 = vrot.lane.b32.xlu1 %v1666_v34, %s2710_s3  ;;  %v1748_v39 = vsel %vm374_vm6, %v1746_v37, %v1747_v3  ;;  %v1830_v3 = vrot.slane %v1824_v53, 5 }
 0x1f6   : > { %v1708_v25 = vsel %vm339_vm5, %v1705_v45, %v1707_v2  ;;  %v1791_v45 = vrot.slane %v1784_v33, 4  ;;  %v1850_v2 = vrot.slane %v1844_v27, 5  ;;  %v1935_v27 = vstv %s2440_s15 }
 0x1f7   : > { %1689 = vrot.lane.b32.xlu0 %v1686_v42, %s2710_s3  ;;  %1647 = vrot.lane.b32.xlu2 %v1642_v16, %s2710_s3  ;;  %v1256_v40 = vpop.permute.xlu1 %1255 }
 0x1f8   : > { %v1260_v36 = vadd.f32 %v1256_v40, %v1240_v21 }
 0x1f9   : > { %v1338_v55 = vpop.permute.xlu2 %1337  ;;  %v1278_v10 = vpop.permute.xlu0 %1277 }
 0x1fa   : > { %v1282_v49 = vadd.f32 %v1278_v10, %v1260_v36  ;;  %v1769_v10 = vrot.slane %v1762_v43, 3 }
 0x1fc   : > { %v1302_v17 = vadd.f32 %v1298_v50, %v1282_v49  ;;  %v1792_v49 = vsel %vm409_vm7, %v1789_v4, %v1791_v45  ;;  %v1770_v57 = vsel %vm374_vm6, %v1767_v30, %v1769_v10 }
 0x1fd   : > { %1709 = vrot.lane.b32.xlu1 %v1706_v62, %s2710_s3  ;;  %v1825_v62 = vmul.f32 %v3657_v22, %v1823_v56 }
 0x1ff   : > { %1729 = vrot.lane.b32.xlu0 %v1726_v63, %s2710_s3  ;;  %1687 = vrot.lane.b32.xlu2 %v1684_v58, %s2710_s3  ;;  %v1296_v52 = vpop.permute.xlu1 %1295  ;;  %v1845_v63 = vmul.f32 %v3664_v60, %v1843_v31 }
 0x200   : > { %v1301_v15 = vadd.f32 %v1296_v52, %v1281_v28  ;;  %v1801_v28 = vstv %s2433_s29  ;;  %s2449_s29 = sld [smem:[#allocation10 + $0x5a]] }
 0x201   : > { %v1355_v13 = vpop.permute.xlu2 %1354  ;;  %v1318_v11 = vpop.permute.xlu0 %1317  ;;  %v1803_v16 = vmul.f32 %v3416_v51, %v1801_v28  ;;  %v1804_v42 = vmul.f32 %v3432_v23, %v1801_v28  ;;  %v1802_v7 = vmul.f32 %v3669_v59, %v1801_v28  ;;  %v1851_v46 = vrot.slane %v1845_v63, 5 }
 0x202   : > { %v1323_v6 = vadd.f32 %v1318_v11, %v1301_v15  ;;  %v1831_v15 = vrot.slane %v1825_v62, 5 }
 0x203   : > { %v1811_v51 = vrot.slane %v1804_v42, 4  ;;  %v1852_v44 = vsel %vm444_vm8, %v1850_v2, %v1851_v46 }
 0x204   : > { %v1343_v21 = vadd.f32 %v1338_v55, %v1323_v6  ;;  %v1809_v55 = vrot.slane %v1803_v16, 4  ;;  %v1832_v38 = vsel %vm444_vm8, %v1830_v3, %v1831_v15  ;;  %v1886_v16 = vmul.f32 %v3669_v59, %v1885_v35 }
 0x205   : > { %1731 = vrot.lane.b32.xlu1 %v1728_v9, %s2710_s3  ;;  %v1808_v9 = vrot.slane %v1802_v7, 4  ;;  %v1936_v3 = vmul.f32 %v3642_v12, %v1935_v27 }
 0x206   : > { %v1812_v41 = vsel %vm409_vm7, %v1809_v55, %v1811_v51 }
 0x207   : > { %1753 = vrot.lane.b32.xlu0 %v1750_v47, %s2710_s3  ;;  %1711 = vrot.lane.b32.xlu2 %v1708_v25, %s2710_s3  ;;  %v1320_v18 = vpop.permute.xlu1 %1319  ;;  %v3676_v47 = vld [vmem:[#allocation4 + $0x10] sm:$0x3f]  ;;  %v1810_v14 = vsel %vm409_vm7, %v1808_v9, %v1809_v55 }
 0x208   : > { %v1324_v19 = vadd.f32 %v1320_v18, %v1302_v17  ;;  %v1826_v25 = vmul.f32 %v3676_v47, %v1823_v56 }
 0x209   : > { %v1388_v50 = vpop.permute.xlu2 %1387  ;;  %v1340_v29 = vpop.permute.xlu0 %1339 }
 0x20a   : > { %v1344_v8 = vadd.f32 %v1340_v29, %v1324_v19  ;;  %v1853_v19 = vrot.slane %v1846_v20, 5  ;;  %v1833_v4 = vrot.slane %v1826_v25, 5 }
 0x20c   : > { %v1359_v34 = vadd.f32 %v1355_v13, %v1344_v8  ;;  %v1854_v37 = vsel %vm444_vm8, %v1851_v46, %v1853_v19 }
 0x20d   : > { %1771 = vrot.lane.b32.xlu1 %v1768_v1, %s2710_s3  ;;  %v1887_v1 = vmul.f32 %v3664_v60, %v1885_v35 }
 0x20f   : > { %1793 = vrot.lane.b32.xlu0 %v1790_v32, %s2710_s3  ;;  %1751 = vrot.lane.b32.xlu2 %v1748_v39, %s2710_s3  ;;  %v1353_v61 = vpop.permute.xlu1 %1352  ;;  %v1893_v42 = vrot.slane %v1887_v1, 6 }
 0x210   : > { %v1358_v40 = vadd.f32 %v1353_v61, %v1343_v21  ;;  %v1865_v21 = vstv %s2436_s6  ;;  %s2348_s6 = sshll.u32 %s2830_s4, 4 }
 0x211   : > { %v1410_v36 = vpop.permute.xlu2 %1409  ;;  %v1366_v48 = vpop.permute.xlu0 %1365  ;;  %v1867_v18 = vmul.f32 %v3657_v22, %v1865_v21  ;;  %v1868_v24 = vmul.f32 %v3676_v47, %v1865_v21  ;;  %v1866_v43 = vmul.f32 %v3642_v12, %v1865_v21  ;;  %s194_s12 = scalar_lea.vmem [#allocation11], %s2348_s6 }
 0x212   : > { %v1371_v54 = vadd.f32 %v1366_v48, %v1358_v40  ;;  %v1907_v48 = vstv %s3685_s8 }
 0x213   : > { %v1873_v8 = vrot.slane %v1867_v18, 6  ;;  %v1875_v5 = vrot.slane %v1868_v24, 6  ;;  %v1872_v55 = vrot.slane %v1866_v43, 6  ;;  %v1908_v10 = vmul.f32 %v3642_v12, %v1907_v48 }
 0x214   : > { %v1393_v17 = vadd.f32 %v1388_v50, %v1371_v54 }
 0x215   : > { %1795 = vrot.lane.b32.xlu1 %v1792_v49, %s2710_s3  ;;  %v1876_v28 = vsel %vm479_vm9, %v1873_v8, %v1875_v5  ;;  %v1874_v56 = vsel %vm479_vm9, %v1872_v55, %v1873_v8  ;;  %v3703_v49 = vld [vmem:[#allocation5 + $0x10] sm:$0x3f] }
 0x216   : > { %v1888_v62 = vmul.f32 %v3703_v49, %v1885_v35 }
 0x217   : > { %1815 = vrot.lane.b32.xlu0 %v1812_v41, %s2710_s3  ;;  %1773 = vrot.lane.b32.xlu2 %v1770_v57, %s2710_s3  ;;  %v1368_v58 = vpop.permute.xlu1 %1367 }
 0x218   : > { %v1372_v52 = vadd.f32 %v1368_v58, %v1359_v34  ;;  %v1834_v34 = vsel %vm444_vm8, %v1831_v15, %v1833_v4  ;;  %v1895_v63 = vrot.slane %v1888_v62, 6  ;;  %v1909_v58 = vmul.f32 %v3657_v22, %v1907_v48 }
 0x219   : > { %v1450_v13 = vpop.permute.xlu2 %1449  ;;  %v1390_v11 = vpop.permute.xlu0 %1389  ;;  %v1937_v15 = vmul.f32 %v3657_v22, %v1935_v27 }
 0x21a   : > { %v1394_v6 = vadd.f32 %v1390_v11, %v1372_v52  ;;  %v1920_v52 = vstv %s3698_s23  ;;  %v1955_v11 = vstv %s2441_s24  ;;  %s2237_s23 = scalar_lea.hbm %s3844_s2, %s2460_s7  ;;  %s2238_s24 = sshll.u32 %s194_s12, 4  ;;  %s2239_s24 = int_to_ptr.vmem [resolvable:$true] %s2238_s24 }
 0x21b   : > { %v1957_v46 = vmul.f32 %v3664_v60, %v1955_v11  ;;  %v1943_v9 = vrot.slane %v1937_v15, 1  ;;  %v1956_v20 = vmul.f32 %v3669_v59, %v1955_v11  ;;  %v1921_v19 = vmul.f32 %v3669_v59, %v1920_v52 }
 0x21c   : > { %v1414_v0 = vadd.f32 %v1410_v36, %v1394_v6  ;;  %v1892_v36 = vrot.slane %v1886_v16, 6  ;;  %v1896_v6 = vsel %vm479_vm9, %v1893_v42, %v1895_v63 }
 0x21d   : > { %1835 = vrot.lane.b32.xlu1 %v1832_v38, %s2710_s3  ;;  %v1962_v24 = vrot.slane %v1956_v20, 1 }
 0x21e   : > { %v1894_v54 = vsel %vm479_vm9, %v1892_v36, %v1893_v42 }
 0x21f   : > { %1855 = vrot.lane.b32.xlu0 %v1852_v44, %s2710_s3  ;;  %1813 = vrot.lane.b32.xlu2 %v1810_v14, %s2710_s3  ;;  %v1408_v23 = vpop.permute.xlu1 %1407  ;;  %v1942_v44 = vrot.slane %v1936_v3, 1  ;;  %v1963_v14 = vrot.slane %v1957_v46, 1 }
 0x220   : > { %v1413_v26 = vadd.f32 %v1408_v23, %v1393_v17  ;;  %v1958_v23 = vmul.f32 %v3703_v49, %v1955_v11 }
 0x221   : > { %v1474_v30 = vpop.permute.xlu2 %1473  ;;  %v1430_v50 = vpop.permute.xlu0 %1429  ;;  %v1944_v18 = vsel %vm304_vm4, %v1942_v44, %v1943_v9 }
 0x222   : > { %v1435_v29 = vadd.f32 %v1430_v50, %v1413_v26  ;;  %v1964_v50 = vsel %vm304_vm4, %v1962_v24, %v1963_v14 }
 0x224   : > { %v1455_v33 = vadd.f32 %v1450_v13, %v1435_v29  ;;  %v1922_v13 = vmul.f32 %v3664_v60, %v1920_v52  ;;  %v1938_v29 = vmul.f32 %v3676_v47, %v1935_v27 }
 0x225   : > { %1857 = vrot.lane.b32.xlu1 %v1854_v37, %s2710_s3  ;;  %v1965_v37 = vrot.slane %v1958_v23, 1 }
 0x227   : > { %1879 = vrot.lane.b32.xlu0 %v1876_v28, %s2710_s3  ;;  %1837 = vrot.lane.b32.xlu2 %v1834_v34, %s2710_s3  ;;  %v1432_v32 = vpop.permute.xlu1 %1431  ;;  %v1945_v34 = vrot.slane %v1938_v29, 1  ;;  %v1966_v42 = vsel %vm304_vm4, %v1963_v14, %v1965_v37 }
 0x228   : > { %v1436_v39 = vadd.f32 %v1432_v32, %v1414_v0 }
 0x229   : > { %v1514_v61 = vpop.permute.xlu2 %1513  ;;  %v1452_v40 = vpop.permute.xlu0 %1451 }
 0x22a   : > { %v1456_v45 = vadd.f32 %v1452_v40, %v1436_v39  ;;  %v1997_v39 = vstv %s2443_s17 }
 0x22b   : > { %v1999_v43 = vmul.f32 %v3664_v60, %v1997_v39  ;;  %v1998_v48 = vmul.f32 %v3669_v59, %v1997_v39 }
 0x22c   : > { %v1478_v51 = vadd.f32 %v1474_v30, %v1456_v45  ;;  %v1977_v30 = vstv %s2442_s30  ;;  %v1946_v45 = vsel %vm304_vm4, %v1943_v9, %v1945_v34  ;;  %s2226_s30 = scalar_lea.sflag [#allocation8], %s2830_s4 }
 0x22d   : > { %1897 = vrot.lane.b32.xlu1 %v1894_v54, %s2710_s3  ;;  %v1979_v8 = vmul.f32 %v3657_v22, %v1977_v30  ;;  %v1980_v5 = vmul.f32 %v3676_v47, %v1977_v30 }
 0x22f   : > { %1912 = vrot.lane.b32.xlu0 %v1908_v10, %s2711_s25  ;;  %1877 = vrot.lane.b32.xlu2 %v1874_v56, %s2710_s3  ;;  %v1472_v31 = vpop.permute.xlu1 %1471  ;;  %v1985_v16 = vrot.slane %v1979_v8, 2  ;;  %v1987_v32 = vrot.slane %v1980_v5, 2  ;;  %v2005_v56 = vrot.slane %v1999_v43, 2 }
 0x230   : > { %v1477_v17 = vadd.f32 %v1472_v31, %v1455_v33 }
 0x231   : > { %v1536_v41 = vpop.permute.xlu2 %1535  ;;  %v1492_v57 = vpop.permute.xlu0 %1491  ;;  %v1988_v36 = vsel %vm339_vm5, %v1985_v16, %v1987_v32 }
 0x232   : > { %v1497_v53 = vadd.f32 %v1492_v57, %v1477_v17  ;;  %v2004_v57 = vrot.slane %v1998_v48, 2 }
 0x234   : > { %v1519_v7 = vadd.f32 %v1514_v61, %v1497_v53 }
 0x235   : > { %1914 = vrot.lane.b32.xlu1 %v1909_v58, %s2711_s25  ;;  %v2006_v58 = vsel %vm339_vm5, %v2004_v57, %v2005_v56 }
 0x237   : > { %1927 = vrot.lane.b32.xlu0 %v1922_v13, %s2711_s25  ;;  %1899 = vrot.lane.b32.xlu2 %v1896_v6, %s2710_s3  ;;  %v1494_v2 = vpop.permute.xlu1 %1493  ;;  %s2444_s3 = sld [smem:[#allocation10 + $0x1b]]  ;;  %v2039_v13 = vstv %s2445_s5 }
 0x238   : > { %v1498_v38 = vadd.f32 %v1494_v2, %v1478_v51  ;;  %v1978_v51 = vmul.f32 %v3642_v12, %v1977_v30  ;;  %v2041_v3 = vmul.f32 %v3664_v60, %v2039_v13  ;;  %v2042_v46 = vmul.f32 %v3703_v49, %v2039_v13 }
 0x239   : > { %v1576_v0 = vpop.permute.xlu2 %1575  ;;  %v1516_v21 = vpop.permute.xlu0 %1515 }
 0x23a   : > { %v1520_v25 = vadd.f32 %v1516_v21, %v1498_v38  ;;  %v1984_v63 = vrot.slane %v1978_v51, 2  ;;  %v2047_v44 = vrot.slane %v2041_v3, 3  ;;  %v2049_v14 = vrot.slane %v2042_v46, 3 }
 0x23c   : > { %v1540_v26 = vadd.f32 %v1536_v41, %v1520_v25  ;;  %v1986_v11 = vsel %vm339_vm5, %v1984_v63, %v1985_v16 }
 0x23d   : > { %1947 = vrot.lane.b32.xlu1 %v1944_v18, %s2711_s25  ;;  %v2019_v40 = vstv %s2444_s3  ;;  %v2061_v18 = vstv %s2446_s18 }
 0x23e   : > { %v2021_v54 = vmul.f32 %v3657_v22, %v2019_v40  ;;  %v2020_v62 = vmul.f32 %v3642_v12, %v2019_v40  ;;  %v2022_v52 = vmul.f32 %v3676_v47, %v2019_v40  ;;  %v2063_v23 = vmul.f32 %v3657_v22, %v2061_v18 }
 0x23f   : > { %1967 = vrot.lane.b32.xlu0 %v1964_v50, %s2711_s25  ;;  %1925 = vrot.lane.b32.xlu2 %v1921_v19, %s2711_s25  ;;  %v1534_v4 = vpop.permute.xlu1 %1533  ;;  %v2081_v19 = vstv %s2447_s26  ;;  %v2050_v50 = vsel %vm374_vm6, %v2047_v44, %v2049_v14  ;;  %v2062_v29 = vmul.f32 %v3642_v12, %v2061_v18  ;;  %s2632_s26 = scalar_lea.hbm %s3844_s2, 32 }
 0x240   : > { %v1539_v35 = vadd.f32 %v1534_v4, %v1519_v7  ;;  %v2027_v53 = vrot.slane %v2021_v54, 3  ;;  %v2026_v27 = vrot.slane %v2020_v62, 3  ;;  %v2000_v7 = vmul.f32 %v3703_v49, %v1997_v39 }
 0x241   : > { %v1600_v1 = vpop.permute.xlu2 %1599  ;;  %v1556_v33 = vpop.permute.xlu0 %1555  ;;  %v2029_v9 = vrot.slane %v2022_v52, 3  ;;  %v2083_v8 = vmul.f32 %v3664_v60, %v2081_v19  ;;  %v2040_v4 = vmul.f32 %v3669_v59, %v2039_v13  ;;  %v2069_v37 = vrot.slane %v2063_v23, 4 }
 0x242   : > { %v1561_v28 = vadd.f32 %v1556_v33, %v1539_v35  ;;  %v2028_v6 = vsel %vm374_vm6, %v2026_v27, %v2027_v53  ;;  %v2007_v25 = vrot.slane %v2000_v7, 2  ;;  %v2068_v16 = vrot.slane %v2062_v29, 4 }
 0x243   : > { %v2030_v24 = vsel %vm374_vm6, %v2027_v53, %v2029_v9  ;;  %v2089_v32 = vrot.slane %v2083_v8, 4  ;;  %v2046_v39 = vrot.slane %v2040_v4, 3  ;;  %v2145_v7 = vstv %s2450_s16 }
 0x244   : > { %v1581_v61 = vadd.f32 %v1576_v0, %v1561_v28  ;;  %v2008_v30 = vsel %vm339_vm5, %v2005_v56, %v2007_v25  ;;  %v2147_v3 = vmul.f32 %v3657_v22, %v2145_v7  ;;  %v2148_v23 = vmul.f32 %v3676_v47, %v2145_v7 }
 0x245   : > { %1969 = vrot.lane.b32.xlu1 %v1966_v42, %s2711_s25  ;;  %v2070_v42 = vsel %vm409_vm7, %v2068_v16, %v2069_v37  ;;  %v2048_v48 = vsel %vm374_vm6, %v2046_v39, %v2047_v44 }
 0x246   : > { %v2153_v14 = vrot.slane %v2147_v3, 6  ;;  %v2155_v4 = vrot.slane %v2148_v23, 6 }
 0x247   : > { %1949 = vrot.lane.b32.xlu2 %v1946_v45, %s2711_s25  ;;  %1991 = vrot.lane.b32.xlu0 %v1988_v36, %s2711_s25  ;;  %v1558_v55 = vpop.permute.xlu1 %1557  ;;  %v2064_v45 = vmul.f32 %v3676_v47, %v2061_v18  ;;  %v2103_v36 = vstv %s2448_s20 }
 0x248   : > { %v1562_v10 = vadd.f32 %v1558_v55, %v1540_v26  ;;  %v2105_v55 = vmul.f32 %v3657_v22, %v2103_v36  ;;  %v2106_v51 = vmul.f32 %v3676_v47, %v2103_v36  ;;  %v2156_v16 = vsel %vm479_vm9, %v2153_v14, %v2155_v4 }
 0x249   : > { %v1633_v31 = vpop.permute.xlu2 %1632  ;;  %v1578_v17 = vpop.permute.xlu0 %1577  ;;  %v2071_v57 = vrot.slane %v2064_v45, 4 }
 0x24a   : > { %v1582_v41 = vadd.f32 %v1578_v17, %v1562_v10  ;;  %v2111_v53 = vrot.slane %v2105_v55, 5  ;;  %v2113_v63 = vrot.slane %v2106_v51, 5 }
 0x24b   : > { %v2072_v13 = vsel %vm409_vm7, %v2069_v37, %v2071_v57 }
 0x24c   : > { %v1604_v15 = vadd.f32 %v1600_v1, %v1582_v41  ;;  %v2082_v1 = vmul.f32 %v3669_v59, %v2081_v19 }
 0x24d   : > { %2009 = vrot.lane.b32.xlu1 %v2006_v58, %s2711_s25  ;;  %v2123_v58 = vstv %s2449_s29 }
 0x24e   : > { %v2088_v43 = vrot.slane %v2082_v1, 4  ;;  %v2125_v52 = vmul.f32 %v3664_v60, %v2123_v58 }
 0x24f   : > { %1989 = vrot.lane.b32.xlu2 %v1986_v11, %s2711_s25  ;;  %2031 = vrot.lane.b32.xlu0 %v2028_v6, %s2711_s25  ;;  %v1598_v2 = vpop.permute.xlu1 %1597  ;;  %v2114_v11 = vsel %vm444_vm8, %v2111_v53, %v2113_v63  ;;  %v2124_v6 = vmul.f32 %v3669_v59, %v2123_v58 }
 0x250   : > { %v1603_v38 = vadd.f32 %v1598_v2, %v1581_v61  ;;  %v2084_v61 = vmul.f32 %v3703_v49, %v2081_v19  ;;  %v2090_v54 = vsel %vm409_vm7, %v2088_v43, %v2089_v32  ;;  %v2104_v2 = vmul.f32 %v3642_v12, %v2103_v36 }
 0x251   : > { %v1648_v20 = vpop.permute.xlu2 %1647  ;;  %v1618_v0 = vpop.permute.xlu0 %1617  ;;  %v2131_v9 = vrot.slane %v2125_v52, 5  ;;  %v2130_v44 = vrot.slane %v2124_v6, 5  ;;  %v2126_v19 = vmul.f32 %v3703_v49, %v2123_v58 }
 0x252   : > { %v1623_v21 = vadd.f32 %v1618_v0, %v1603_v38  ;;  %v2091_v62 = vrot.slane %v2084_v61, 4  ;;  %v2110_v18 = vrot.slane %v2104_v2, 5 }
 0x254   : > { %v1638_v26 = vadd.f32 %v1633_v31, %v1623_v21  ;;  %v2092_v27 = vsel %vm409_vm7, %v2089_v32, %v2091_v62 }
 0x255   : > { %2033 = vrot.lane.b32.xlu1 %v2030_v24, %s2711_s25  ;;  %v2132_v24 = vsel %vm444_vm8, %v2130_v44, %v2131_v9 }
 0x257   : > { %2011 = vrot.lane.b32.xlu2 %v2008_v30, %s2711_s25  ;;  %2053 = vrot.lane.b32.xlu0 %v2050_v50, %s2711_s25  ;;  %v1620_v5 = vpop.permute.xlu1 %1619  ;;  %v2165_v30 = vstv %s2451_s27  ;;  %v2112_v50 = vsel %vm444_vm8, %v2110_v18, %v2111_v53 }
 0x258   : > { %v1624_v35 = vadd.f32 %v1620_v5, %v1604_v15  ;;  %v2167_v29 = vmul.f32 %v3664_v60, %v2165_v30  ;;  %v2168_v8 = vmul.f32 %v3703_v49, %v2165_v30  ;;  %v2166_v43 = vmul.f32 %v3669_v59, %v2165_v30 }
 0x259   : > { %v1688_v33 = vpop.permute.xlu2 %1687  ;;  %v1635_v28 = vpop.permute.xlu0 %1634 }
 0x25a   : > { %v1639_v34 = vadd.f32 %v1635_v28, %v1624_v35  ;;  %v2173_v28 = vrot.slane %v2167_v29, 6  ;;  %v2172_v36 = vrot.slane %v2166_v43, 6 }
 0x25c   : > { %v1652_v40 = vadd.f32 %v1648_v20, %v1639_v34  ;;  %v2146_v20 = vmul.f32 %v3642_v12, %v2145_v7  ;;  %v2175_v34 = vrot.slane %v2168_v8, 6 }
 0x25d   : > { %2073 = vrot.lane.b32.xlu1 %v2070_v42, %s2711_s25 }
 0x25e   : > { %v2152_v22 = vrot.slane %v2146_v20, 6  ;;  %v2176_v49 = vsel %vm479_vm9, %v2173_v28, %v2175_v34 }
 0x25f   : > { %2051 = vrot.lane.b32.xlu2 %v2048_v48, %s2711_s25  ;;  %2093 = vrot.lane.b32.xlu0 %v2090_v54, %s2711_s25  ;;  %v1646_v10 = vpop.permute.xlu1 %1645  ;;  %v2174_v54 = vsel %vm479_vm9, %v2172_v36, %v2173_v28 }
 0x260   : > { %v1651_v56 = vadd.f32 %v1646_v10, %v1638_v26  ;;  %v2154_v12 = vsel %vm479_vm9, %v2152_v22, %v2153_v14 }
 0x261   : > { %v1712_v31 = vpop.permute.xlu2 %1711  ;;  %v1668_v17 = vpop.permute.xlu0 %1667 }
 0x262   : > { %v1673_v41 = vadd.f32 %v1668_v17, %v1651_v56 }
 0x264   : > { %v1693_v15 = vadd.f32 %v1688_v33, %v1673_v41  ;;  %v2133_v33 = vrot.slane %v2126_v19, 5 }
 0x265   : > { %2095 = vrot.lane.b32.xlu1 %v2092_v27, %s2711_s25 }
 0x266   : > { %v2134_v60 = vsel %vm444_vm8, %v2131_v9, %v2133_v33 }
 0x267   : > { %2075 = vrot.lane.b32.xlu2 %v2072_v13, %s2711_s25  ;;  %2117 = vrot.lane.b32.xlu0 %v2114_v11, %s2711_s25  ;;  %v1670_v46 = vpop.permute.xlu1 %1669 }
 0x268   : > { %v1674_v38 = vadd.f32 %v1670_v46, %v1652_v40 }
 0x269   : > { %v1752_v0 = vpop.permute.xlu2 %1751  ;;  %v1690_v21 = vpop.permute.xlu0 %1689 }
 0x26a   : > { %v1694_v25 = vadd.f32 %v1690_v21, %v1674_v38 }
 0x26c   : > { %v1716_v26 = vadd.f32 %v1712_v31, %v1694_v25 }
 0x26d   : > { %2135 = vrot.lane.b32.xlu1 %v2132_v24, %s2711_s25 }
 0x26f   : > { %2115 = vrot.lane.b32.xlu2 %v2112_v50, %s2711_s25  ;;  %2157 = vrot.lane.b32.xlu0 %v2154_v12, %s2711_s25  ;;  %v1710_v5 = vpop.permute.xlu1 %1709 }
 0x270   : > { %v1715_v47 = vadd.f32 %v1710_v5, %v1693_v15 }
 0x271   : > { %v1774_v35 = vpop.permute.xlu2 %1773  ;;  %v1730_v37 = vpop.permute.xlu0 %1729 }
 0x272   : > { %v1735_v1 = vadd.f32 %v1730_v37, %v1715_v47 }
 0x274   : > { %v1757_v32 = vadd.f32 %v1752_v0, %v1735_v1 }
 0x275   : > { %2159 = vrot.lane.b32.xlu1 %v2156_v16, %s2711_s25 }
 0x277   : > { %2137 = vrot.lane.b32.xlu2 %v2134_v60, %s2711_s25  ;;  %2179 = vrot.lane.b32.xlu0 %v2176_v49, %s2711_s25  ;;  %v1732_v39 = vpop.permute.xlu1 %1731 }
 0x278   : > { %v1736_v42 = vadd.f32 %v1732_v39, %v1716_v26 }
 0x279   : > { %v1814_v61 = vpop.permute.xlu2 %1813  ;;  %v1754_v40 = vpop.permute.xlu0 %1753 }
 0x27a   : > { %v1758_v45 = vadd.f32 %v1754_v40, %v1736_v42 }
 0x27c   : > { %v1778_v48 = vadd.f32 %v1774_v35, %v1758_v45 }
 0x27f   : > { %2177 = vrot.lane.b32.xlu2 %v2174_v54, %s2711_s25  ;;  %v1772_v55 = vpop.permute.xlu1 %1771  ;;  %s2240_s25 = sshll.u32 %s2237_s23, 4  ;;  %s2241_s25 = int_to_ptr.hbm [resolvable:$true] %s2240_s25 }
 0x280   : > { %v1777_v15 = vadd.f32 %v1772_v55, %v1757_v32  ;;  %s2626_s17 = sshra.s32 %s2241_s25, 4  ;;  %s2627_s17 = int_to_ptr.hbm [resolvable:$true] %s2626_s17 }
 0x281   : > { %v1838_v51 = vpop.permute.xlu2 %1837  ;;  %v1794_v10 = vpop.permute.xlu0 %1793  ;;  %s2628_s3 = scalar_lea.hbm %s2627_s17, 16  ;;  %p2633_p11 = scmp.lt.s32.totalorder %s2627_s17, %s3844_s2 }
 0x282   : > { %v1799_v13 = vadd.f32 %v1794_v10, %v1777_v15  ;;  %p2629_p3 = scmp.ne.s32.totalorder %s2627_s17, %s2628_s3  ;;  %p2634_p12 = scmp.lt.s32.totalorder %s2632_s26, %s2628_s3 }
 0x284   : > { %v1819_v46 = vadd.f32 %v1814_v61, %v1799_v13  ;;  %p2630_p5 = pnand %p2629_p3, %p2781_p8  ;;  %p2635_p0 = por %p2634_p12, %p2633_p11 }
 0x286   : > { %p2631_p7 = pneg %p2630_p5 }
 0x287   : > { %v1796_v56 = vpop.permute.xlu1 %1795 }
 0x288   : > { %v1800_v3 = vadd.f32 %v1796_v56, %v1778_v48  ;;  %p2636_p1 = pnand %p2635_p0, %p2631_p7 }
 0x289   : > { %v1878_v62 = vpop.permute.xlu2 %1877  ;;  %v1816_v31 = vpop.permute.xlu0 %1815 }
 0x28a   : > { %v1820_v9 = vadd.f32 %v1816_v31, %v1800_v3 }
 0x28c   : > { %v1842_v25 = vadd.f32 %v1838_v51, %v1820_v9 }
 0x28f   : > { %v1836_v17 = vpop.permute.xlu1 %1835 }
 0x290   : > { %v1841_v2 = vadd.f32 %v1836_v17, %v1819_v46 }
 0x291   : > { %v1900_v41 = vpop.permute.xlu2 %1899  ;;  %v1856_v57 = vpop.permute.xlu0 %1855 }
 0x292   : > { %v1861_v21 = vadd.f32 %v1856_v57, %v1841_v2 }
 0x294   : > { %v1883_v14 = vadd.f32 %v1878_v62, %v1861_v21 }
 0x297   : > { %v1858_v53 = vpop.permute.xlu1 %1857 }
 0x298   : > { %v1862_v44 = vadd.f32 %v1858_v53, %v1842_v25 }
 0x299   : > { %v1926_v59 = vpop.permute.xlu2 %1925  ;;  %v1880_v63 = vpop.permute.xlu0 %1879 }
 0x29a   : > { %v1884_v23 = vadd.f32 %v1880_v63, %v1862_v44 }
 0x29c   : > { %v1904_v30 = vadd.f32 %v1900_v41, %v1884_v23 }
 0x29f   : > { %v1898_v58 = vpop.permute.xlu1 %1897 }
 0x2a0   : > { %v1903_v24 = vadd.f32 %v1898_v58, %v1883_v14 }
 0x2a1   : > { %v1950_v27 = vpop.permute.xlu2 %1949  ;;  %v1913_v52 = vpop.permute.xlu0 %1912 }
 0x2a2   : > { %v1918_v19 = vadd.f32 %v1913_v52, %v1903_v24 }
 0x2a4   : > { %v1931_v29 = vadd.f32 %v1926_v59, %v1918_v19 }
 0x2a7   : > { %v1915_v7 = vpop.permute.xlu1 %1914 }
 0x2a8   : > { %v1919_v12 = vadd.f32 %v1915_v7, %v1904_v30 }
 0x2a9   : > { %v1990_v11 = vpop.permute.xlu2 %1989  ;;  %v1928_v6 = vpop.permute.xlu0 %1927 }
 0x2aa   : > { %v1932_v47 = vadd.f32 %v1928_v6, %v1919_v12 }
 0x2ac   : > { %v1954_v1 = vadd.f32 %v1950_v27, %v1932_v47 }
 0x2af   : > { %v1948_v38 = vpop.permute.xlu1 %1947 }
 0x2b0   : > { %v1953_v5 = vadd.f32 %v1948_v38, %v1931_v29 }
 0x2b1   : > { %v2012_v20 = vpop.permute.xlu2 %2011  ;;  %v1968_v0 = vpop.permute.xlu0 %1967 }
 0x2b2   : > { %v1973_v35 = vadd.f32 %v1968_v0, %v1953_v5 }
 0x2b4   : > { %v1995_v34 = vadd.f32 %v1990_v11, %v1973_v35 }
 0x2b7   : > { %v1970_v18 = vpop.permute.xlu1 %1969 }
 0x2b8   : > { %v1974_v28 = vadd.f32 %v1970_v18, %v1954_v1 }
 0x2b9   : > { %v1992_v22 = vpop.permute.xlu0 %1991  ;;  %v2052_v26 = vpop.permute.xlu2 %2051 }
 0x2ba   : > { %v1996_v32 = vadd.f32 %v1992_v22, %v1974_v28 }
 0x2bc   : > { %v2016_v43 = vadd.f32 %v2012_v20, %v1996_v32 }
 0x2bf   : > { %v2010_v50 = vpop.permute.xlu1 %2009 }
 0x2c0   : > { %v2015_v16 = vadd.f32 %v2010_v50, %v1995_v34 }
 0x2c1   : > { %v2032_v8 = vpop.permute.xlu0 %2031  ;;  %v2076_v4 = vpop.permute.xlu2 %2075 }
 0x2c2   : > { %v2037_v39 = vadd.f32 %v2032_v8, %v2015_v16 }
 0x2c4   : > { %v2057_v40 = vadd.f32 %v2052_v26, %v2037_v39 }
 0x2c7   : > { %v2034_v37 = vpop.permute.xlu1 %2033 }
 0x2c8   : > { %v2038_v61 = vadd.f32 %v2034_v37, %v2016_v43 }
 0x2c9   : > { %v2054_v33 = vpop.permute.xlu0 %2053  ;;  %v2116_v60 = vpop.permute.xlu2 %2115 }
 0x2ca   : > { %v2058_v48 = vadd.f32 %v2054_v33, %v2038_v61 }
 0x2cc   : > { %v2080_v10 = vadd.f32 %v2076_v4, %v2058_v48 }
 0x2cf   : > { %v2074_v49 = vpop.permute.xlu1 %2073 }
 0x2d0   : > { %v2079_v45 = vadd.f32 %v2074_v49, %v2057_v40 }
 0x2d1   : > { %v2094_v42 = vpop.permute.xlu0 %2093  ;;  %v2138_v54 = vpop.permute.xlu2 %2137 }
 0x2d2   : > { %v2099_v51 = vadd.f32 %v2094_v42, %v2079_v45 }
 0x2d4   : > { %v2121_v62 = vadd.f32 %v2116_v60, %v2099_v51 }
 0x2d7   : > { %v2096_v36 = vpop.permute.xlu1 %2095 }
 0x2d8   : > { %v2100_v56 = vadd.f32 %v2096_v36, %v2080_v10 }
 0x2d9   : > { %v2118_v55 = vpop.permute.xlu0 %2117  ;;  %v2178_v59 = vpop.permute.xlu2 %2177 }
 0x2da   : > { %v2122_v57 = vadd.f32 %v2118_v55, %v2100_v56 }
 0x2dc   : > { %v2142_v27 = vadd.f32 %v2138_v54, %v2122_v57 }
 0x2df   : > { %v2136_v31 = vpop.permute.xlu1 %2135 }
 0x2e0   : > { %v2141_v17 = vadd.f32 %v2136_v31, %v2121_v62 }
 0x2e1   : > { %v2158_v41 = vpop.permute.xlu0 %2157 }
 0x2e2   : > { %v2163_v53 = vadd.f32 %v2158_v41, %v2141_v17 }
 0x2e4   : > { %v2183_v63 = vadd.f32 %v2178_v59, %v2163_v53 }
 0x2e6   : > { %v2452_v58 = vmul.f32 -1.442695, %v2183_v63 }
 0x2e7   : > { %v2160_v52 = vpop.permute.xlu1 %2159 }
 0x2e8   : > { %2547 = vpow2.f32 %v2452_v58  ;;  %v2164_v15 = vadd.f32 %v2160_v52, %v2142_v27 }
 0x2e9   : > { %v2180_v7 = vpop.permute.xlu0 %2179 }
 0x2ea   : > { %v2184_v13 = vadd.f32 %v2180_v7, %v2164_v15 }
 0x2ec   : > { %v2453_v11 = vmul.f32 -1.442695, %v2184_v13 }
 0x2ee   : > { %v2548_v6 = vpop.eup %2547  ;;  %2549 = vpow2.f32 %v2453_v11 }
 0x2ef   : > { %v2191_v3 = vadd.f32 1.0, %v2548_v6 }
 0x2f1   : > { %2551 = vrcp.f32 %v2191_v3  ;;  %v2204_v0 = vand.u32 2147483648, %v2191_v3  ;;  %v2202_v25 = vand.u32 2147483647, %v2191_v3  ;;  %vm2198_vm11 = vweird.f32 %v2191_v3 }
 0x2f3   : > { %v2205_v24 = vor.u32 1.1754944e-38, %v2204_v0  ;;  %vm2203_vm13 = vcmp.eq.f32.partialorder %v2202_v25, 8.507059e+37 }
 0x2f4   : > { %v2550_v46 = vpop.eup %2549 }
 0x2f5   : > { %v2192_v2 = vadd.f32 1.0, %v2550_v46 }
 0x2f7   : > { %v2552_v38 = vpop.eup %2551  ;;  %2553 = vrcp.f32 %v2192_v2  ;;  %v2219_v26 = vand.u32 2147483648, %v2192_v2  ;;  %v2217_v50 = vand.u32 2147483647, %v2192_v2  ;;  %vm2213_vm15 = vweird.f32 %v2192_v2 }
 0x2f8   : > { %v2194_v9 = vmul.f32 %v2552_v38, %v2191_v3  ;;  %vm2199_vm10 = vweird.f32 %v2552_v38 }
 0x2f9   : > { %vm2200_vm12 = vmor %vm2198_vm11, %vm2199_vm10  ;;  %v2220_v29 = vor.u32 1.1754944e-38, %v2219_v26  ;;  %vm2218_vm2 = vcmp.eq.f32.partialorder %v2217_v50, 8.507059e+37 }
 0x2fa   : > { %v2195_v20 = vsub.f32 1.0, %v2194_v9 }
 0x2fc   : > { %v2196_v21 = vmul.f32 %v2552_v38, %v2195_v20 }
 0x2fd   : > { %v2554_v44 = vpop.eup %2553 }
 0x2fe   : > { %v2209_v14 = vmul.f32 %v2554_v44, %v2192_v2  ;;  %v2197_v18 = vadd.f32 %v2552_v38, %v2196_v21  ;;  %vm2214_vm14 = vweird.f32 %v2554_v44 }
 0x2ff   : > { %vm2215_vm1 = vmor %vm2213_vm15, %vm2214_vm14 }
 0x300   : > { %v2210_v22 = vsub.f32 1.0, %v2209_v14  ;;  %v2201_v23 = vsel %vm2200_vm12, %v2552_v38, %v2197_v18 }
 0x301   : > { %v2206_v19 = vsel %vm2203_vm13, %v2205_v24, %v2201_v23 }
 0x302   : > { %v2211_v30 = vmul.f32 %v2554_v44, %v2210_v22  ;;  %2223 = vst.msk [vmem:[%s194_s12] sm:$0xff] %vm200_vm0, %v2206_v19 }
 0x304   : > { %v2212_v12 = vadd.f32 %v2554_v44, %v2211_v30 }
 0x306   : > { %v2216_v8 = vsel %vm2215_vm1, %v2554_v44, %v2212_v12 }
 0x307   : > { %v2221_v5 = vsel %vm2218_vm2, %v2220_v29, %v2216_v8 }
 0x308   : > { %2224 = vst.msk [vmem:[%s194_s12 + $0x8] sm:$0xff] %vm200_vm0, %v2221_v5 }
 0x309   : > { %2639 = shalt.err (!%p2636_p1)
}
 0x30a   : > { %s2712_s4 = smov 128   ;;  %s2713_s16 = smov 8  }
 0x30b   : > { %2467 = dma.vmem_to_hbm [thread:$0]  (%p2781_p8), %s2239_s24, 256, %s2241_s25, %s2226_s30, %s2712_s4, %s2712_s4, %s2713_s16  }
 0x30c PF: > { %s2255_s27 = sand.u32 1, %s2678_s9   ;;  %p2478_p2 = pnand %p2341_p13, %p2785_p9 }
 0x30d   : > { %s2256_s6 = scalar_lea.sflag [#allocation8], %s2255_s27 }
 0x30e   : > { %p2479_p4 = pneg %p2478_p2 }
 0x310   : > { %2673 = dma.done.wait (%p2479_p4), %s2256_s6, 256  }
 0x311   : > { %2675 = vsyncadd (%p2479_p4), %s2256_s6, 4294967040  ;;  %s19_s14 = sadd.s32 1, %s2698_s14   ;;  %s3852_s9 = smov %s2682_s10 }
 0x312   : > { %p16_p6 = scmp.ge.s32.totalorder %s19_s14, 4   ;;  %s3853_s10 = smov %s2686_s11 }
 0x313   : > { %s3854_s11 = smov %s2823_s19  ;;  %s3855_s12 = smov %s2694_s13 }
 0x314   : > { %s3856_s13 = smov %s3858_s28  ;;  %18 = sbr.rel (!%p16_p6) target bundleno = 7 (0x7), region = 89 }
 0x319   :  { %2262 = vsyncpa [#allocation7], 1 }
 0x31a   :  { %2264 = vsyncpa [#allocation7 + $0x1], 1 }
 0x31b   :  { %2265 = vsyncpa [#allocation8], 1 }
 0x31c   :  { %2267 = vsyncpa [#allocation8 + $0x1], 1 }
 0x31d   :  { %2268 = vsyncpa [#allocation9], 1 }
 0x31e   :  { %2270 = vsyncpa [#allocation9 + $0x1], 1 }

</bundles_post_ra>
